<compile_context>
chip_gen: v7x
topology: tpu7x:2x2x1
jax: 0.10.0
libtpu: 0.0.40
codegen_flags: <defaults>
</compile_context>

<pallas_src>
import jax
import jax.numpy as jnp
from jax.experimental import pallas as pl
from jax.experimental.pallas import tpu as pltpu


C1 = 10       # conv1 out channels
C2 = 20       # conv2 out channels
K1P = 32      # conv1 im2col contraction dim, padded 25 -> 32
LANES = 128   # lane padding used for every channel / feature dimension


# ---------------------------------------------------------------------------
# Fused forward kernel (one image per grid step)
# ---------------------------------------------------------------------------
def _fused_forward_kernel(cols1_ref, w1_ref, b1_ref, w2_ref, b2_ref,
                          wfc1_ref, bfc1_ref, wfc2_ref, bfc2_ref, out_ref):
    f32 = jnp.float32

    # ---- conv1 + bias + 2x2 maxpool + ReLU --------------------------------
    # cols1_ref block: (1, 4, 144, K1P) -- the 4 pooling taps of the conv1
    # im2col; max over taps == maxpool of the conv output.
    w1 = w1_ref[...]                                                  # (K1P, 128)
    t0 = jnp.dot(cols1_ref[0, 0], w1, preferred_element_type=f32)
    t1 = jnp.dot(cols1_ref[0, 1], w1, preferred_element_type=f32)
    t2 = jnp.dot(cols1_ref[0, 2], w1, preferred_element_type=f32)
    t3 = jnp.dot(cols1_ref[0, 3], w1, preferred_element_type=f32)
    p1 = jnp.maximum(jnp.maximum(t0, t1), jnp.maximum(t2, t3))
    p1 = jnp.maximum(p1 + b1_ref[...], 0.0)          # (144, 128), row = 12*ph + pw

    # zero-pad rows 144 -> 160 so all shifted slices below stay in bounds
    x1 = jnp.concatenate([p1, jnp.zeros((16, LANES), f32)], axis=0)   # (160, 128)

    # ---- conv2 + bias: 25 shifted matmuls (rows r = 12*h + w, h<8, w<12) ---
    acc = jnp.zeros((96, LANES), f32)
    for i in range(5):
        for j in range(5):
            off = 12 * i + j
            xs = x1[off:off + 96, :]                                  # (96, 128)
            acc = acc + jnp.dot(xs, w2_ref[5 * i + j],
                                preferred_element_type=f32)
    acc = acc + b2_ref[...]                                           # (96, 128)

    # ---- 2x2 maxpool via shifted maxima (valid at rows r = 24*ph + 2*pw) ---
    accp = jnp.concatenate([acc, jnp.zeros((32, LANES), f32)], axis=0)  # (128,128)
    mh = jnp.maximum(accp[0:112, :], accp[1:113, :])                    # (112,128)
    mv = jnp.maximum(mh[0:96, :], mh[12:108, :])                        # (96, 128)

    # ---- flatten (PyTorch NCHW order) + fc1 + ReLU -------------------------
    # fc1 decomposed per pooled spatial position s = 4*ph + pw:
    #   h1 += relu(pool2[s, :]) @ wfc1r[s],  wfc1r[s, c, u] = W_fc1[u, 16*c + s]
    h1 = bfc1_ref[...]                                                  # (1, 128)
    for s in range(16):
        r = 24 * (s // 4) + 2 * (s % 4)
        row = jnp.maximum(mv[r:r + 1, :], 0.0)                          # (1, 128)
        h1 = h1 + jnp.dot(row, wfc1_ref[s], preferred_element_type=f32)
    h1 = jnp.maximum(h1, 0.0)

    # ---- fc2 + log_softmax (padded logit lanes carry a -1e30 bias) ---------
    logits = jnp.dot(h1, wfc2_ref[...], preferred_element_type=f32) + bfc2_ref[...]
    m = jnp.max(logits, axis=-1, keepdims=True)
    shifted = logits - m
    lse = jnp.log(jnp.sum(jnp.exp(shifted), axis=-1, keepdims=True))
    out_ref[...] = (shifted - lse).reshape(1, 1, LANES)


# ---------------------------------------------------------------------------
# Glue: input im2col (on the raw input only) and weight padding / reordering
# ---------------------------------------------------------------------------
def _prep_x(x_nchw):
    """Raw (N,1,28,28) input -> 4-tap conv1 im2col: (N, 4, 144, K1P)."""
    N = x_nchw.shape[0]
    x = x_nchw.reshape(N, 28, 28).astype(jnp.float32)
    taps = []
    for a in range(2):
        for b in range(2):
            cols = jnp.stack(
                [x[:, a + i:a + i + 24:2, b + j:b + j + 24:2]
                 for i in range(5) for j in range(5)],
                axis=-1,
            )                                          # (N, 12, 12, 25)
            taps.append(cols.reshape(N, 144, 25))
    cols1 = jnp.stack(taps, axis=1)                    # (N, 4, 144, 25)
    return jnp.pad(cols1, ((0, 0), (0, 0), (0, 0), (0, K1P - 25)))


def _prep_params(params):
    f32 = jnp.float32
    w1 = params["w_conv1"].astype(f32).reshape(C1, 25).T              # (25, 10)
    w1p = jnp.zeros((K1P, LANES), f32).at[:25, :C1].set(w1)
    b1p = jnp.zeros((1, LANES), f32).at[0, :C1].set(params["b_conv1"].astype(f32))

    w2 = jnp.transpose(params["w_conv2"].astype(f32), (2, 3, 1, 0)).reshape(25, C1, C2)
    w2p = jnp.zeros((25, LANES, LANES), f32).at[:, :C1, :C2].set(w2)
    b2p = jnp.zeros((1, LANES), f32).at[0, :C2].set(params["b_conv2"].astype(f32))

    # fc1 weight (50, 320) with column index k = c*16 + s  ->  (s, c, u)
    wfc1 = params["w_fc1"].astype(f32).reshape(50, C2, 16)            # (u, c, s)
    wfc1r = jnp.transpose(wfc1, (2, 1, 0))                            # (16, 20, 50)
    wfc1p = jnp.zeros((16, LANES, LANES), f32).at[:, :C2, :50].set(wfc1r)
    bfc1p = jnp.zeros((1, LANES), f32).at[0, :50].set(params["b_fc1"].astype(f32))

    wfc2p = jnp.zeros((LANES, LANES), f32).at[:50, :10].set(params["w_fc2"].astype(f32).T)
    # padded logit lanes get -1e30 so the in-kernel log_softmax ignores them
    bfc2p = jnp.full((1, LANES), -1e30, f32).at[0, :10].set(params["b_fc2"].astype(f32))
    return w1p, b1p, w2p, b2p, wfc1p, bfc1p, wfc2p, bfc2p


@jax.jit
def fgsm_forward(x_nchw, params):
    """Forward pass of FGSM_example_model.  x_nchw: (N, 1, 28, 28) float32."""
    N = x_nchw.shape[0]
    cols1 = _prep_x(x_nchw)
    w1p, b1p, w2p, b2p, wfc1p, bfc1p, wfc2p, bfc2p = _prep_params(params)

    out = pl.pallas_call(
        _fused_forward_kernel,
        out_shape=jax.ShapeDtypeStruct((N, 1, LANES), jnp.float32),
        grid=(N,),
        in_specs=[
            pl.BlockSpec((1, 4, 144, K1P), lambda i: (i, 0, 0, 0)),   # per-image im2col taps
            pl.BlockSpec((K1P, LANES), lambda i: (0, 0)),             # conv1 weight (resident)
            pl.BlockSpec((1, LANES), lambda i: (0, 0)),               # conv1 bias
            pl.BlockSpec((25, LANES, LANES), lambda i: (0, 0, 0)),    # conv2 weight (resident)
            pl.BlockSpec((1, LANES), lambda i: (0, 0)),               # conv2 bias
            pl.BlockSpec((16, LANES, LANES), lambda i: (0, 0, 0)),    # fc1 weight (resident)
            pl.BlockSpec((1, LANES), lambda i: (0, 0)),               # fc1 bias
            pl.BlockSpec((LANES, LANES), lambda i: (0, 0)),           # fc2 weight (resident)
            pl.BlockSpec((1, LANES), lambda i: (0, 0)),               # fc2 bias (pad = -1e30)
        ],
        out_specs=pl.BlockSpec((1, 1, LANES), lambda i: (i, 0, 0)),
        compiler_params=pltpu.CompilerParams(
            dimension_semantics=("parallel",)),
    )(cols1, w1p, b1p, w2p, b2p, wfc1p, bfc1p, wfc2p, bfc2p)

    return out[:, 0, :10]


# ---------------------------------------------------------------------------
# Parameters and a pure-JAX reference (independent path, for validation)
# ---------------------------------------------------------------------------
def init_params(key):
    ks = jax.random.split(key, 8)
    scale = 0.1
    return {
        "w_conv1": scale * jax.random.normal(ks[0], (10, 1, 5, 5), jnp.float32),
        "b_conv1": scale * jax.random.normal(ks[1], (10,), jnp.float32),
        "w_conv2": scale * jax.random.normal(ks[2], (20, 10, 5, 5), jnp.float32),
        "b_conv2": scale * jax.random.normal(ks[3], (20,), jnp.float32),
        "w_fc1": scale * jax.random.normal(ks[4], (50, 320), jnp.float32),
        "b_fc1": scale * jax.random.normal(ks[5], (50,), jnp.float32),
        "w_fc2": scale * jax.random.normal(ks[6], (10, 50), jnp.float32),
        "b_fc2": scale * jax.random.normal(ks[7], (10,), jnp.float32),
    }


def _pool2x2(y):
    N, C, H, W = y.shape
    return y.reshape(N, C, H // 2, 2, W // 2, 2).max(axis=(3, 5))


@jax.jit
def reference_forward(x_nchw, params):
    dn = ("NCHW", "OIHW", "NCHW")
    x = x_nchw.astype(jnp.float32)
    y = jax.lax.conv_general_dilated(x, params["w_conv1"], (1, 1), "VALID",
                                     dimension_numbers=dn)
    y = y + params["b_conv1"][None, :, None, None]
    y = jnp.maximum(_pool2x2(y), 0.0)
    y = jax.lax.conv_general_dilated(y, params["w_conv2"], (1, 1), "VALID",
                                     dimension_numbers=dn)
    y = y + params["b_conv2"][None, :, None, None]
    y = jnp.maximum(_pool2x2(y), 0.0)
    flat = y.reshape(y.shape[0], 320)
    h = jnp.maximum(flat @ params["w_fc1"].T + params["b_fc1"], 0.0)
    logits = h @ params["w_fc2"].T + params["b_fc2"]
    return jax.nn.log_softmax(logits, axis=-1)


if __name__ == "__main__":
    key = jax.random.PRNGKey(0)
    k_param, k_x = jax.random.split(key)
    params = init_params(k_param)
    x = jax.random.normal(k_x, (2, 1, 28, 28), jnp.float32)  # MNIST-shaped input

    out = fgsm_forward(x, params)
    out = jax.block_until_ready(out)
    assert out.shape == (2, 10)

    ref = jax.block_until_ready(reference_forward(x, params))
    err = float(jnp.max(jnp.abs(out - ref)))
    assert err < 5e-2, f"kernel/reference mismatch: max abs err = {err}"

    print("KERNEL_OK")
</pallas_src>

<mosaic_0001>
module attributes {stable_mosaic.version = 11 : i64} {
  func.func @_fused_forward_kernel(%arg0: i32, %arg1: memref<1x4x144x32xf32, #tpu.memory_space<vmem>>, %arg2: memref<32x128xf32, #tpu.memory_space<vmem>>, %arg3: memref<1x128xf32, #tpu.memory_space<vmem>>, %arg4: memref<25x128x128xf32, #tpu.memory_space<vmem>>, %arg5: memref<1x128xf32, #tpu.memory_space<vmem>>, %arg6: memref<16x128x128xf32, #tpu.memory_space<vmem>>, %arg7: memref<1x128xf32, #tpu.memory_space<vmem>>, %arg8: memref<128x128xf32, #tpu.memory_space<vmem>>, %arg9: memref<1x128xf32, #tpu.memory_space<vmem>>, %arg10: memref<1x1x128xf32, #tpu.memory_space<vmem>>) attributes {dimension_semantics = [#tpu.dimension_semantics<parallel>], iteration_bounds = array<i64: 2>, scalar_prefetch = 0 : i64, scratch_operands = 0 : i64, tpu.core_type = #tpu.core_type<tc>, window_params = [{transform_indices = @transform_0, window_bounds = array<i64: 1, 4, 144, 32>}, {pipeline_mode = #tpu.pipeline_mode<synchronous>, transform_indices = @transform_1, window_bounds = array<i64: 32, 128>}, {pipeline_mode = #tpu.pipeline_mode<synchronous>, transform_indices = @transform_2, window_bounds = array<i64: 1, 128>}, {pipeline_mode = #tpu.pipeline_mode<synchronous>, transform_indices = @transform_3, window_bounds = array<i64: 25, 128, 128>}, {pipeline_mode = #tpu.pipeline_mode<synchronous>, transform_indices = @transform_4, window_bounds = array<i64: 1, 128>}, {pipeline_mode = #tpu.pipeline_mode<synchronous>, transform_indices = @transform_5, window_bounds = array<i64: 16, 128, 128>}, {pipeline_mode = #tpu.pipeline_mode<synchronous>, transform_indices = @transform_6, window_bounds = array<i64: 1, 128>}, {pipeline_mode = #tpu.pipeline_mode<synchronous>, transform_indices = @transform_7, window_bounds = array<i64: 128, 128>}, {pipeline_mode = #tpu.pipeline_mode<synchronous>, transform_indices = @transform_8, window_bounds = array<i64: 1, 128>}, {transform_indices = @transform_9, window_bounds = array<i64: 1, 1, 128>}]} {
    %c0 = arith.constant 0 : index
    %c0_0 = arith.constant 0 : index
    %0 = vector.load %arg2[%c0, %c0_0] : memref<32x128xf32, #tpu.memory_space<vmem>>, vector<32x128xf32>
    %c0_1 = arith.constant 0 : index
    %c0_2 = arith.constant 0 : index
    %c0_3 = arith.constant 0 : index
    %c0_4 = arith.constant 0 : index
    %1 = vector.load %arg1[%c0_1, %c0_2, %c0_3, %c0_4] : memref<1x4x144x32xf32, #tpu.memory_space<vmem>>, vector<1x1x144x32xf32>
    %2 = vector.shape_cast %1 : vector<1x1x144x32xf32> to vector<144x32xf32>
    %cst = arith.constant dense<0.000000e+00> : vector<144x128xf32>
    %3 = tpu.matmul %2, %0, %cst {dimension_numbers = #tpu.dot_dimension_numbers<[1], [0], [0], [1], [0, 0, 1, 1], [], []>} : vector<144x32xf32>, vector<32x128xf32>, vector<144x128xf32> -> vector<144x128xf32>
    %c0_5 = arith.constant 0 : index
    %c1 = arith.constant 1 : index
    %c0_6 = arith.constant 0 : index
    %c0_7 = arith.constant 0 : index
    %4 = vector.load %arg1[%c0_5, %c1, %c0_6, %c0_7] : memref<1x4x144x32xf32, #tpu.memory_space<vmem>>, vector<1x1x144x32xf32>
    %5 = vector.shape_cast %4 : vector<1x1x144x32xf32> to vector<144x32xf32>
    %cst_8 = arith.constant dense<0.000000e+00> : vector<144x128xf32>
    %6 = tpu.matmul %5, %0, %cst_8 {dimension_numbers = #tpu.dot_dimension_numbers<[1], [0], [0], [1], [0, 0, 1, 1], [], []>} : vector<144x32xf32>, vector<32x128xf32>, vector<144x128xf32> -> vector<144x128xf32>
    %c0_9 = arith.constant 0 : index
    %c2 = arith.constant 2 : index
    %c0_10 = arith.constant 0 : index
    %c0_11 = arith.constant 0 : index
    %7 = vector.load %arg1[%c0_9, %c2, %c0_10, %c0_11] : memref<1x4x144x32xf32, #tpu.memory_space<vmem>>, vector<1x1x144x32xf32>
    %8 = vector.shape_cast %7 : vector<1x1x144x32xf32> to vector<144x32xf32>
    %cst_12 = arith.constant dense<0.000000e+00> : vector<144x128xf32>
    %9 = tpu.matmul %8, %0, %cst_12 {dimension_numbers = #tpu.dot_dimension_numbers<[1], [0], [0], [1], [0, 0, 1, 1], [], []>} : vector<144x32xf32>, vector<32x128xf32>, vector<144x128xf32> -> vector<144x128xf32>
    %c0_13 = arith.constant 0 : index
    %c3 = arith.constant 3 : index
    %c0_14 = arith.constant 0 : index
    %c0_15 = arith.constant 0 : index
    %10 = vector.load %arg1[%c0_13, %c3, %c0_14, %c0_15] : memref<1x4x144x32xf32, #tpu.memory_space<vmem>>, vector<1x1x144x32xf32>
    %11 = vector.shape_cast %10 : vector<1x1x144x32xf32> to vector<144x32xf32>
    %cst_16 = arith.constant dense<0.000000e+00> : vector<144x128xf32>
    %12 = tpu.matmul %11, %0, %cst_16 {dimension_numbers = #tpu.dot_dimension_numbers<[1], [0], [0], [1], [0, 0, 1, 1], [], []>} : vector<144x32xf32>, vector<32x128xf32>, vector<144x128xf32> -> vector<144x128xf32>
    %13 = arith.maximumf %3, %6 : vector<144x128xf32>
    %14 = arith.maximumf %9, %12 : vector<144x128xf32>
    %15 = arith.maximumf %13, %14 : vector<144x128xf32>
    %c0_17 = arith.constant 0 : index
    %c0_18 = arith.constant 0 : index
    %16 = vector.load %arg3[%c0_17, %c0_18] : memref<1x128xf32, #tpu.memory_space<vmem>>, vector<1x128xf32>
    %17 = vector.broadcast %16 : vector<1x128xf32> to vector<144x128xf32>
    %18 = arith.addf %15, %17 : vector<144x128xf32>
    %cst_19 = arith.constant 0.000000e+00 : f32
    %19 = vector.broadcast %cst_19 : f32 to vector<144x128xf32>
    %20 = arith.maximumf %18, %19 : vector<144x128xf32>
    %cst_20 = arith.constant 0.000000e+00 : f32
    %21 = vector.broadcast %cst_20 : f32 to vector<16x128xf32>
    %22 = tpu.concatenate %20, %21 in 0 : vector<144x128xf32>, vector<16x128xf32> -> vector<160x128xf32>
    %cst_21 = arith.constant 0.000000e+00 : f32
    %23 = vector.broadcast %cst_21 : f32 to vector<96x128xf32>
    %24 = vector.extract_strided_slice %22 {offsets = [0, 0], sizes = [96, 128], strides = [1, 1]} : vector<160x128xf32> to vector<96x128xf32>
    %c0_22 = arith.constant 0 : index
    %c0_23 = arith.constant 0 : index
    %c0_24 = arith.constant 0 : index
    %25 = vector.load %arg4[%c0_22, %c0_23, %c0_24] : memref<25x128x128xf32, #tpu.memory_space<vmem>>, vector<1x128x128xf32>
    %26 = vector.shape_cast %25 : vector<1x128x128xf32> to vector<128x128xf32>
    %cst_25 = arith.constant dense<0.000000e+00> : vector<96x128xf32>
    %27 = tpu.matmul %24, %26, %cst_25 {dimension_numbers = #tpu.dot_dimension_numbers<[1], [0], [0], [1], [0, 0, 1, 1], [], []>} : vector<96x128xf32>, vector<128x128xf32>, vector<96x128xf32> -> vector<96x128xf32>
    %28 = arith.addf %23, %27 : vector<96x128xf32>
    %29 = vector.extract_strided_slice %22 {offsets = [1, 0], sizes = [96, 128], strides = [1, 1]} : vector<160x128xf32> to vector<96x128xf32>
    %c1_26 = arith.constant 1 : index
    %c0_27 = arith.constant 0 : index
    %c0_28 = arith.constant 0 : index
    %30 = vector.load %arg4[%c1_26, %c0_27, %c0_28] : memref<25x128x128xf32, #tpu.memory_space<vmem>>, vector<1x128x128xf32>
    %31 = vector.shape_cast %30 : vector<1x128x128xf32> to vector<128x128xf32>
    %cst_29 = arith.constant dense<0.000000e+00> : vector<96x128xf32>
    %32 = tpu.matmul %29, %31, %cst_29 {dimension_numbers = #tpu.dot_dimension_numbers<[1], [0], [0], [1], [0, 0, 1, 1], [], []>} : vector<96x128xf32>, vector<128x128xf32>, vector<96x128xf32> -> vector<96x128xf32>
    %33 = arith.addf %28, %32 : vector<96x128xf32>
    %34 = vector.extract_strided_slice %22 {offsets = [2, 0], sizes = [96, 128], strides = [1, 1]} : vector<160x128xf32> to vector<96x128xf32>
    %c2_30 = arith.constant 2 : index
    %c0_31 = arith.constant 0 : index
    %c0_32 = arith.constant 0 : index
    %35 = vector.load %arg4[%c2_30, %c0_31, %c0_32] : memref<25x128x128xf32, #tpu.memory_space<vmem>>, vector<1x128x128xf32>
    %36 = vector.shape_cast %35 : vector<1x128x128xf32> to vector<128x128xf32>
    %cst_33 = arith.constant dense<0.000000e+00> : vector<96x128xf32>
    %37 = tpu.matmul %34, %36, %cst_33 {dimension_numbers = #tpu.dot_dimension_numbers<[1], [0], [0], [1], [0, 0, 1, 1], [], []>} : vector<96x128xf32>, vector<128x128xf32>, vector<96x128xf32> -> vector<96x128xf32>
    %38 = arith.addf %33, %37 : vector<96x128xf32>
    %39 = vector.extract_strided_slice %22 {offsets = [3, 0], sizes = [96, 128], strides = [1, 1]} : vector<160x128xf32> to vector<96x128xf32>
    %c3_34 = arith.constant 3 : index
    %c0_35 = arith.constant 0 : index
    %c0_36 = arith.constant 0 : index
    %40 = vector.load %arg4[%c3_34, %c0_35, %c0_36] : memref<25x128x128xf32, #tpu.memory_space<vmem>>, vector<1x128x128xf32>
    %41 = vector.shape_cast %40 : vector<1x128x128xf32> to vector<128x128xf32>
    %cst_37 = arith.constant dense<0.000000e+00> : vector<96x128xf32>
    %42 = tpu.matmul %39, %41, %cst_37 {dimension_numbers = #tpu.dot_dimension_numbers<[1], [0], [0], [1], [0, 0, 1, 1], [], []>} : vector<96x128xf32>, vector<128x128xf32>, vector<96x128xf32> -> vector<96x128xf32>
    %43 = arith.addf %38, %42 : vector<96x128xf32>
    %44 = vector.extract_strided_slice %22 {offsets = [4, 0], sizes = [96, 128], strides = [1, 1]} : vector<160x128xf32> to vector<96x128xf32>
    %c4 = arith.constant 4 : index
    %c0_38 = arith.constant 0 : index
    %c0_39 = arith.constant 0 : index
    %45 = vector.load %arg4[%c4, %c0_38, %c0_39] : memref<25x128x128xf32, #tpu.memory_space<vmem>>, vector<1x128x128xf32>
    %46 = vector.shape_cast %45 : vector<1x128x128xf32> to vector<128x128xf32>
    %cst_40 = arith.constant dense<0.000000e+00> : vector<96x128xf32>
    %47 = tpu.matmul %44, %46, %cst_40 {dimension_numbers = #tpu.dot_dimension_numbers<[1], [0], [0], [1], [0, 0, 1, 1], [], []>} : vector<96x128xf32>, vector<128x128xf32>, vector<96x128xf32> -> vector<96x128xf32>
    %48 = arith.addf %43, %47 : vector<96x128xf32>
    %49 = vector.extract_strided_slice %22 {offsets = [12, 0], sizes = [96, 128], strides = [1, 1]} : vector<160x128xf32> to vector<96x128xf32>
    %c5 = arith.constant 5 : index
    %c0_41 = arith.constant 0 : index
    %c0_42 = arith.constant 0 : index
    %50 = vector.load %arg4[%c5, %c0_41, %c0_42] : memref<25x128x128xf32, #tpu.memory_space<vmem>>, vector<1x128x128xf32>
    %51 = vector.shape_cast %50 : vector<1x128x128xf32> to vector<128x128xf32>
    %cst_43 = arith.constant dense<0.000000e+00> : vector<96x128xf32>
    %52 = tpu.matmul %49, %51, %cst_43 {dimension_numbers = #tpu.dot_dimension_numbers<[1], [0], [0], [1], [0, 0, 1, 1], [], []>} : vector<96x128xf32>, vector<128x128xf32>, vector<96x128xf32> -> vector<96x128xf32>
    %53 = arith.addf %48, %52 : vector<96x128xf32>
    %54 = vector.extract_strided_slice %22 {offsets = [13, 0], sizes = [96, 128], strides = [1, 1]} : vector<160x128xf32> to vector<96x128xf32>
    %c6 = arith.constant 6 : index
    %c0_44 = arith.constant 0 : index
    %c0_45 = arith.constant 0 : index
    %55 = vector.load %arg4[%c6, %c0_44, %c0_45] : memref<25x128x128xf32, #tpu.memory_space<vmem>>, vector<1x128x128xf32>
    %56 = vector.shape_cast %55 : vector<1x128x128xf32> to vector<128x128xf32>
    %cst_46 = arith.constant dense<0.000000e+00> : vector<96x128xf32>
    %57 = tpu.matmul %54, %56, %cst_46 {dimension_numbers = #tpu.dot_dimension_numbers<[1], [0], [0], [1], [0, 0, 1, 1], [], []>} : vector<96x128xf32>, vector<128x128xf32>, vector<96x128xf32> -> vector<96x128xf32>
    %58 = arith.addf %53, %57 : vector<96x128xf32>
    %59 = vector.extract_strided_slice %22 {offsets = [14, 0], sizes = [96, 128], strides = [1, 1]} : vector<160x128xf32> to vector<96x128xf32>
    %c7 = arith.constant 7 : index
    %c0_47 = arith.constant 0 : index
    %c0_48 = arith.constant 0 : index
    %60 = vector.load %arg4[%c7, %c0_47, %c0_48] : memref<25x128x128xf32, #tpu.memory_space<vmem>>, vector<1x128x128xf32>
    %61 = vector.shape_cast %60 : vector<1x128x128xf32> to vector<128x128xf32>
    %cst_49 = arith.constant dense<0.000000e+00> : vector<96x128xf32>
    %62 = tpu.matmul %59, %61, %cst_49 {dimension_numbers = #tpu.dot_dimension_numbers<[1], [0], [0], [1], [0, 0, 1, 1], [], []>} : vector<96x128xf32>, vector<128x128xf32>, vector<96x128xf32> -> vector<96x128xf32>
    %63 = arith.addf %58, %62 : vector<96x128xf32>
    %64 = vector.extract_strided_slice %22 {offsets = [15, 0], sizes = [96, 128], strides = [1, 1]} : vector<160x128xf32> to vector<96x128xf32>
    %c8 = arith.constant 8 : index
    %c0_50 = arith.constant 0 : index
    %c0_51 = arith.constant 0 : index
    %65 = vector.load %arg4[%c8, %c0_50, %c0_51] : memref<25x128x128xf32, #tpu.memory_space<vmem>>, vector<1x128x128xf32>
    %66 = vector.shape_cast %65 : vector<1x128x128xf32> to vector<128x128xf32>
    %cst_52 = arith.constant dense<0.000000e+00> : vector<96x128xf32>
    %67 = tpu.matmul %64, %66, %cst_52 {dimension_numbers = #tpu.dot_dimension_numbers<[1], [0], [0], [1], [0, 0, 1, 1], [], []>} : vector<96x128xf32>, vector<128x128xf32>, vector<96x128xf32> -> vector<96x128xf32>
    %68 = arith.addf %63, %67 : vector<96x128xf32>
    %69 = vector.extract_strided_slice %22 {offsets = [16, 0], sizes = [96, 128], strides = [1, 1]} : vector<160x128xf32> to vector<96x128xf32>
    %c9 = arith.constant 9 : index
    %c0_53 = arith.constant 0 : index
    %c0_54 = arith.constant 0 : index
    %70 = vector.load %arg4[%c9, %c0_53, %c0_54] : memref<25x128x128xf32, #tpu.memory_space<vmem>>, vector<1x128x128xf32>
    %71 = vector.shape_cast %70 : vector<1x128x128xf32> to vector<128x128xf32>
    %cst_55 = arith.constant dense<0.000000e+00> : vector<96x128xf32>
    %72 = tpu.matmul %69, %71, %cst_55 {dimension_numbers = #tpu.dot_dimension_numbers<[1], [0], [0], [1], [0, 0, 1, 1], [], []>} : vector<96x128xf32>, vector<128x128xf32>, vector<96x128xf32> -> vector<96x128xf32>
    %73 = arith.addf %68, %72 : vector<96x128xf32>
    %74 = vector.extract_strided_slice %22 {offsets = [24, 0], sizes = [96, 128], strides = [1, 1]} : vector<160x128xf32> to vector<96x128xf32>
    %c10 = arith.constant 10 : index
    %c0_56 = arith.constant 0 : index
    %c0_57 = arith.constant 0 : index
    %75 = vector.load %arg4[%c10, %c0_56, %c0_57] : memref<25x128x128xf32, #tpu.memory_space<vmem>>, vector<1x128x128xf32>
    %76 = vector.shape_cast %75 : vector<1x128x128xf32> to vector<128x128xf32>
    %cst_58 = arith.constant dense<0.000000e+00> : vector<96x128xf32>
    %77 = tpu.matmul %74, %76, %cst_58 {dimension_numbers = #tpu.dot_dimension_numbers<[1], [0], [0], [1], [0, 0, 1, 1], [], []>} : vector<96x128xf32>, vector<128x128xf32>, vector<96x128xf32> -> vector<96x128xf32>
    %78 = arith.addf %73, %77 : vector<96x128xf32>
    %79 = vector.extract_strided_slice %22 {offsets = [25, 0], sizes = [96, 128], strides = [1, 1]} : vector<160x128xf32> to vector<96x128xf32>
    %c11 = arith.constant 11 : index
    %c0_59 = arith.constant 0 : index
    %c0_60 = arith.constant 0 : index
    %80 = vector.load %arg4[%c11, %c0_59, %c0_60] : memref<25x128x128xf32, #tpu.memory_space<vmem>>, vector<1x128x128xf32>
    %81 = vector.shape_cast %80 : vector<1x128x128xf32> to vector<128x128xf32>
    %cst_61 = arith.constant dense<0.000000e+00> : vector<96x128xf32>
    %82 = tpu.matmul %79, %81, %cst_61 {dimension_numbers = #tpu.dot_dimension_numbers<[1], [0], [0], [1], [0, 0, 1, 1], [], []>} : vector<96x128xf32>, vector<128x128xf32>, vector<96x128xf32> -> vector<96x128xf32>
    %83 = arith.addf %78, %82 : vector<96x128xf32>
    %84 = vector.extract_strided_slice %22 {offsets = [26, 0], sizes = [96, 128], strides = [1, 1]} : vector<160x128xf32> to vector<96x128xf32>
    %c12 = arith.constant 12 : index
    %c0_62 = arith.constant 0 : index
    %c0_63 = arith.constant 0 : index
    %85 = vector.load %arg4[%c12, %c0_62, %c0_63] : memref<25x128x128xf32, #tpu.memory_space<vmem>>, vector<1x128x128xf32>
    %86 = vector.shape_cast %85 : vector<1x128x128xf32> to vector<128x128xf32>
    %cst_64 = arith.constant dense<0.000000e+00> : vector<96x128xf32>
    %87 = tpu.matmul %84, %86, %cst_64 {dimension_numbers = #tpu.dot_dimension_numbers<[1], [0], [0], [1], [0, 0, 1, 1], [], []>} : vector<96x128xf32>, vector<128x128xf32>, vector<96x128xf32> -> vector<96x128xf32>
    %88 = arith.addf %83, %87 : vector<96x128xf32>
    %89 = vector.extract_strided_slice %22 {offsets = [27, 0], sizes = [96, 128], strides = [1, 1]} : vector<160x128xf32> to vector<96x128xf32>
    %c13 = arith.constant 13 : index
    %c0_65 = arith.constant 0 : index
    %c0_66 = arith.constant 0 : index
    %90 = vector.load %arg4[%c13, %c0_65, %c0_66] : memref<25x128x128xf32, #tpu.memory_space<vmem>>, vector<1x128x128xf32>
    %91 = vector.shape_cast %90 : vector<1x128x128xf32> to vector<128x128xf32>
    %cst_67 = arith.constant dense<0.000000e+00> : vector<96x128xf32>
    %92 = tpu.matmul %89, %91, %cst_67 {dimension_numbers = #tpu.dot_dimension_numbers<[1], [0], [0], [1], [0, 0, 1, 1], [], []>} : vector<96x128xf32>, vector<128x128xf32>, vector<96x128xf32> -> vector<96x128xf32>
    %93 = arith.addf %88, %92 : vector<96x128xf32>
    %94 = vector.extract_strided_slice %22 {offsets = [28, 0], sizes = [96, 128], strides = [1, 1]} : vector<160x128xf32> to vector<96x128xf32>
    %c14 = arith.constant 14 : index
    %c0_68 = arith.constant 0 : index
    %c0_69 = arith.constant 0 : index
    %95 = vector.load %arg4[%c14, %c0_68, %c0_69] : memref<25x128x128xf32, #tpu.memory_space<vmem>>, vector<1x128x128xf32>
    %96 = vector.shape_cast %95 : vector<1x128x128xf32> to vector<128x128xf32>
    %cst_70 = arith.constant dense<0.000000e+00> : vector<96x128xf32>
    %97 = tpu.matmul %94, %96, %cst_70 {dimension_numbers = #tpu.dot_dimension_numbers<[1], [0], [0], [1], [0, 0, 1, 1], [], []>} : vector<96x128xf32>, vector<128x128xf32>, vector<96x128xf32> -> vector<96x128xf32>
    %98 = arith.addf %93, %97 : vector<96x128xf32>
    %99 = vector.extract_strided_slice %22 {offsets = [36, 0], sizes = [96, 128], strides = [1, 1]} : vector<160x128xf32> to vector<96x128xf32>
    %c15 = arith.constant 15 : index
    %c0_71 = arith.constant 0 : index
    %c0_72 = arith.constant 0 : index
    %100 = vector.load %arg4[%c15, %c0_71, %c0_72] : memref<25x128x128xf32, #tpu.memory_space<vmem>>, vector<1x128x128xf32>
    %101 = vector.shape_cast %100 : vector<1x128x128xf32> to vector<128x128xf32>
    %cst_73 = arith.constant dense<0.000000e+00> : vector<96x128xf32>
    %102 = tpu.matmul %99, %101, %cst_73 {dimension_numbers = #tpu.dot_dimension_numbers<[1], [0], [0], [1], [0, 0, 1, 1], [], []>} : vector<96x128xf32>, vector<128x128xf32>, vector<96x128xf32> -> vector<96x128xf32>
    %103 = arith.addf %98, %102 : vector<96x128xf32>
    %104 = vector.extract_strided_slice %22 {offsets = [37, 0], sizes = [96, 128], strides = [1, 1]} : vector<160x128xf32> to vector<96x128xf32>
    %c16 = arith.constant 16 : index
    %c0_74 = arith.constant 0 : index
    %c0_75 = arith.constant 0 : index
    %105 = vector.load %arg4[%c16, %c0_74, %c0_75] : memref<25x128x128xf32, #tpu.memory_space<vmem>>, vector<1x128x128xf32>
    %106 = vector.shape_cast %105 : vector<1x128x128xf32> to vector<128x128xf32>
    %cst_76 = arith.constant dense<0.000000e+00> : vector<96x128xf32>
    %107 = tpu.matmul %104, %106, %cst_76 {dimension_numbers = #tpu.dot_dimension_numbers<[1], [0], [0], [1], [0, 0, 1, 1], [], []>} : vector<96x128xf32>, vector<128x128xf32>, vector<96x128xf32> -> vector<96x128xf32>
    %108 = arith.addf %103, %107 : vector<96x128xf32>
    %109 = vector.extract_strided_slice %22 {offsets = [38, 0], sizes = [96, 128], strides = [1, 1]} : vector<160x128xf32> to vector<96x128xf32>
    %c17 = arith.constant 17 : index
    %c0_77 = arith.constant 0 : index
    %c0_78 = arith.constant 0 : index
    %110 = vector.load %arg4[%c17, %c0_77, %c0_78] : memref<25x128x128xf32, #tpu.memory_space<vmem>>, vector<1x128x128xf32>
    %111 = vector.shape_cast %110 : vector<1x128x128xf32> to vector<128x128xf32>
    %cst_79 = arith.constant dense<0.000000e+00> : vector<96x128xf32>
    %112 = tpu.matmul %109, %111, %cst_79 {dimension_numbers = #tpu.dot_dimension_numbers<[1], [0], [0], [1], [0, 0, 1, 1], [], []>} : vector<96x128xf32>, vector<128x128xf32>, vector<96x128xf32> -> vector<96x128xf32>
    %113 = arith.addf %108, %112 : vector<96x128xf32>
    %114 = vector.extract_strided_slice %22 {offsets = [39, 0], sizes = [96, 128], strides = [1, 1]} : vector<160x128xf32> to vector<96x128xf32>
    %c18 = arith.constant 18 : index
    %c0_80 = arith.constant 0 : index
    %c0_81 = arith.constant 0 : index
    %115 = vector.load %arg4[%c18, %c0_80, %c0_81] : memref<25x128x128xf32, #tpu.memory_space<vmem>>, vector<1x128x128xf32>
    %116 = vector.shape_cast %115 : vector<1x128x128xf32> to vector<128x128xf32>
    %cst_82 = arith.constant dense<0.000000e+00> : vector<96x128xf32>
    %117 = tpu.matmul %114, %116, %cst_82 {dimension_numbers = #tpu.dot_dimension_numbers<[1], [0], [0], [1], [0, 0, 1, 1], [], []>} : vector<96x128xf32>, vector<128x128xf32>, vector<96x128xf32> -> vector<96x128xf32>
    %118 = arith.addf %113, %117 : vector<96x128xf32>
    %119 = vector.extract_strided_slice %22 {offsets = [40, 0], sizes = [96, 128], strides = [1, 1]} : vector<160x128xf32> to vector<96x128xf32>
    %c19 = arith.constant 19 : index
    %c0_83 = arith.constant 0 : index
    %c0_84 = arith.constant 0 : index
    %120 = vector.load %arg4[%c19, %c0_83, %c0_84] : memref<25x128x128xf32, #tpu.memory_space<vmem>>, vector<1x128x128xf32>
    %121 = vector.shape_cast %120 : vector<1x128x128xf32> to vector<128x128xf32>
    %cst_85 = arith.constant dense<0.000000e+00> : vector<96x128xf32>
    %122 = tpu.matmul %119, %121, %cst_85 {dimension_numbers = #tpu.dot_dimension_numbers<[1], [0], [0], [1], [0, 0, 1, 1], [], []>} : vector<96x128xf32>, vector<128x128xf32>, vector<96x128xf32> -> vector<96x128xf32>
    %123 = arith.addf %118, %122 : vector<96x128xf32>
    %124 = vector.extract_strided_slice %22 {offsets = [48, 0], sizes = [96, 128], strides = [1, 1]} : vector<160x128xf32> to vector<96x128xf32>
    %c20 = arith.constant 20 : index
    %c0_86 = arith.constant 0 : index
    %c0_87 = arith.constant 0 : index
    %125 = vector.load %arg4[%c20, %c0_86, %c0_87] : memref<25x128x128xf32, #tpu.memory_space<vmem>>, vector<1x128x128xf32>
    %126 = vector.shape_cast %125 : vector<1x128x128xf32> to vector<128x128xf32>
    %cst_88 = arith.constant dense<0.000000e+00> : vector<96x128xf32>
    %127 = tpu.matmul %124, %126, %cst_88 {dimension_numbers = #tpu.dot_dimension_numbers<[1], [0], [0], [1], [0, 0, 1, 1], [], []>} : vector<96x128xf32>, vector<128x128xf32>, vector<96x128xf32> -> vector<96x128xf32>
    %128 = arith.addf %123, %127 : vector<96x128xf32>
    %129 = vector.extract_strided_slice %22 {offsets = [49, 0], sizes = [96, 128], strides = [1, 1]} : vector<160x128xf32> to vector<96x128xf32>
    %c21 = arith.constant 21 : index
    %c0_89 = arith.constant 0 : index
    %c0_90 = arith.constant 0 : index
    %130 = vector.load %arg4[%c21, %c0_89, %c0_90] : memref<25x128x128xf32, #tpu.memory_space<vmem>>, vector<1x128x128xf32>
    %131 = vector.shape_cast %130 : vector<1x128x128xf32> to vector<128x128xf32>
    %cst_91 = arith.constant dense<0.000000e+00> : vector<96x128xf32>
    %132 = tpu.matmul %129, %131, %cst_91 {dimension_numbers = #tpu.dot_dimension_numbers<[1], [0], [0], [1], [0, 0, 1, 1], [], []>} : vector<96x128xf32>, vector<128x128xf32>, vector<96x128xf32> -> vector<96x128xf32>
    %133 = arith.addf %128, %132 : vector<96x128xf32>
    %134 = vector.extract_strided_slice %22 {offsets = [50, 0], sizes = [96, 128], strides = [1, 1]} : vector<160x128xf32> to vector<96x128xf32>
    %c22 = arith.constant 22 : index
    %c0_92 = arith.constant 0 : index
    %c0_93 = arith.constant 0 : index
    %135 = vector.load %arg4[%c22, %c0_92, %c0_93] : memref<25x128x128xf32, #tpu.memory_space<vmem>>, vector<1x128x128xf32>
    %136 = vector.shape_cast %135 : vector<1x128x128xf32> to vector<128x128xf32>
    %cst_94 = arith.constant dense<0.000000e+00> : vector<96x128xf32>
    %137 = tpu.matmul %134, %136, %cst_94 {dimension_numbers = #tpu.dot_dimension_numbers<[1], [0], [0], [1], [0, 0, 1, 1], [], []>} : vector<96x128xf32>, vector<128x128xf32>, vector<96x128xf32> -> vector<96x128xf32>
    %138 = arith.addf %133, %137 : vector<96x128xf32>
    %139 = vector.extract_strided_slice %22 {offsets = [51, 0], sizes = [96, 128], strides = [1, 1]} : vector<160x128xf32> to vector<96x128xf32>
    %c23 = arith.constant 23 : index
    %c0_95 = arith.constant 0 : index
    %c0_96 = arith.constant 0 : index
    %140 = vector.load %arg4[%c23, %c0_95, %c0_96] : memref<25x128x128xf32, #tpu.memory_space<vmem>>, vector<1x128x128xf32>
    %141 = vector.shape_cast %140 : vector<1x128x128xf32> to vector<128x128xf32>
    %cst_97 = arith.constant dense<0.000000e+00> : vector<96x128xf32>
    %142 = tpu.matmul %139, %141, %cst_97 {dimension_numbers = #tpu.dot_dimension_numbers<[1], [0], [0], [1], [0, 0, 1, 1], [], []>} : vector<96x128xf32>, vector<128x128xf32>, vector<96x128xf32> -> vector<96x128xf32>
    %143 = arith.addf %138, %142 : vector<96x128xf32>
    %144 = vector.extract_strided_slice %22 {offsets = [52, 0], sizes = [96, 128], strides = [1, 1]} : vector<160x128xf32> to vector<96x128xf32>
    %c24 = arith.constant 24 : index
    %c0_98 = arith.constant 0 : index
    %c0_99 = arith.constant 0 : index
    %145 = vector.load %arg4[%c24, %c0_98, %c0_99] : memref<25x128x128xf32, #tpu.memory_space<vmem>>, vector<1x128x128xf32>
    %146 = vector.shape_cast %145 : vector<1x128x128xf32> to vector<128x128xf32>
    %cst_100 = arith.constant dense<0.000000e+00> : vector<96x128xf32>
    %147 = tpu.matmul %144, %146, %cst_100 {dimension_numbers = #tpu.dot_dimension_numbers<[1], [0], [0], [1], [0, 0, 1, 1], [], []>} : vector<96x128xf32>, vector<128x128xf32>, vector<96x128xf32> -> vector<96x128xf32>
    %148 = arith.addf %143, %147 : vector<96x128xf32>
    %c0_101 = arith.constant 0 : index
    %c0_102 = arith.constant 0 : index
    %149 = vector.load %arg5[%c0_101, %c0_102] : memref<1x128xf32, #tpu.memory_space<vmem>>, vector<1x128xf32>
    %150 = vector.broadcast %149 : vector<1x128xf32> to vector<96x128xf32>
    %151 = arith.addf %148, %150 : vector<96x128xf32>
    %cst_103 = arith.constant 0.000000e+00 : f32
    %152 = vector.broadcast %cst_103 : f32 to vector<32x128xf32>
    %153 = tpu.concatenate %151, %152 in 0 : vector<96x128xf32>, vector<32x128xf32> -> vector<128x128xf32>
    %154 = vector.extract_strided_slice %153 {offsets = [0, 0], sizes = [112, 128], strides = [1, 1]} : vector<128x128xf32> to vector<112x128xf32>
    %155 = vector.extract_strided_slice %153 {offsets = [1, 0], sizes = [112, 128], strides = [1, 1]} : vector<128x128xf32> to vector<112x128xf32>
    %156 = arith.maximumf %154, %155 : vector<112x128xf32>
    %157 = vector.extract_strided_slice %156 {offsets = [0, 0], sizes = [96, 128], strides = [1, 1]} : vector<112x128xf32> to vector<96x128xf32>
    %158 = vector.extract_strided_slice %156 {offsets = [12, 0], sizes = [96, 128], strides = [1, 1]} : vector<112x128xf32> to vector<96x128xf32>
    %159 = arith.maximumf %157, %158 : vector<96x128xf32>
    %c0_104 = arith.constant 0 : index
    %c0_105 = arith.constant 0 : index
    %160 = vector.load %arg7[%c0_104, %c0_105] : memref<1x128xf32, #tpu.memory_space<vmem>>, vector<1x128xf32>
    %161 = vector.extract_strided_slice %159 {offsets = [0, 0], sizes = [1, 128], strides = [1, 1]} : vector<96x128xf32> to vector<1x128xf32>
    %cst_106 = arith.constant 0.000000e+00 : f32
    %162 = vector.broadcast %cst_106 : f32 to vector<1x128xf32>
    %163 = arith.maximumf %161, %162 : vector<1x128xf32>
    %c0_107 = arith.constant 0 : index
    %c0_108 = arith.constant 0 : index
    %c0_109 = arith.constant 0 : index
    %164 = vector.load %arg6[%c0_107, %c0_108, %c0_109] : memref<16x128x128xf32, #tpu.memory_space<vmem>>, vector<1x128x128xf32>
    %165 = vector.shape_cast %164 : vector<1x128x128xf32> to vector<128x128xf32>
    %cst_110 = arith.constant dense<0.000000e+00> : vector<1x128xf32>
    %166 = tpu.matmul %163, %165, %cst_110 {dimension_numbers = #tpu.dot_dimension_numbers<[1], [0], [0], [1], [0, 0, 1, 1], [], []>} : vector<1x128xf32>, vector<128x128xf32>, vector<1x128xf32> -> vector<1x128xf32>
    %167 = arith.addf %160, %166 : vector<1x128xf32>
    %168 = vector.extract_strided_slice %159 {offsets = [2, 0], sizes = [1, 128], strides = [1, 1]} : vector<96x128xf32> to vector<1x128xf32>
    %cst_111 = arith.constant 0.000000e+00 : f32
    %169 = vector.broadcast %cst_111 : f32 to vector<1x128xf32>
    %170 = arith.maximumf %168, %169 : vector<1x128xf32>
    %c1_112 = arith.constant 1 : index
    %c0_113 = arith.constant 0 : index
    %c0_114 = arith.constant 0 : index
    %171 = vector.load %arg6[%c1_112, %c0_113, %c0_114] : memref<16x128x128xf32, #tpu.memory_space<vmem>>, vector<1x128x128xf32>
    %172 = vector.shape_cast %171 : vector<1x128x128xf32> to vector<128x128xf32>
    %cst_115 = arith.constant dense<0.000000e+00> : vector<1x128xf32>
    %173 = tpu.matmul %170, %172, %cst_115 {dimension_numbers = #tpu.dot_dimension_numbers<[1], [0], [0], [1], [0, 0, 1, 1], [], []>} : vector<1x128xf32>, vector<128x128xf32>, vector<1x128xf32> -> vector<1x128xf32>
    %174 = arith.addf %167, %173 : vector<1x128xf32>
    %175 = vector.extract_strided_slice %159 {offsets = [4, 0], sizes = [1, 128], strides = [1, 1]} : vector<96x128xf32> to vector<1x128xf32>
    %cst_116 = arith.constant 0.000000e+00 : f32
    %176 = vector.broadcast %cst_116 : f32 to vector<1x128xf32>
    %177 = arith.maximumf %175, %176 : vector<1x128xf32>
    %c2_117 = arith.constant 2 : index
    %c0_118 = arith.constant 0 : index
    %c0_119 = arith.constant 0 : index
    %178 = vector.load %arg6[%c2_117, %c0_118, %c0_119] : memref<16x128x128xf32, #tpu.memory_space<vmem>>, vector<1x128x128xf32>
    %179 = vector.shape_cast %178 : vector<1x128x128xf32> to vector<128x128xf32>
    %cst_120 = arith.constant dense<0.000000e+00> : vector<1x128xf32>
    %180 = tpu.matmul %177, %179, %cst_120 {dimension_numbers = #tpu.dot_dimension_numbers<[1], [0], [0], [1], [0, 0, 1, 1], [], []>} : vector<1x128xf32>, vector<128x128xf32>, vector<1x128xf32> -> vector<1x128xf32>
    %181 = arith.addf %174, %180 : vector<1x128xf32>
    %182 = vector.extract_strided_slice %159 {offsets = [6, 0], sizes = [1, 128], strides = [1, 1]} : vector<96x128xf32> to vector<1x128xf32>
    %cst_121 = arith.constant 0.000000e+00 : f32
    %183 = vector.broadcast %cst_121 : f32 to vector<1x128xf32>
    %184 = arith.maximumf %182, %183 : vector<1x128xf32>
    %c3_122 = arith.constant 3 : index
    %c0_123 = arith.constant 0 : index
    %c0_124 = arith.constant 0 : index
    %185 = vector.load %arg6[%c3_122, %c0_123, %c0_124] : memref<16x128x128xf32, #tpu.memory_space<vmem>>, vector<1x128x128xf32>
    %186 = vector.shape_cast %185 : vector<1x128x128xf32> to vector<128x128xf32>
    %cst_125 = arith.constant dense<0.000000e+00> : vector<1x128xf32>
    %187 = tpu.matmul %184, %186, %cst_125 {dimension_numbers = #tpu.dot_dimension_numbers<[1], [0], [0], [1], [0, 0, 1, 1], [], []>} : vector<1x128xf32>, vector<128x128xf32>, vector<1x128xf32> -> vector<1x128xf32>
    %188 = arith.addf %181, %187 : vector<1x128xf32>
    %189 = vector.extract_strided_slice %159 {offsets = [24, 0], sizes = [1, 128], strides = [1, 1]} : vector<96x128xf32> to vector<1x128xf32>
    %cst_126 = arith.constant 0.000000e+00 : f32
    %190 = vector.broadcast %cst_126 : f32 to vector<1x128xf32>
    %191 = arith.maximumf %189, %190 : vector<1x128xf32>
    %c4_127 = arith.constant 4 : index
    %c0_128 = arith.constant 0 : index
    %c0_129 = arith.constant 0 : index
    %192 = vector.load %arg6[%c4_127, %c0_128, %c0_129] : memref<16x128x128xf32, #tpu.memory_space<vmem>>, vector<1x128x128xf32>
    %193 = vector.shape_cast %192 : vector<1x128x128xf32> to vector<128x128xf32>
    %cst_130 = arith.constant dense<0.000000e+00> : vector<1x128xf32>
    %194 = tpu.matmul %191, %193, %cst_130 {dimension_numbers = #tpu.dot_dimension_numbers<[1], [0], [0], [1], [0, 0, 1, 1], [], []>} : vector<1x128xf32>, vector<128x128xf32>, vector<1x128xf32> -> vector<1x128xf32>
    %195 = arith.addf %188, %194 : vector<1x128xf32>
    %196 = vector.extract_strided_slice %159 {offsets = [26, 0], sizes = [1, 128], strides = [1, 1]} : vector<96x128xf32> to vector<1x128xf32>
    %cst_131 = arith.constant 0.000000e+00 : f32
    %197 = vector.broadcast %cst_131 : f32 to vector<1x128xf32>
    %198 = arith.maximumf %196, %197 : vector<1x128xf32>
    %c5_132 = arith.constant 5 : index
    %c0_133 = arith.constant 0 : index
    %c0_134 = arith.constant 0 : index
    %199 = vector.load %arg6[%c5_132, %c0_133, %c0_134] : memref<16x128x128xf32, #tpu.memory_space<vmem>>, vector<1x128x128xf32>
    %200 = vector.shape_cast %199 : vector<1x128x128xf32> to vector<128x128xf32>
    %cst_135 = arith.constant dense<0.000000e+00> : vector<1x128xf32>
    %201 = tpu.matmul %198, %200, %cst_135 {dimension_numbers = #tpu.dot_dimension_numbers<[1], [0], [0], [1], [0, 0, 1, 1], [], []>} : vector<1x128xf32>, vector<128x128xf32>, vector<1x128xf32> -> vector<1x128xf32>
    %202 = arith.addf %195, %201 : vector<1x128xf32>
    %203 = vector.extract_strided_slice %159 {offsets = [28, 0], sizes = [1, 128], strides = [1, 1]} : vector<96x128xf32> to vector<1x128xf32>
    %cst_136 = arith.constant 0.000000e+00 : f32
    %204 = vector.broadcast %cst_136 : f32 to vector<1x128xf32>
    %205 = arith.maximumf %203, %204 : vector<1x128xf32>
    %c6_137 = arith.constant 6 : index
    %c0_138 = arith.constant 0 : index
    %c0_139 = arith.constant 0 : index
    %206 = vector.load %arg6[%c6_137, %c0_138, %c0_139] : memref<16x128x128xf32, #tpu.memory_space<vmem>>, vector<1x128x128xf32>
    %207 = vector.shape_cast %206 : vector<1x128x128xf32> to vector<128x128xf32>
    %cst_140 = arith.constant dense<0.000000e+00> : vector<1x128xf32>
    %208 = tpu.matmul %205, %207, %cst_140 {dimension_numbers = #tpu.dot_dimension_numbers<[1], [0], [0], [1], [0, 0, 1, 1], [], []>} : vector<1x128xf32>, vector<128x128xf32>, vector<1x128xf32> -> vector<1x128xf32>
    %209 = arith.addf %202, %208 : vector<1x128xf32>
    %210 = vector.extract_strided_slice %159 {offsets = [30, 0], sizes = [1, 128], strides = [1, 1]} : vector<96x128xf32> to vector<1x128xf32>
    %cst_141 = arith.constant 0.000000e+00 : f32
    %211 = vector.broadcast %cst_141 : f32 to vector<1x128xf32>
    %212 = arith.maximumf %210, %211 : vector<1x128xf32>
    %c7_142 = arith.constant 7 : index
    %c0_143 = arith.constant 0 : index
    %c0_144 = arith.constant 0 : index
    %213 = vector.load %arg6[%c7_142, %c0_143, %c0_144] : memref<16x128x128xf32, #tpu.memory_space<vmem>>, vector<1x128x128xf32>
    %214 = vector.shape_cast %213 : vector<1x128x128xf32> to vector<128x128xf32>
    %cst_145 = arith.constant dense<0.000000e+00> : vector<1x128xf32>
    %215 = tpu.matmul %212, %214, %cst_145 {dimension_numbers = #tpu.dot_dimension_numbers<[1], [0], [0], [1], [0, 0, 1, 1], [], []>} : vector<1x128xf32>, vector<128x128xf32>, vector<1x128xf32> -> vector<1x128xf32>
    %216 = arith.addf %209, %215 : vector<1x128xf32>
    %217 = vector.extract_strided_slice %159 {offsets = [48, 0], sizes = [1, 128], strides = [1, 1]} : vector<96x128xf32> to vector<1x128xf32>
    %cst_146 = arith.constant 0.000000e+00 : f32
    %218 = vector.broadcast %cst_146 : f32 to vector<1x128xf32>
    %219 = arith.maximumf %217, %218 : vector<1x128xf32>
    %c8_147 = arith.constant 8 : index
    %c0_148 = arith.constant 0 : index
    %c0_149 = arith.constant 0 : index
    %220 = vector.load %arg6[%c8_147, %c0_148, %c0_149] : memref<16x128x128xf32, #tpu.memory_space<vmem>>, vector<1x128x128xf32>
    %221 = vector.shape_cast %220 : vector<1x128x128xf32> to vector<128x128xf32>
    %cst_150 = arith.constant dense<0.000000e+00> : vector<1x128xf32>
    %222 = tpu.matmul %219, %221, %cst_150 {dimension_numbers = #tpu.dot_dimension_numbers<[1], [0], [0], [1], [0, 0, 1, 1], [], []>} : vector<1x128xf32>, vector<128x128xf32>, vector<1x128xf32> -> vector<1x128xf32>
    %223 = arith.addf %216, %222 : vector<1x128xf32>
    %224 = vector.extract_strided_slice %159 {offsets = [50, 0], sizes = [1, 128], strides = [1, 1]} : vector<96x128xf32> to vector<1x128xf32>
    %cst_151 = arith.constant 0.000000e+00 : f32
    %225 = vector.broadcast %cst_151 : f32 to vector<1x128xf32>
    %226 = arith.maximumf %224, %225 : vector<1x128xf32>
    %c9_152 = arith.constant 9 : index
    %c0_153 = arith.constant 0 : index
    %c0_154 = arith.constant 0 : index
    %227 = vector.load %arg6[%c9_152, %c0_153, %c0_154] : memref<16x128x128xf32, #tpu.memory_space<vmem>>, vector<1x128x128xf32>
    %228 = vector.shape_cast %227 : vector<1x128x128xf32> to vector<128x128xf32>
    %cst_155 = arith.constant dense<0.000000e+00> : vector<1x128xf32>
    %229 = tpu.matmul %226, %228, %cst_155 {dimension_numbers = #tpu.dot_dimension_numbers<[1], [0], [0], [1], [0, 0, 1, 1], [], []>} : vector<1x128xf32>, vector<128x128xf32>, vector<1x128xf32> -> vector<1x128xf32>
    %230 = arith.addf %223, %229 : vector<1x128xf32>
    %231 = vector.extract_strided_slice %159 {offsets = [52, 0], sizes = [1, 128], strides = [1, 1]} : vector<96x128xf32> to vector<1x128xf32>
    %cst_156 = arith.constant 0.000000e+00 : f32
    %232 = vector.broadcast %cst_156 : f32 to vector<1x128xf32>
    %233 = arith.maximumf %231, %232 : vector<1x128xf32>
    %c10_157 = arith.constant 10 : index
    %c0_158 = arith.constant 0 : index
    %c0_159 = arith.constant 0 : index
    %234 = vector.load %arg6[%c10_157, %c0_158, %c0_159] : memref<16x128x128xf32, #tpu.memory_space<vmem>>, vector<1x128x128xf32>
    %235 = vector.shape_cast %234 : vector<1x128x128xf32> to vector<128x128xf32>
    %cst_160 = arith.constant dense<0.000000e+00> : vector<1x128xf32>
    %236 = tpu.matmul %233, %235, %cst_160 {dimension_numbers = #tpu.dot_dimension_numbers<[1], [0], [0], [1], [0, 0, 1, 1], [], []>} : vector<1x128xf32>, vector<128x128xf32>, vector<1x128xf32> -> vector<1x128xf32>
    %237 = arith.addf %230, %236 : vector<1x128xf32>
    %238 = vector.extract_strided_slice %159 {offsets = [54, 0], sizes = [1, 128], strides = [1, 1]} : vector<96x128xf32> to vector<1x128xf32>
    %cst_161 = arith.constant 0.000000e+00 : f32
    %239 = vector.broadcast %cst_161 : f32 to vector<1x128xf32>
    %240 = arith.maximumf %238, %239 : vector<1x128xf32>
    %c11_162 = arith.constant 11 : index
    %c0_163 = arith.constant 0 : index
    %c0_164 = arith.constant 0 : index
    %241 = vector.load %arg6[%c11_162, %c0_163, %c0_164] : memref<16x128x128xf32, #tpu.memory_space<vmem>>, vector<1x128x128xf32>
    %242 = vector.shape_cast %241 : vector<1x128x128xf32> to vector<128x128xf32>
    %cst_165 = arith.constant dense<0.000000e+00> : vector<1x128xf32>
    %243 = tpu.matmul %240, %242, %cst_165 {dimension_numbers = #tpu.dot_dimension_numbers<[1], [0], [0], [1], [0, 0, 1, 1], [], []>} : vector<1x128xf32>, vector<128x128xf32>, vector<1x128xf32> -> vector<1x128xf32>
    %244 = arith.addf %237, %243 : vector<1x128xf32>
    %245 = vector.extract_strided_slice %159 {offsets = [72, 0], sizes = [1, 128], strides = [1, 1]} : vector<96x128xf32> to vector<1x128xf32>
    %cst_166 = arith.constant 0.000000e+00 : f32
    %246 = vector.broadcast %cst_166 : f32 to vector<1x128xf32>
    %247 = arith.maximumf %245, %246 : vector<1x128xf32>
    %c12_167 = arith.constant 12 : index
    %c0_168 = arith.constant 0 : index
    %c0_169 = arith.constant 0 : index
    %248 = vector.load %arg6[%c12_167, %c0_168, %c0_169] : memref<16x128x128xf32, #tpu.memory_space<vmem>>, vector<1x128x128xf32>
    %249 = vector.shape_cast %248 : vector<1x128x128xf32> to vector<128x128xf32>
    %cst_170 = arith.constant dense<0.000000e+00> : vector<1x128xf32>
    %250 = tpu.matmul %247, %249, %cst_170 {dimension_numbers = #tpu.dot_dimension_numbers<[1], [0], [0], [1], [0, 0, 1, 1], [], []>} : vector<1x128xf32>, vector<128x128xf32>, vector<1x128xf32> -> vector<1x128xf32>
    %251 = arith.addf %244, %250 : vector<1x128xf32>
    %252 = vector.extract_strided_slice %159 {offsets = [74, 0], sizes = [1, 128], strides = [1, 1]} : vector<96x128xf32> to vector<1x128xf32>
    %cst_171 = arith.constant 0.000000e+00 : f32
    %253 = vector.broadcast %cst_171 : f32 to vector<1x128xf32>
    %254 = arith.maximumf %252, %253 : vector<1x128xf32>
    %c13_172 = arith.constant 13 : index
    %c0_173 = arith.constant 0 : index
    %c0_174 = arith.constant 0 : index
    %255 = vector.load %arg6[%c13_172, %c0_173, %c0_174] : memref<16x128x128xf32, #tpu.memory_space<vmem>>, vector<1x128x128xf32>
    %256 = vector.shape_cast %255 : vector<1x128x128xf32> to vector<128x128xf32>
    %cst_175 = arith.constant dense<0.000000e+00> : vector<1x128xf32>
    %257 = tpu.matmul %254, %256, %cst_175 {dimension_numbers = #tpu.dot_dimension_numbers<[1], [0], [0], [1], [0, 0, 1, 1], [], []>} : vector<1x128xf32>, vector<128x128xf32>, vector<1x128xf32> -> vector<1x128xf32>
    %258 = arith.addf %251, %257 : vector<1x128xf32>
    %259 = vector.extract_strided_slice %159 {offsets = [76, 0], sizes = [1, 128], strides = [1, 1]} : vector<96x128xf32> to vector<1x128xf32>
    %cst_176 = arith.constant 0.000000e+00 : f32
    %260 = vector.broadcast %cst_176 : f32 to vector<1x128xf32>
    %261 = arith.maximumf %259, %260 : vector<1x128xf32>
    %c14_177 = arith.constant 14 : index
    %c0_178 = arith.constant 0 : index
    %c0_179 = arith.constant 0 : index
    %262 = vector.load %arg6[%c14_177, %c0_178, %c0_179] : memref<16x128x128xf32, #tpu.memory_space<vmem>>, vector<1x128x128xf32>
    %263 = vector.shape_cast %262 : vector<1x128x128xf32> to vector<128x128xf32>
    %cst_180 = arith.constant dense<0.000000e+00> : vector<1x128xf32>
    %264 = tpu.matmul %261, %263, %cst_180 {dimension_numbers = #tpu.dot_dimension_numbers<[1], [0], [0], [1], [0, 0, 1, 1], [], []>} : vector<1x128xf32>, vector<128x128xf32>, vector<1x128xf32> -> vector<1x128xf32>
    %265 = arith.addf %258, %264 : vector<1x128xf32>
    %266 = vector.extract_strided_slice %159 {offsets = [78, 0], sizes = [1, 128], strides = [1, 1]} : vector<96x128xf32> to vector<1x128xf32>
    %cst_181 = arith.constant 0.000000e+00 : f32
    %267 = vector.broadcast %cst_181 : f32 to vector<1x128xf32>
    %268 = arith.maximumf %266, %267 : vector<1x128xf32>
    %c15_182 = arith.constant 15 : index
    %c0_183 = arith.constant 0 : index
    %c0_184 = arith.constant 0 : index
    %269 = vector.load %arg6[%c15_182, %c0_183, %c0_184] : memref<16x128x128xf32, #tpu.memory_space<vmem>>, vector<1x128x128xf32>
    %270 = vector.shape_cast %269 : vector<1x128x128xf32> to vector<128x128xf32>
    %cst_185 = arith.constant dense<0.000000e+00> : vector<1x128xf32>
    %271 = tpu.matmul %268, %270, %cst_185 {dimension_numbers = #tpu.dot_dimension_numbers<[1], [0], [0], [1], [0, 0, 1, 1], [], []>} : vector<1x128xf32>, vector<128x128xf32>, vector<1x128xf32> -> vector<1x128xf32>
    %272 = arith.addf %265, %271 : vector<1x128xf32>
    %cst_186 = arith.constant 0.000000e+00 : f32
    %273 = vector.broadcast %cst_186 : f32 to vector<1x128xf32>
    %274 = arith.maximumf %272, %273 : vector<1x128xf32>
    %c0_187 = arith.constant 0 : index
    %c0_188 = arith.constant 0 : index
    %275 = vector.load %arg8[%c0_187, %c0_188] : memref<128x128xf32, #tpu.memory_space<vmem>>, vector<128x128xf32>
    %cst_189 = arith.constant dense<0.000000e+00> : vector<1x128xf32>
    %276 = tpu.matmul %274, %275, %cst_189 {dimension_numbers = #tpu.dot_dimension_numbers<[1], [0], [0], [1], [0, 0, 1, 1], [], []>} : vector<1x128xf32>, vector<128x128xf32>, vector<1x128xf32> -> vector<1x128xf32>
    %c0_190 = arith.constant 0 : index
    %c0_191 = arith.constant 0 : index
    %277 = vector.load %arg9[%c0_190, %c0_191] : memref<1x128xf32, #tpu.memory_space<vmem>>, vector<1x128xf32>
    %278 = arith.addf %276, %277 : vector<1x128xf32>
    %cst_192 = arith.constant dense<0xFF800000> : vector<1xf32>
    %279 = vector.multi_reduction <maximumf>, %278, %cst_192 [1] : vector<1x128xf32> to vector<1xf32>
    %280 = vector.shape_cast %279 : vector<1xf32> to vector<1x1xf32>
    %281 = vector.broadcast %280 : vector<1x1xf32> to vector<1x128xf32>
    %282 = arith.subf %278, %281 : vector<1x128xf32>
    %283 = math.exp %282 : vector<1x128xf32>
    %cst_193 = arith.constant dense<0.000000e+00> : vector<1xf32>
    %284 = vector.multi_reduction <add>, %283, %cst_193 [1] : vector<1x128xf32> to vector<1xf32>
    %285 = vector.shape_cast %284 : vector<1xf32> to vector<1x1xf32>
    %286 = math.log %285 : vector<1x1xf32>
    %287 = vector.broadcast %286 : vector<1x1xf32> to vector<1x128xf32>
    %288 = arith.subf %282, %287 : vector<1x128xf32>
    %289 = vector.shape_cast %288 : vector<1x128xf32> to vector<1x1x128xf32>
    %c0_194 = arith.constant 0 : index
    %c0_195 = arith.constant 0 : index
    %c0_196 = arith.constant 0 : index
    %290 = vector.load %arg10[%c0_194, %c0_195, %c0_196] : memref<1x1x128xf32, #tpu.memory_space<vmem>>, vector<1x1x128xf32>
    tpu.vector_store %arg10[%c0_194, %c0_195, %c0_196], %289 {strides = array<i32>} : memref<1x1x128xf32, #tpu.memory_space<vmem>>, vector<1x1x128xf32>,
    return
  }
  func.func @transform_0(%arg0: i32) -> (i32, i32, i32, i32) {
    %c0_i32 = arith.constant 0 : i32
    %c0_i32_0 = arith.constant 0 : i32
    %c0_i32_1 = arith.constant 0 : i32
    %c0_i32_2 = arith.constant 0 : i32
    return %arg0, %c0_i32, %c0_i32_0, %c0_i32_1 : i32, i32, i32, i32
  }
  func.func @transform_1(%arg0: i32) -> (i32, i32) {
    %c0_i32 = arith.constant 0 : i32
    %c0_i32_0 = arith.constant 0 : i32
    %c0_i32_1 = arith.constant 0 : i32
    return %c0_i32, %c0_i32_0 : i32, i32
  }
  func.func @transform_2(%arg0: i32) -> (i32, i32) {
    %c0_i32 = arith.constant 0 : i32
    %c0_i32_0 = arith.constant 0 : i32
    %c0_i32_1 = arith.constant 0 : i32
    return %c0_i32, %c0_i32_0 : i32, i32
  }
  func.func @transform_3(%arg0: i32) -> (i32, i32, i32) {
    %c0_i32 = arith.constant 0 : i32
    %c0_i32_0 = arith.constant 0 : i32
    %c0_i32_1 = arith.constant 0 : i32
    %c0_i32_2 = arith.constant 0 : i32
    return %c0_i32, %c0_i32_0, %c0_i32_1 : i32, i32, i32
  }
  func.func @transform_4(%arg0: i32) -> (i32, i32) {
    %c0_i32 = arith.constant 0 : i32
    %c0_i32_0 = arith.constant 0 : i32
    %c0_i32_1 = arith.constant 0 : i32
    return %c0_i32, %c0_i32_0 : i32, i32
  }
  func.func @transform_5(%arg0: i32) -> (i32, i32, i32) {
    %c0_i32 = arith.constant 0 : i32
    %c0_i32_0 = arith.constant 0 : i32
    %c0_i32_1 = arith.constant 0 : i32
    %c0_i32_2 = arith.constant 0 : i32
    return %c0_i32, %c0_i32_0, %c0_i32_1 : i32, i32, i32
  }
  func.func @transform_6(%arg0: i32) -> (i32, i32) {
    %c0_i32 = arith.constant 0 : i32
    %c0_i32_0 = arith.constant 0 : i32
    %c0_i32_1 = arith.constant 0 : i32
    return %c0_i32, %c0_i32_0 : i32, i32
  }
  func.func @transform_7(%arg0: i32) -> (i32, i32) {
    %c0_i32 = arith.constant 0 : i32
    %c0_i32_0 = arith.constant 0 : i32
    %c0_i32_1 = arith.constant 0 : i32
    return %c0_i32, %c0_i32_0 : i32, i32
  }
  func.func @transform_8(%arg0: i32) -> (i32, i32) {
    %c0_i32 = arith.constant 0 : i32
    %c0_i32_0 = arith.constant 0 : i32
    %c0_i32_1 = arith.constant 0 : i32
    return %c0_i32, %c0_i32_0 : i32, i32
  }
  func.func @transform_9(%arg0: i32) -> (i32, i32, i32) {
    %c0_i32 = arith.constant 0 : i32
    %c0_i32_0 = arith.constant 0 : i32
    %c0_i32_1 = arith.constant 0 : i32
    return %arg0, %c0_i32, %c0_i32_0 : i32, i32, i32
  }
}

</mosaic_0001>

<bundles_post_ra>
// kernel: fgsm_forward.1
= control target key start
LH: loop header
LB: loop body
LE: loop exit
PB: predicated region body
PF: predicated region fallthrough
CT: control target
= control target key end

     0   :  { %14 = vsyncpa [#allocation3], 0  ;;  %s16479_s0 = inlined_call_operand.vmem [shape: f32[2,4,144,32], index: 0, kind: input, shape index: {}]   ;;  %s16480_s1 = inlined_call_operand.vmem [shape: f32[32,128], index: 1, kind: input, shape index: {}]   ;;  %s16481_s2 = inlined_call_operand.vmem [shape: f32[1,128], index: 2, kind: input, shape index: {}]   ;;  %s16482_s3 = inlined_call_operand.vmem [shape: f32[25,128,128], index: 3, kind: input, shape index: {}]   ;;  %s16483_s4 = inlined_call_operand.vmem [shape: f32[1,128], index: 4, kind: input, shape index: {}]   ;;  %s16484_s5 = inlined_call_operand.vmem [shape: f32[16,128,128], index: 5, kind: input, shape index: {}]   ;;  %s16485_s6 = inlined_call_operand.vmem [shape: f32[1,128], index: 6, kind: input, shape index: {}]   ;;  %s16486_s7 = inlined_call_operand.vmem [shape: f32[128,128], index: 7, kind: input, shape index: {}]   ;;  %s16487_s8 = inlined_call_operand.vmem [shape: f32[1,128], index: 8, kind: input, shape index: {}]   ;;  %s16488_s9 = inlined_call_operand.hbm [shape: f32[2,1,128], index: 9, kind: output, shape index: {}]  }
   0x1   :  { %16 = vsyncpa [#allocation3 + $0x1], 0  ;;  %s12818_s30 = smov 0   ;;  %s12820_s10 = smov 0  }
   0x2   :  { %s12822_s11 = smov 0   ;;  %s12824_s12 = smov 0  }
   0x3 LB: > { %s12839_s13 = sadd.s32 4294967295, %s12762_s12   ;;  %s7268_s14 = sadd.s32 4294967294, %s12762_s12   ;;  %s12762_s12 = sphi %s12824_s12, %s16703_s12   ;;  %s12758_s11 = sphi %s12822_s11, %s16702_s11   ;;  %s12754_s10 = sphi %s12820_s10, %s16701_s10   ;;  %s12750_s30 = sphi %s12818_s30, %s16700_s30  }
   0x4   : > { %s12843_s15 = sadd.s32 1, %s12762_s12   ;;  %s223_s16 = sadd.s32 1, %s12758_s11 }
   0x5   : > { %s220_s17 = ssub.s32 %s12762_s12, %s12843_s15  ;;  %p233_p0 = scmp.ne.s32.totalorder %s12758_s11, %s12754_s10 }
   0x6   : > { %p221_p1 = scmp.eq.s32.totalorder %s220_s17, 0  ;;  %p234_p2 = scmp.eq.s32.totalorder %s12839_s13, 1 }
   0x7   : > { %p239_p3 = scmp.ne.s32.totalorder %s12754_s10, %s12750_s30  ;;  %p240_p4 = scmp.eq.s32.totalorder %s7268_s14, 1 }
   0x8   : > { %s12854_s18 = scalar_select %p221_p1, %s12758_s11, %s223_s16  }
   0x9   : > { %p12856_p5 = por %p234_p2, %p233_p0  ;;  %p12860_p6 = por %p240_p4, %p239_p3 }
   0xa   : > { %p7271_p7 = scmp.ge.s32.totalorder %s12762_s12, 1  ;;  %p290_p8 = scmp.lt.s32.totalorder %s12762_s12, 3 }
   0xc   : > { %p291_p9 = pnand %p7271_p7, %p290_p8 }
   0xe   : > { %294 = sbr.rel (%p291_p9) target bundleno = 2489 (0x9b9), region = 56 }
  0x15   : > { %v330_v0 = vld [vmem:[%s16480_s1] sm:$0xff]  ;;  %v331_v1 = vld [vmem:[%s16480_s1 + $0x8] sm:$0xff]  ;;  %v332_v2 = vld [vmem:[%s16480_s1 + $0x10] sm:$0xff]  ;;  %p325_p10 = scmp.lt.s32.totalorder %s12839_s13, 1  ;;  %vm352_vm0 = vcmask 261120   ;;  %vm1389_vm1 = vcmask 1046528  }
  0x16   : > { %v12876_v3 = vpack.c.bf16 %v331_v1, %v330_v0  ;;  %v333_v4 = vld [vmem:[%s16480_s1 + $0x18] sm:$0xff]  ;;  %vm1886_vm2 = vcmask 1044480   ;;  %vm2078_vm3 = vcmask 1043456   ;;  %vm1694_vm4 = vcmask 1045504   ;;  %s8025_s16 = sshll.u32 %s12839_s13, 4 }
  0x17   : > { %v12881_v5 = vpack.c.bf16 %v333_v4, %v332_v2  ;;  %s326_s29 = scalar_select %p325_p10, %s12839_s13, 1  ;;  %vm2428_vm5 = vcmask 1042432   ;;  %vm2620_vm6 = vcmask 1041408   ;;  %vm2812_vm7 = vcmask 1040384  }
  0x18   : > { %11091 = vmatprep.subr.bf16.mxu1 %v12876_v3  ;;  %11107 = vmatprep.subr.bf16.mxu0 %v12876_v3  ;;  %vm12766_vm8 = vmmov 0   ;;  %s16437_s24 = scalar_lea.hbm %s16488_s9, %s8025_s16  ;;  %s12767_s13 = smov [#allocation2]  }
  0x19   : > { %11093 = vmatpush3.bf16.msra.mxu1 %v12876_v3  ;;  %s12653_s14 = smul.u32 576, %s326_s29  ;;  %11109 = vmatpush3.bf16.msra.mxu0 %v12876_v3  ;;  %s12704_s27 = sshll.u32 %s12767_s13, 4  ;;  %s12705_s27 = int_to_ptr.vmem [resolvable:$false] %s12704_s27 }
  0x1a   : > { %11095 = vmatprep.subr.bf16.mxu1 %v12881_v5  ;;  %11111 = vmatprep.subr.bf16.mxu0 %v12881_v5  ;;  %s12706_s28 = scalar_lea.vmem %s12705_s27, 32 }
  0x1b   : > { %s12893_s21 = scalar_lea.vmem %s16479_s0, %s12653_s14  ;;  %s323_s14 = sand.u32 1, %s12754_s10  }
  0x1c   : > { %v334_v6 = vld [vmem:[%s12893_s21] sm:$0xff]  ;;  %v335_v7 = vld [vmem:[%s12893_s21 + $0x8] sm:$0xff]  ;;  %v336_v8 = vld [vmem:[%s12893_s21 + $0x10] sm:$0xff]  ;;  %s324_s17 = scalar_lea.vmem [#allocation2], %s323_s14  ;;  %s7201_s25 = scalar_lea.sflag [#allocation3], %s323_s14 }
  0x1d   : > { %11097 = vmatpush3.bf16.msra.mxu1 %v12881_v5  ;;  %9113 = vmatprep.mubr.msk.f32.mxu1 %vm352_vm0, %v334_v6  ;;  %v337_v9 = vld [vmem:[%s12893_s21 + $0x18] sm:$0xff]  ;;  %v338_v10 = vld [vmem:[%s12893_s21 + $0x20] sm:$0xff]  ;;  %v339_v11 = vld [vmem:[%s12893_s21 + $0x28] sm:$0xff] }
  0x1e   : > { %11099 = vmatprep.subr.bf16.mxu1 %v12876_v3  ;;  %11113 = vmatpush3.bf16.msra.mxu0 %v12881_v5  ;;  %v340_v12 = vld [vmem:[%s12893_s21 + $0x30] sm:$0xff]  ;;  %v7327_v13 = vld [vmem:[%s12893_s21 + $0x120] sm:$0xff]  ;;  %v341_v14 = vld [vmem:[%s12893_s21 + $0x38] sm:$0xff] }
  0x1f   : > { %9183 = vmatprep.mubr.msk.f32.mxu0 %vm352_vm0, %v7327_v13  ;;  %v7328_v15 = vld [vmem:[%s12893_s21 + $0x128] sm:$0xff]  ;;  %v342_v16 = vld [vmem:[%s12893_s21 + $0x40] sm:$0xff]  ;;  %v7329_v17 = vld [vmem:[%s12893_s21 + $0x130] sm:$0xff] }
  0x20   : > { %9114 = vmatmul.mubr.msk.f32.vlgmr.msra.gmra.mrb[0].mxu1 %vm352_vm0, %v335_v7  ;;  %v7330_v18 = vld [vmem:[%s12893_s21 + $0x138] sm:$0xff]  ;;  %v7331_v19 = vld [vmem:[%s12893_s21 + $0x140] sm:$0xff]  ;;  %v343_v20 = vld [vmem:[%s12893_s21 + $0x48] sm:$0xff] }
  0x21   : > { %11101 = vmatpush3.bf16.msra.mxu1 %v12876_v3  ;;  %9116 = vmatprep.mubr.msk.f32.mxu1 %vm352_vm0, %v336_v8  ;;  %v344_v21 = vld [vmem:[%s12893_s21 + $0x50] sm:$0xff]  ;;  %v7332_v22 = vld [vmem:[%s12893_s21 + $0x148] sm:$0xff]  ;;  %v345_v24 = vld [vmem:[%s12893_s21 + $0x58] sm:$0xff] }
  0x22   : > { %11103 = vmatprep.subr.bf16.mxu1 %v12881_v5  ;;  %9184 = vmatmul.mubr.msk.f32.vlgmr.msra.gmra.mrb[0].mxu0 %vm352_vm0, %v7328_v15  ;;  %v7333_v23 = vld [vmem:[%s12893_s21 + $0x150] sm:$0xff]  ;;  %v346_v25 = vld [vmem:[%s12893_s21 + $0x60] sm:$0xff]  ;;  %v7334_v26 = vld [vmem:[%s12893_s21 + $0x158] sm:$0xff] }
  0x23   : > { %9186 = vmatprep.mubr.msk.f32.mxu0 %vm352_vm0, %v7329_v17  ;;  %v7335_v27 = vld [vmem:[%s12893_s21 + $0x160] sm:$0xff]  ;;  %v347_v28 = vld [vmem:[%s12893_s21 + $0x68] sm:$0xff]  ;;  %v348_v29 = vld [vmem:[%s12893_s21 + $0x70] sm:$0xff] }
  0x24   : > { %9117 = vmatmul.mubr.msk.f32.gmra.mrb[2].mxu1 %vm352_vm0, %v337_v9  ;;  %v7336_v30 = vld [vmem:[%s12893_s21 + $0x168] sm:$0xff]  ;;  %v7337_v31 = vld [vmem:[%s12893_s21 + $0x170] sm:$0xff]  ;;  %v349_v32 = vld [vmem:[%s12893_s21 + $0x78] sm:$0xff] }
  0x25   : > { %9119 = vmatprep.mubr.msk.f32.mxu1 %vm352_vm0, %v338_v10  ;;  %11105 = vmatpush3.bf16.msra.mxu1 %v12881_v5  ;;  %v350_v33 = vld [vmem:[%s12893_s21 + $0x80] sm:$0xff]  ;;  %v7338_v34 = vld [vmem:[%s12893_s21 + $0x178] sm:$0xff]  ;;  %v351_v36 = vld [vmem:[%s12893_s21 + $0x88] sm:$0xff] }
  0x26   : > { %12330 = vmatprep.subr.bf16.mxu1 %v12876_v3  ;;  %9187 = vmatmul.mubr.msk.f32.gmra.mrb[2].mxu0 %vm352_vm0, %v7330_v18  ;;  %v7339_v35 = vld [vmem:[%s12893_s21 + $0x180] sm:$0xff]  ;;  %v7291_v37 = vld [vmem:[%s12893_s21 + $0x90] sm:$0xff]  ;;  %v7340_v38 = vld [vmem:[%s12893_s21 + $0x188] sm:$0xff] }
  0x27   : > { %9189 = vmatprep.mubr.msk.f32.mxu0 %vm352_vm0, %v7331_v19  ;;  %v7341_v39 = vld [vmem:[%s12893_s21 + $0x190] sm:$0xff]  ;;  %v7292_v40 = vld [vmem:[%s12893_s21 + $0x98] sm:$0xff]  ;;  %v7293_v41 = vld [vmem:[%s12893_s21 + $0xa0] sm:$0xff] }
  0x28   : > { %9120 = vmatmul.mubr.msk.f32.gmra.mrb[4].mxu1 %vm352_vm0, %v339_v11  ;;  %v7342_v42 = vld [vmem:[%s12893_s21 + $0x198] sm:$0xff]  ;;  %v7294_v43 = vld [vmem:[%s12893_s21 + $0xa8] sm:$0xff]  ;;  %v7295_v44 = vld [vmem:[%s12893_s21 + $0xb0] sm:$0xff] }
  0x29   : > { %9122 = vmatprep.mubr.msk.f32.mxu1 %vm352_vm0, %v340_v12  ;;  %v7296_v45 = vld [vmem:[%s12893_s21 + $0xb8] sm:$0xff]  ;;  %v7297_v46 = vld [vmem:[%s12893_s21 + $0xc0] sm:$0xff]  ;;  %v7298_v47 = vld [vmem:[%s12893_s21 + $0xc8] sm:$0xff] }
  0x2a   : > { %9190 = vmatmul.mubr.msk.f32.gmra.mrb[4].mxu0 %vm352_vm0, %v7332_v22  ;;  %v7299_v48 = vld [vmem:[%s12893_s21 + $0xd0] sm:$0xff]  ;;  %v7300_v49 = vld [vmem:[%s12893_s21 + $0xd8] sm:$0xff]  ;;  %v7301_v50 = vld [vmem:[%s12893_s21 + $0xe0] sm:$0xff] }
  0x2b   : > { %9192 = vmatprep.mubr.msk.f32.mxu0 %vm352_vm0, %v7333_v23  ;;  %v7302_v51 = vld [vmem:[%s12893_s21 + $0xe8] sm:$0xff]  ;;  %v7303_v52 = vld [vmem:[%s12893_s21 + $0xf0] sm:$0xff]  ;;  %v7304_v53 = vld [vmem:[%s12893_s21 + $0xf8] sm:$0xff] }
  0x2c   : > { %9123 = vmatmul.mubr.msk.f32.gmra.mrb[6].mxu1 %vm352_vm0, %v341_v14  ;;  %v7305_v54 = vld [vmem:[%s12893_s21 + $0x100] sm:$0xff]  ;;  %v7306_v55 = vld [vmem:[%s12893_s21 + $0x108] sm:$0xff]  ;;  %v7307_v56 = vld [vmem:[%s12893_s21 + $0x110] sm:$0xff] }
  0x2d   : > { %9125 = vmatprep.mubr.msk.f32.mxu1 %vm352_vm0, %v342_v16  ;;  %v7308_v57 = vld [vmem:[%s12893_s21 + $0x118] sm:$0xff]  ;;  %v7343_v58 = vld [vmem:[%s12893_s21 + $0x1a0] sm:$0xff]  ;;  %v7344_v59 = vld [vmem:[%s12893_s21 + $0x1a8] sm:$0xff] }
  0x2e   : > { %9193 = vmatmul.mubr.msk.f32.gmra.mrb[6].mxu0 %vm352_vm0, %v7334_v26  ;;  %v7363_v60 = vld [vmem:[%s12893_s21 + $0x1b0] sm:$0xff]  ;;  %v7364_v61 = vld [vmem:[%s12893_s21 + $0x1b8] sm:$0xff]  ;;  %v7365_v62 = vld [vmem:[%s12893_s21 + $0x1c0] sm:$0xff] }
  0x2f   : > { %9195 = vmatprep.mubr.msk.f32.mxu0 %vm352_vm0, %v7335_v27  ;;  %v7366_v63 = vld [vmem:[%s12893_s21 + $0x1c8] sm:$0xff]  ;;  %v7367_v0 = vld [vmem:[%s12893_s21 + $0x1d0] sm:$0xff]  ;;  %v7368_v1 = vld [vmem:[%s12893_s21 + $0x1d8] sm:$0xff] }
  0x30   : > { %9126 = vmatmul.mubr.msk.f32.gmra.mrb[8].mxu1 %vm352_vm0, %v343_v20  ;;  %v7369_v2 = vld [vmem:[%s12893_s21 + $0x1e0] sm:$0xff]  ;;  %v7371_v4 = vld [vmem:[%s12893_s21 + $0x1f0] sm:$0xff]  ;;  %v7374_v7 = vld [vmem:[%s12893_s21 + $0x208] sm:$0xff] }
  0x31   : > { %9128 = vmatprep.mubr.msk.f32.mxu1 %vm352_vm0, %v344_v21  ;;  %v7373_v6 = vld [vmem:[%s12893_s21 + $0x200] sm:$0xff]  ;;  %v7375_v8 = vld [vmem:[%s12893_s21 + $0x210] sm:$0xff]  ;;  %v7376_v9 = vld [vmem:[%s12893_s21 + $0x218] sm:$0xff] }
  0x32   : > { %9196 = vmatmul.mubr.msk.f32.gmra.mrb[8].mxu0 %vm352_vm0, %v7336_v30  ;;  %v7377_v10 = vld [vmem:[%s12893_s21 + $0x220] sm:$0xff]  ;;  %v7378_v11 = vld [vmem:[%s12893_s21 + $0x228] sm:$0xff]  ;;  %v7379_v12 = vld [vmem:[%s12893_s21 + $0x230] sm:$0xff] }
  0x33   : > { %9198 = vmatprep.mubr.msk.f32.mxu0 %vm352_vm0, %v7337_v31  ;;  %v7380_v13 = vld [vmem:[%s12893_s21 + $0x238] sm:$0xff]  ;;  %v7400_v14 = vld [vmem:[%s16482_s3 + $0x80] sm:$0xff]  ;;  %v7401_v15 = vld [vmem:[%s16482_s3 + $0x88] sm:$0xff] }
  0x34   : > { %9129 = vmatmul.mubr.msk.f32.gmra.mrb[10].mxu1 %vm352_vm0, %v345_v24  ;;  %v7432_v16 = vld [vmem:[%s16482_s3 + $0x180] sm:$0xff]  ;;  %v11122_v17 = vpack.c.bf16 %v7401_v15, %v7400_v14  ;;  %v7433_v18 = vld [vmem:[%s16482_s3 + $0x188] sm:$0xff]  ;;  %v7402_v20 = vld [vmem:[%s16482_s3 + $0x90] sm:$0xff] }
  0x35   : > { %9131 = vmatprep.mubr.msk.f32.mxu1 %vm352_vm0, %v346_v25  ;;  %v11218_v19 = vpack.c.bf16 %v7433_v18, %v7432_v16  ;;  %v7403_v21 = vld [vmem:[%s16482_s3 + $0x98] sm:$0xff]  ;;  %v7434_v22 = vld [vmem:[%s16482_s3 + $0x190] sm:$0xff]  ;;  %v7404_v26 = vld [vmem:[%s16482_s3 + $0xa0] sm:$0xff] }
  0x36   : > { %9199 = vmatmul.mubr.msk.f32.gmra.mrb[10].mxu0 %vm352_vm0, %v7338_v34  ;;  %v11126_v23 = vpack.c.bf16 %v7403_v21, %v7402_v20  ;;  %v7435_v24 = vld [vmem:[%s16482_s3 + $0x198] sm:$0xff]  ;;  %v7405_v27 = vld [vmem:[%s16482_s3 + $0xa8] sm:$0xff]  ;;  %v7438_v34 = vld [vmem:[%s16482_s3 + $0x1b0] sm:$0xff] }
  0x37   : > { %9201 = vmatprep.mubr.msk.f32.mxu0 %vm352_vm0, %v7339_v35  ;;  %11219 = vmatprep.subr.bf16.mxu0 %v11218_v19  ;;  %v11222_v25 = vpack.c.bf16 %v7435_v24, %v7434_v22  ;;  %v7437_v30 = vld [vmem:[%s16482_s3 + $0x1a8] sm:$0xff] }
  0x38   : > { %9132 = vmatmul.mubr.msk.f32.gmra.mrb[12].mxu1 %vm352_vm0, %v347_v28  ;;  %11221 = vmatpush3.bf16.msra.mxu0 %v11218_v19  ;;  %v7436_v28 = vld [vmem:[%s16482_s3 + $0x1a0] sm:$0xff] }
  0x39   : > { %9134 = vmatprep.mubr.msk.f32.mxu1 %vm352_vm0, %v348_v29  ;;  %11223 = vmatprep.subr.bf16.mxu0 %v11222_v25  ;;  %v11130_v29 = vpack.c.bf16 %v7405_v27, %v7404_v26  ;;  %v11226_v31 = vpack.c.bf16 %v7437_v30, %v7436_v28 }
  0x3a   : > { %9202 = vmatmul.mubr.msk.f32.gmra.mrb[12].mxu0 %vm352_vm0, %v7340_v38  ;;  %v7408_v38 = vld [vmem:[%s16482_s3 + $0xc0] sm:$0xff] }
  0x3b   : > { %9204 = vmatprep.mubr.msk.f32.mxu0 %vm352_vm0, %v7341_v39  ;;  %v7409_v39 = vld [vmem:[%s16482_s3 + $0xc8] sm:$0xff] }
  0x3c   : > { %9135 = vmatmul.mubr.msk.f32.gmra.mrb[14].mxu1 %vm352_vm0, %v349_v32  ;;  %11225 = vmatpush3.bf16.msra.mxu0 %v11222_v25  ;;  %v7406_v32 = vld [vmem:[%s16482_s3 + $0xb0] sm:$0xff] }
  0x3d   : > { %9137 = vmatprep.mubr.msk.f32.mxu1 %vm352_vm0, %v350_v33  ;;  %11227 = vmatprep.subr.bf16.mxu0 %v11226_v31  ;;  %v7407_v33 = vld [vmem:[%s16482_s3 + $0xb8] sm:$0xff] }
  0x3e   : > { %9205 = vmatmul.mubr.msk.f32.gmra.mrb[14].mxu0 %vm352_vm0, %v7342_v42  ;;  %v11134_v35 = vpack.c.bf16 %v7407_v33, %v7406_v32  ;;  %v7441_v42 = vld [vmem:[%s16482_s3 + $0x1c8] sm:$0xff] }
  0x40   : > { %9138 = vmatmul.mubr.msk.f32.gmra.mrb[16].mxu1 %vm352_vm0, %v351_v36  ;;  %11229 = vmatpush3.bf16.msra.mxu0 %v11226_v31  ;;  %v7439_v36 = vld [vmem:[%s16482_s3 + $0x1b8] sm:$0xff] }
  0x41   : > { %9148 = vmatprep.mubr.msk.f32.mxu1 %vm352_vm0, %v7291_v37  ;;  %v11230_v37 = vpack.c.bf16 %v7439_v36, %v7438_v34 }
  0x43   : > { %11231 = vmatprep.subr.bf16.mxu0 %v11230_v37 }
  0x44   : > { %9149 = vmatmul.mubr.msk.f32.vlgmr.msra.gmra.mrb[18].mxu1 %vm352_vm0, %v7292_v40  ;;  %v7440_v40 = vld [vmem:[%s16482_s3 + $0x1c0] sm:$0xff]  ;;  %11233 = vmatpush3.bf16.msra.mxu0 %v11230_v37 }
  0x45   : > { %12332 = vmatpush3.bf16.msra.mxu1 %v12876_v3  ;;  %9151 = vmatprep.mubr.msk.f32.mxu1 %vm352_vm0, %v7293_v41  ;;  %v11138_v41 = vpack.c.bf16 %v7409_v39, %v7408_v38 }
  0x46   : > { %12331 = vmatprep.subr.bf16.mxu1 %v12881_v5 }
  0x48   : > { %9152 = vmatmul.mubr.msk.f32.gmra.mrb[20].mxu1 %vm352_vm0, %v7294_v43  ;;  %v11234_v43 = vpack.c.bf16 %v7441_v42, %v7440_v40 }
  0x49   : > { %9154 = vmatprep.mubr.msk.f32.mxu1 %vm352_vm0, %v7295_v44  ;;  %12333 = vmatpush3.bf16.msra.mxu1 %v12881_v5  ;;  %v7410_v44 = vld [vmem:[%s16482_s3 + $0xd0] sm:$0xff] }
  0x4a   : > { %11115 = vmatprep.subr.bf16.mxu1 %v12876_v3  ;;  %11235 = vmatprep.subr.bf16.mxu0 %v11234_v43 }
  0x4b   : > { %11237 = vmatpush3.bf16.msra.mxu0 %v11234_v43  ;;  %v1347_v43 = vld [vmem:[%s16482_s3 + $0x20] sm:$0xff] }
  0x4c   : > { %9155 = vmatmul.mubr.msk.f32.gmra.mrb[22].mxu1 %vm352_vm0, %v7296_v45  ;;  %v7411_v45 = vld [vmem:[%s16482_s3 + $0xd8] sm:$0xff] }
  0x4d   : > { %9157 = vmatprep.mubr.msk.f32.mxu1 %vm352_vm0, %v7297_v46  ;;  %v7442_v46 = vld [vmem:[%s16482_s3 + $0x1d0] sm:$0xff] }
  0x50   : > { %9158 = vmatmul.mubr.msk.f32.gmra.mrb[24].mxu1 %vm352_vm0, %v7298_v47  ;;  %v11142_v47 = vpack.c.bf16 %v7411_v45, %v7410_v44 }
  0x51   : > { %9160 = vmatprep.mubr.msk.f32.mxu1 %vm352_vm0, %v7299_v48  ;;  %v7443_v48 = vld [vmem:[%s16482_s3 + $0x1d8] sm:$0xff] }
  0x54   : > { %9161 = vmatmul.mubr.msk.f32.gmra.mrb[26].mxu1 %vm352_vm0, %v7300_v49  ;;  %v11238_v49 = vpack.c.bf16 %v7443_v48, %v7442_v46 }
  0x55   : > { %9163 = vmatprep.mubr.msk.f32.mxu1 %vm352_vm0, %v7301_v50  ;;  %v7412_v50 = vld [vmem:[%s16482_s3 + $0xe0] sm:$0xff] }
  0x56   : > { %11239 = vmatprep.subr.bf16.mxu0 %v11238_v49 }
  0x57   : > { %11241 = vmatpush3.bf16.msra.mxu0 %v11238_v49  ;;  %v7450_v49 = vld [vmem:[%s16482_s3 + $0x210] sm:$0xff] }
  0x58   : > { %9164 = vmatmul.mubr.msk.f32.gmra.mrb[28].mxu1 %vm352_vm0, %v7302_v51  ;;  %v7413_v51 = vld [vmem:[%s16482_s3 + $0xe8] sm:$0xff] }
  0x59   : > { %9166 = vmatprep.mubr.msk.f32.mxu1 %vm352_vm0, %v7303_v52  ;;  %v7444_v52 = vld [vmem:[%s16482_s3 + $0x1e0] sm:$0xff] }
  0x5c   : > { %9167 = vmatmul.mubr.msk.f32.gmra.mrb[30].mxu1 %vm352_vm0, %v7304_v53  ;;  %v11146_v53 = vpack.c.bf16 %v7413_v51, %v7412_v50 }
  0x5d   : > { %9169 = vmatprep.mubr.msk.f32.mxu1 %vm352_vm0, %v7305_v54  ;;  %v7445_v54 = vld [vmem:[%s16482_s3 + $0x1e8] sm:$0xff] }
  0x60   : > { %9170 = vmatmul.mubr.msk.f32.gmra.mrb[32].mxu1 %vm352_vm0, %v7306_v55  ;;  %v11242_v55 = vpack.c.bf16 %v7445_v54, %v7444_v52 }
  0x61   : > { %9172 = vmatprep.mubr.msk.f32.mxu1 %vm352_vm0, %v7307_v56  ;;  %v7414_v56 = vld [vmem:[%s16482_s3 + $0xf0] sm:$0xff] }
  0x62   : > { %11243 = vmatprep.subr.bf16.mxu0 %v11242_v55 }
  0x63   : > { %11245 = vmatpush3.bf16.msra.mxu0 %v11242_v55 }
  0x64   : > { %9173 = vmatmul.mubr.msk.f32.gmra.mrb[34].mxu1 %vm352_vm0, %v7308_v57  ;;  %v7415_v57 = vld [vmem:[%s16482_s3 + $0xf8] sm:$0xff] }
  0x65   : > { %9207 = vmatprep.mubr.msk.f32.mxu1 %vm352_vm0, %v7343_v58  ;;  %v7446_v58 = vld [vmem:[%s16482_s3 + $0x1f0] sm:$0xff] }
  0x68   : > { %9208 = vmatmul.mubr.msk.f32.vlgmr.msra.gmra.mrb[36].mxu1 %vm352_vm0, %v7344_v59  ;;  %v11150_v59 = vpack.c.bf16 %v7415_v57, %v7414_v56 }
  0x69   : > { %11117 = vmatpush3.bf16.msra.mxu1 %v12876_v3  ;;  %9218 = vmatprep.mubr.msk.f32.mxu1 %vm352_vm0, %v7363_v60  ;;  %v7370_v3 = vld [vmem:[%s12893_s21 + $0x1e8] sm:$0xff]  ;;  %v7447_v60 = vld [vmem:[%s16482_s3 + $0x1f8] sm:$0xff] }
  0x6a   : > { %11119 = vmatprep.subr.bf16.mxu1 %v12881_v5 }
  0x6d   : > { %11121 = vmatpush3.bf16.msra.mxu1 %v12881_v5  ;;  %v7372_v5 = vld [vmem:[%s12893_s21 + $0x1f8] sm:$0xff]  ;;  %s7213_s21 = sshll.u32 %s324_s17, 4  ;;  %s16439_s21 = int_to_ptr.vmem [resolvable:$true] %s7213_s21 }
  0x6e   : > { %11123 = vmatprep.subr.bf16.mxu1 %v11122_v17  ;;  %s12700_s26 = scalar_lea.vmem %s16439_s21, 16  ;;  %p12707_p0 = scmp.lt.s32.totalorder %s16439_s21, %s12705_s27 }
  0x6f   : > { %p12701_p11 = scmp.ne.s32.totalorder %s16439_s21, %s12700_s26  ;;  %p12708_p1 = scmp.lt.s32.totalorder %s12706_s28, %s12700_s26 }
  0x70   : > { %9219 = vmatmul.mubr.msk.f32.vlgmr.msra.gmra.mrb[38].mxu1 %vm352_vm0, %v7364_v61  ;;  %v11246_v61 = vpack.c.bf16 %v7447_v60, %v7446_v58 }
  0x71   : > { %9221 = vmatprep.mubr.msk.f32.mxu1 %vm352_vm0, %v7365_v62  ;;  %11125 = vmatpush3.bf16.msra.mxu1 %v11122_v17  ;;  %v1343_v62 = vld [vmem:[%s16482_s3] sm:$0xff]  ;;  %p12702_p12 = pnand %p12701_p11, %p12856_p5  ;;  %p12709_p2 = por %p12708_p1, %p12707_p0 }
  0x72   : > { %11127 = vmatprep.subr.bf16.mxu1 %v11126_v23  ;;  %11247 = vmatprep.subr.bf16.mxu0 %v11246_v61 }
  0x73   : > { %11249 = vmatpush3.bf16.msra.mxu0 %v11246_v61  ;;  %p12703_p13 = pneg %p12702_p12 }
  0x74   : > { %9222 = vmatmul.mubr.msk.f32.gmra.mrb[40].mxu1 %vm352_vm0, %v7366_v63  ;;  %v1344_v63 = vld [vmem:[%s16482_s3 + $0x8] sm:$0xff] }
  0x75   : > { %9224 = vmatprep.mubr.msk.f32.mxu1 %vm352_vm0, %v7367_v0  ;;  %11129 = vmatpush3.bf16.msra.mxu1 %v11126_v23  ;;  %v7448_v0 = vld [vmem:[%s16482_s3 + $0x200] sm:$0xff]  ;;  %p12710_p3 = pnand %p12709_p2, %p12703_p13 }
  0x76   : > { %11131 = vmatprep.subr.bf16.mxu1 %v11130_v29 }
  0x78   : > { %9225 = vmatmul.mubr.msk.f32.gmra.mrb[42].mxu1 %vm352_vm0, %v7368_v1  ;;  %v13158_v1 = vpack.c.bf16 %v1344_v63, %v1343_v62 }
  0x79   : > { %9227 = vmatprep.mubr.msk.f32.mxu1 %vm352_vm0, %v7369_v2  ;;  %11133 = vmatpush3.bf16.msra.mxu1 %v11130_v29  ;;  %v7449_v2 = vld [vmem:[%s16482_s3 + $0x208] sm:$0xff] }
  0x7a   : > { %11135 = vmatprep.subr.bf16.mxu1 %v11134_v35 }
  0x7c   : > { %9228 = vmatmul.mubr.msk.f32.gmra.mrb[44].mxu1 %vm352_vm0, %v7370_v3  ;;  %v13163_v3 = vpack.c.bf16 %v7449_v2, %v7448_v0  ;;  %v1346_v2 = vld [vmem:[%s16482_s3 + $0x18] sm:$0xff] }
  0x7d   : > { %9230 = vmatprep.mubr.msk.f32.mxu1 %vm352_vm0, %v7371_v4  ;;  %11137 = vmatpush3.bf16.msra.mxu1 %v11134_v35 }
  0x7e   : > { %11139 = vmatprep.subr.bf16.mxu1 %v11138_v41  ;;  %11251 = vmatprep.subr.bf16.mxu0 %v13163_v3 }
  0x80   : > { %9231 = vmatmul.mubr.msk.f32.gmra.mrb[46].mxu1 %vm352_vm0, %v7372_v5 }
  0x81   : > { %9233 = vmatprep.mubr.msk.f32.mxu1 %vm352_vm0, %v7373_v6  ;;  %11141 = vmatpush3.bf16.msra.mxu1 %v11138_v41 }
  0x82   : > { %11143 = vmatprep.subr.bf16.mxu1 %v11142_v47 }
  0x84   : > { %9234 = vmatmul.mubr.msk.f32.gmra.mrb[48].mxu1 %vm352_vm0, %v7374_v7 }
  0x85   : > { %9236 = vmatprep.mubr.msk.f32.mxu1 %vm352_vm0, %v7375_v8  ;;  %11145 = vmatpush3.bf16.msra.mxu1 %v11142_v47  ;;  %v7451_v47 = vld [vmem:[%s16482_s3 + $0x218] sm:$0xff] }
  0x86   : > { %11147 = vmatprep.subr.bf16.mxu1 %v11146_v53 }
  0x88   : > { %9237 = vmatmul.mubr.msk.f32.gmra.mrb[50].mxu1 %vm352_vm0, %v7376_v9 }
  0x89   : > { %9239 = vmatprep.mubr.msk.f32.mxu1 %vm352_vm0, %v7377_v10  ;;  %11149 = vmatpush3.bf16.msra.mxu1 %v11146_v53  ;;  %v13308_v53 = vld [vmem:[%s16481_s2] ss:$0 sm:$0xff] }
  0x8a   : > { %11151 = vmatprep.subr.bf16.mxu1 %v11150_v59 }
  0x8c   : > { %9240 = vmatmul.mubr.msk.f32.gmra.mrb[52].mxu1 %vm352_vm0, %v7378_v11 }
  0x8d   : > { %9242 = vmatprep.mubr.msk.f32.mxu1 %vm352_vm0, %v7379_v12  ;;  %11153 = vmatpush3.bf16.msra.mxu1 %v11150_v59 }
  0x8e   : > { %11155 = vmatprep.subr.bf16.mxu1 %v13158_v1 }
  0x90   : > { %9243 = vmatmul.mubr.msk.f32.gmra.mrb[54].mxu1 %vm352_vm0, %v7380_v13 }
  0xf3   : > { %v13167_v4 = vpop.f32.mrb[0].mxu1 }
  0xf4   : > { %v13169_v5 = vpop.f32.mrb[1].mxu1 }
  0xf5   : > { %v13179_v10 = vpop.f32.mrb[0].mxu0 }
  0xf6   : > { %v13181_v11 = vpop.f32.mrb[1].mxu0 }
  0xf7   : > { %v13171_v6 = vpop.f32.mrb[2].mxu1 }
  0xf8   : > { %v13173_v7 = vpop.f32.mrb[3].mxu1 }
  0xf9   : > { %v13187_v14 = vpop.f32.mrb[2].mxu0 }
  0xfa   : > { %v13189_v15 = vpop.f32.mrb[3].mxu0 }
  0xfb   : > { %v13175_v8 = vpop.f32.mrb[4].mxu1 }
  0xfc   : > { %v13177_v9 = vpop.f32.mrb[5].mxu1 }
  0xfd   : > { %v13195_v18 = vpop.f32.mrb[4].mxu0 }
  0xfe   : > { %v13197_v19 = vpop.f32.mrb[5].mxu0 }
  0xff   : > { %v13183_v12 = vpop.f32.mrb[6].mxu1 }
 0x100   : > { %v13185_v13 = vpop.f32.mrb[7].mxu1 }
 0x101   : > { %v13203_v22 = vpop.f32.mrb[6].mxu0 }
 0x102   : > { %v13205_v23 = vpop.f32.mrb[7].mxu0 }
 0x103   : > { %v13191_v16 = vpop.f32.mrb[8].mxu1 }
 0x104   : > { %v13193_v17 = vpop.f32.mrb[9].mxu1 }
 0x105   : > { %v13211_v26 = vpop.f32.mrb[8].mxu0 }
 0x106   : > { %v13213_v27 = vpop.f32.mrb[9].mxu0 }
 0x107   : > { %v13199_v20 = vpop.f32.mrb[10].mxu1 }
 0x108   : > { %v13201_v21 = vpop.f32.mrb[11].mxu1 }
 0x109   : > { %v13219_v30 = vpop.f32.mrb[10].mxu0 }
 0x10a   : > { %v13221_v31 = vpop.f32.mrb[11].mxu0 }
 0x10b   : > { %v13207_v24 = vpop.f32.mrb[12].mxu1 }
 0x10c   : > { %v13209_v25 = vpop.f32.mrb[13].mxu1 }
 0x10d   : > { %16549 = vst [vmem:[#allocation5_spill] sm:$0xff] %v13209_v25  ;;  %v13227_v34 = vpop.f32.mrb[12].mxu0 }
 0x10e   : > { %v13229_v35 = vpop.f32.mrb[13].mxu0 }
 0x10f   : > { %v13215_v28 = vpop.f32.mrb[14].mxu1 }
 0x110   : > { %16550 = vst [vmem:[#allocation6_spill] sm:$0xff] %v13215_v28  ;;  %v13217_v29 = vpop.f32.mrb[15].mxu1  ;;  %v7456_v28 = vld [vmem:[%s16482_s3 + $0x240] sm:$0xff] }
 0x111   : > { %16551 = vst [vmem:[#allocation7_spill] sm:$0xff] %v13217_v29  ;;  %v13233_v40 = vpop.f32.mrb[14].mxu0  ;;  %v13355_v29 = vpack.c.bf16 %v7451_v47, %v7450_v49 }
 0x112   : > { %16554 = vst [vmem:[#allocation10_spill] sm:$0xff] %v13233_v40  ;;  %v13235_v41 = vpop.f32.mrb[15].mxu0 }
 0x113   : > { %v13223_v32 = vpop.f32.mrb[16].mxu1  ;;  %16555 = vst [vmem:[#allocation11_spill] sm:$0xff] %v13235_v41  ;;  %v7457_v41 = vld [vmem:[%s16482_s3 + $0x248] sm:$0xff] }
 0x114   : > { %16552 = vst [vmem:[#allocation8_spill] sm:$0xff] %v13223_v32  ;;  %v13225_v33 = vpop.f32.mrb[17].mxu1 }
 0x115   : > { %16553 = vst [vmem:[#allocation9_spill] sm:$0xff] %v13225_v33  ;;  %v7453_v33 = vld [vmem:[%s16482_s3 + $0x228] sm:$0xff] }
 0x117   : > { %v9150_v36 = vpop.f32.mrb[18].mxu1 }
 0x118   : > { %v1247_v37 = vmax.f32 %v13167_v4, %v9150_v36  ;;  %v701_v38 = vpop.f32.mrb[19].mxu1 }
 0x119   : > { %v1246_v39 = vmax.f32 %v13169_v5, %v701_v38  ;;  %v1345_v38 = vld [vmem:[%s16482_s3 + $0x10] sm:$0xff] }
 0x11b   : > { %v13237_v42 = vpop.f32.mrb[20].mxu1 }
 0x11c   : > { %v13241_v44 = vpop.f32.mrb[21].mxu1 }
 0x11f   : > { %v13245_v46 = vpop.f32.mrb[22].mxu1 }
 0x120   : > { %v13249_v48 = vpop.f32.mrb[23].mxu1 }
 0x123   : > { %v13253_v50 = vpop.f32.mrb[24].mxu1 }
 0x124   : > { %v13257_v52 = vpop.f32.mrb[25].mxu1 }
 0x127   : > { %v13261_v54 = vpop.f32.mrb[26].mxu1 }
 0x128   : > { %v13265_v56 = vpop.f32.mrb[27].mxu1 }
 0x12b   : > { %v13269_v58 = vpop.f32.mrb[28].mxu1 }
 0x12c   : > { %v13273_v60 = vpop.f32.mrb[29].mxu1 }
 0x12f   : > { %v13277_v62 = vpop.f32.mrb[30].mxu1 }
 0x130   : > { %v13281_v0 = vpop.f32.mrb[31].mxu1 }
 0x131   : > { %16556 = vst [vmem:[#allocation12_spill] sm:$0xff] %v13281_v0 }
 0x133   : > { %v13285_v4 = vpop.f32.mrb[32].mxu1 }
 0x134   : > { %16557 = vst [vmem:[#allocation13_spill] sm:$0xff] %v13285_v4  ;;  %v13289_v36 = vpop.f32.mrb[33].mxu1  ;;  %v1352_v4 = vld [vmem:[%s16482_s3 + $0x48] sm:$0xff] }
 0x135   : > { %16558 = vst [vmem:[#allocation14_spill] sm:$0xff] %v13289_v36 }
 0x137   : > { %v13293_v61 = vpop.f32.mrb[34].mxu1 }
 0x138   : > { %16559 = vst [vmem:[#allocation15_spill] sm:$0xff] %v13293_v61  ;;  %v13297_v59 = vpop.f32.mrb[35].mxu1 }
 0x139   : > { %16560 = vst [vmem:[#allocation16_spill] sm:$0xff] %v13297_v59 }
 0x13b   : > { %v13301_v57 = vpop.f32.mrb[36].mxu1 }
 0x13c   : > { %16561 = vst [vmem:[#allocation17_spill] sm:$0xff] %v13301_v57  ;;  %v13303_v55 = vpop.f32.mrb[37].mxu1 }
 0x13d   : > { %16562 = vst [vmem:[#allocation18_spill] sm:$0xff] %v13303_v55  ;;  %v1351_v55 = vld [vmem:[%s16482_s3 + $0x40] sm:$0xff] }
 0x143   : > { %v9220_v5 = vpop.f32.mrb[38].mxu1 }
 0x144   : > { %v1265_v63 = vmax.f32 %v13179_v10, %v9220_v5  ;;  %v1157_v51 = vpop.f32.mrb[39].mxu1  ;;  %v1348_v10 = vld [vmem:[%s16482_s3 + $0x28] sm:$0xff]  ;;  %v7452_v5 = vld [vmem:[%s16482_s3 + $0x220] sm:$0xff] }
 0x145   : > { %v1264_v45 = vmax.f32 %v13181_v11, %v1157_v51  ;;  %v1349_v11 = vld [vmem:[%s16482_s3 + $0x30] sm:$0xff]  ;;  %v1350_v51 = vld [vmem:[%s16482_s3 + $0x38] sm:$0xff]  ;;  %v13370_v47 = vpack.c.bf16 %v7453_v33, %v7452_v5  ;;  %v13388_v33 = vpack.c.bf16 %v7457_v41, %v7456_v28  ;;  %v16565_v28 = vmax.f32 %v13175_v8, %v13245_v46 }
 0x146   : > { %v1283_v59 = vmax.f32 %v1247_v37, %v1265_v63  ;;  %v7454_v37 = vld [vmem:[%s16482_s3 + $0x230] sm:$0xff]  ;;  %v7455_v63 = vld [vmem:[%s16482_s3 + $0x238] sm:$0xff]  ;;  %v13377_v40 = vpack.c.bf16 %v1350_v51, %v1349_v11 }
 0x147   : > { %v1282_v61 = vmax.f32 %v1246_v39, %v1264_v45  ;;  %v9223_v32 = vpop.f32.mrb[40].mxu1  ;;  %v13353_v45 = vpack.c.bf16 %v1346_v2, %v1345_v38  ;;  %v16563_v2 = vmax.f32 %v13171_v6, %v13237_v42  ;;  %v13379_v0 = vpack.c.bf16 %v7455_v63, %v7454_v37  ;;  %v1353_v8 = vld [vmem:[%s16482_s3 + $0x50] sm:$0xff]  ;;  %v1354_v46 = vld [vmem:[%s16482_s3 + $0x58] sm:$0xff] }
 0x148   : > { %v1308_v57 = vadd.f32 %v13308_v53, %v1283_v59  ;;  %v1267_v36 = vmax.f32 %v13187_v14, %v9223_v32  ;;  %v1167_v39 = vpop.f32.mrb[41].mxu1  ;;  %v13368_v32 = vpack.c.bf16 %v1348_v10, %v1347_v43  ;;  %v13386_v10 = vpack.c.bf16 %v1352_v4, %v1351_v55 }
 0x149   : > { %v1307_v59 = vadd.f32 %v13308_v53, %v1282_v61  ;;  %v1266_v14 = vmax.f32 %v13189_v15, %v1167_v39  ;;  %v16564_v61 = vmax.f32 %v13173_v7, %v13241_v44  ;;  %v16566_v63 = vmax.f32 %v13177_v9, %v13249_v48 }
 0x14a   : > { %v13372_v49 = vmax.f32 %v1308_v57, 0.0  ;;  %v1285_v38 = vmax.f32 %v16563_v2, %v1267_v36 }
 0x14b   : > { %v13381_v25 = vmax.f32 %v1307_v59, 0.0  ;;  %v1284_v15 = vmax.f32 %v16564_v61, %v1266_v14  ;;  %v9226_v43 = vpop.f32.mrb[42].mxu1 }
 0x14c   : > { %v1310_v57 = vadd.f32 %v13308_v53, %v1285_v38  ;;  %v1269_v6 = vmax.f32 %v13195_v18, %v9226_v43  ;;  %v1177_v42 = vpop.f32.mrb[43].mxu1  ;;  %v1391_v36 = vrot.slane %v13372_v49, 1  ;;  %v1888_v5 = vrot.slane %v13372_v49, 3 }
 0x14d   : > { %v1309_v11 = vadd.f32 %v13308_v53, %v1284_v15  ;;  %v1268_v51 = vmax.f32 %v13197_v19, %v1177_v42  ;;  %v1390_v7 = vrot.slane %v13381_v25, 1  ;;  %v1887_v44 = vrot.slane %v13381_v25, 3 }
 0x14e   : > { %v13398_v55 = vmax.f32 %v1310_v57, 0.0  ;;  %v1287_v41 = vmax.f32 %v16565_v28, %v1269_v6  ;;  %v2079_v18 = vrot.slane %v13381_v25, 4  ;;  %v2080_v4 = vrot.slane %v13372_v49, 4 }
 0x14f   : > { %v13405_v37 = vmax.f32 %v1309_v11, 0.0  ;;  %v1286_v19 = vmax.f32 %v16566_v63, %v1268_v51  ;;  %v9229_v39 = vpop.f32.mrb[44].mxu1  ;;  %v1392_v59 = vsel %vm1389_vm1, %v1390_v7, %v1391_v36  ;;  %v1889_v14 = vsel %vm1886_vm2, %v1887_v44, %v1888_v5 }
 0x150   : > { %v1312_v2 = vadd.f32 %v13308_v53, %v1287_v41  ;;  %v1271_v38 = vmax.f32 %v13203_v22, %v9229_v39  ;;  %v1187_v61 = vpop.f32.mrb[45].mxu1  ;;  %9277 = vmatprep.mubr.f32.mxu1 %v1392_v59  ;;  %9427 = vmatprep.mubr.f32.mxu0 %v1889_v14  ;;  %v1395_v9 = vrot.slane %v13398_v55, 1  ;;  %v1892_v48 = vrot.slane %v13398_v55, 3 }
 0x151   : > { %v1311_v15 = vadd.f32 %v13308_v53, %v1286_v19  ;;  %v1270_v43 = vmax.f32 %v13205_v23, %v1187_v61  ;;  %v1393_v57 = vrot.slane %v13405_v37, 1  ;;  %v1890_v6 = vrot.slane %v13405_v37, 3 }
 0x152   : > { %v13426_v42 = vmax.f32 %v1312_v2, 0.0  ;;  %v16567_v22 = vmax.f32 %v13183_v12, %v13253_v50  ;;  %v13431_v51 = vpack.c.bf16 %v1354_v46, %v1353_v8  ;;  %v13436_v7 = vsel %vm2078_vm3, %v2079_v18, %v2080_v4 }
 0x153   : > { %v13438_v44 = vmax.f32 %v1311_v15, 0.0  ;;  %v16568_v23 = vmax.f32 %v13185_v13, %v13257_v52  ;;  %v9232_v41 = vpop.f32.mrb[46].mxu1  ;;  %v1394_v63 = vsel %vm1389_vm1, %v1391_v36, %v1393_v57  ;;  %v1891_v19 = vsel %vm1886_vm2, %v1888_v5, %v1890_v6 }
 0x154   : > { %v1289_v11 = vmax.f32 %v16567_v22, %v1271_v38  ;;  %v1273_v50 = vmax.f32 %v13211_v26, %v9232_v41  ;;  %v1197_v39 = vpop.f32.mrb[47].mxu1  ;;  %9278 = vmatmul.mubr.f32.vlgmr.msra.gmra.mrb[56].mxu1 %v1394_v63  ;;  %9428 = vmatmul.mubr.f32.vlgmr.msra.gmra.mrb[16].mxu0 %v1891_v19  ;;  %v1396_v18 = vsel %vm1389_vm1, %v1393_v57, %v1395_v9  ;;  %v1399_v59 = vrot.slane %v13426_v42, 1 }
 0x155   : > { %v1288_v28 = vmax.f32 %v16568_v23, %v1270_v43  ;;  %v1272_v13 = vmax.f32 %v13213_v27, %v1197_v39  ;;  %11157 = vmatpush3.bf16.msra.mxu1 %v13158_v1  ;;  %11253 = vmatpush3.bf16.msra.mxu0 %v13163_v3  ;;  %v1893_v52 = vsel %vm1886_vm2, %v1890_v6, %v1892_v48  ;;  %v1397_v36 = vrot.slane %v13438_v44, 1 }
 0x156   : > { %v1314_v12 = vadd.f32 %v13308_v53, %v1289_v11  ;;  %v16569_v5 = vmax.f32 %v13191_v16, %v13261_v54  ;;  %9280 = vmatprep.mubr.f32.mxu1 %v1396_v18  ;;  %9430 = vmatprep.mubr.f32.mxu0 %v1893_v52  ;;  %v1894_v46 = vrot.slane %v13438_v44, 3  ;;  %v1896_v27 = vrot.slane %v13426_v42, 3 }
 0x157   : > { %v1313_v14 = vadd.f32 %v13308_v53, %v1288_v28  ;;  %v16570_v1 = vmax.f32 %v13193_v17, %v13265_v56  ;;  %v9235_v38 = vpop.f32.mrb[48].mxu1  ;;  %11159 = vmatprep.subr.bf16.mxu1 %v13353_v45  ;;  %11255 = vmatprep.subr.bf16.mxu0 %v13355_v29  ;;  %v13470_v16 = vsel %vm1389_vm1, %v1395_v9, %v1397_v36 }
 0x158   : > { %v13455_v26 = vmax.f32 %v1314_v12, 0.0  ;;  %v1291_v8 = vmax.f32 %v16569_v5, %v1273_v50  ;;  %v13473_v54 = vsel %vm1389_vm1, %v1397_v36, %v1399_v59  ;;  %v1275_v15 = vmax.f32 %v13219_v30, %v9235_v38  ;;  %v1207_v43 = vpop.f32.mrb[49].mxu1  ;;  %9281 = vmatmul.mubr.f32.gmra.mrb[58].mxu1 %v13470_v16  ;;  %v16574_v36 = vld [vmem:[#allocation5_spill] sm:$0xff]  ;;  %v16575_v5 = vld [vmem:[#allocation12_spill] sm:$0xff]  ;;  %v16577_v38 = vld [vmem:[#allocation10_spill] sm:$0xff] }
 0x159   : > { %v13462_v2 = vmax.f32 %v1313_v14, 0.0  ;;  %v1290_v3 = vmax.f32 %v16570_v1, %v1272_v13  ;;  %v13479_v17 = vsel %vm1886_vm2, %v1892_v48, %v1894_v46  ;;  %v13482_v56 = vsel %vm1886_vm2, %v1894_v46, %v1896_v27  ;;  %11161 = vmatpush3.bf16.msra.mxu1 %v13353_v45  ;;  %11257 = vmatpush3.bf16.msra.mxu0 %v13355_v29  ;;  %v7459_v1 = vld [vmem:[%s16482_s3 + $0x258] sm:$0xff] }
 0x15a   : > { %v1316_v61 = vadd.f32 %v13308_v53, %v1291_v8  ;;  %v1274_v9 = vmax.f32 %v13221_v31, %v1207_v43  ;;  %9431 = vmatmul.mubr.f32.gmra.mrb[18].mxu0 %v13479_v17  ;;  %v16571_v48 = vmax.f32 %v13199_v20, %v13269_v58  ;;  %9283 = vmatprep.mubr.f32.mxu1 %v13473_v54  ;;  %v1403_v31 = vrot.slane %v13455_v26, 1 }
 0x15b   : > { %v1315_v57 = vadd.f32 %v13308_v53, %v1290_v3  ;;  %v1401_v6 = vrot.slane %v13462_v2, 1  ;;  %v1898_v30 = vrot.slane %v13462_v2, 3  ;;  %v1900_v45 = vrot.slane %v13455_v26, 3  ;;  %9433 = vmatprep.mubr.f32.mxu0 %v13482_v56  ;;  %v9238_v63 = vpop.f32.mrb[50].mxu1  ;;  %11163 = vmatprep.subr.bf16.mxu1 %v13368_v32 }
 0x15c   : > { %v13490_v22 = vmax.f32 %v1316_v61, 0.0  ;;  %v1293_v11 = vmax.f32 %v16571_v48, %v1275_v15  ;;  %v16572_v28 = vmax.f32 %v13201_v21, %v13273_v60  ;;  %v1277_v19 = vmax.f32 %v13227_v34, %v9238_v63  ;;  %11259 = vmatprep.subr.bf16.mxu0 %v13370_v47  ;;  %v1217_v12 = vpop.f32.mrb[51].mxu1 }
 0x15d   : > { %v13499_v23 = vmax.f32 %v1315_v57, 0.0  ;;  %v13507_v20 = vsel %vm1389_vm1, %v1399_v59, %v1401_v6  ;;  %v13510_v29 = vsel %vm1886_vm2, %v1896_v27, %v1898_v30  ;;  %v13517_v21 = vsel %vm1389_vm1, %v1401_v6, %v1403_v31  ;;  %11165 = vmatpush3.bf16.msra.mxu1 %v13368_v32  ;;  %11261 = vmatpush3.bf16.msra.mxu0 %v13370_v47  ;;  %v7458_v47 = vld [vmem:[%s16482_s3 + $0x250] sm:$0xff] }
 0x15e   : > { %v1292_v41 = vmax.f32 %v16572_v28, %v1274_v9  ;;  %v1318_v58 = vadd.f32 %v13308_v53, %v1293_v11  ;;  %9284 = vmatmul.mubr.f32.gmra.mrb[60].mxu1 %v13507_v20  ;;  %v1407_v60 = vrot.slane %v13490_v22, 1  ;;  %v1276_v39 = vmax.f32 %v13229_v35, %v1217_v12  ;;  %9434 = vmatmul.mubr.f32.gmra.mrb[20].mxu0 %v13510_v29  ;;  %v16578_v6 = vld [vmem:[#allocation11_spill] sm:$0xff]  ;;  %v16580_v28 = vld [vmem:[#allocation13_spill] sm:$0xff] }
 0x15f   : > { %v13525_v34 = vsel %vm1886_vm2, %v1898_v30, %v1900_v45  ;;  %v1405_v18 = vrot.slane %v13499_v23, 1  ;;  %v16573_v14 = vmax.f32 %v13207_v24, %v13277_v62  ;;  %9286 = vmatprep.mubr.f32.mxu1 %v13517_v21  ;;  %v1902_v35 = vrot.slane %v13499_v23, 3  ;;  %v9241_v27 = vpop.f32.mrb[52].mxu1  ;;  %11167 = vmatprep.subr.bf16.mxu1 %v13377_v40  ;;  %v16582_v12 = vld [vmem:[#allocation7_spill] sm:$0xff] }
 0x160   : > { %v1317_v50 = vadd.f32 %v13308_v53, %v1292_v41  ;;  %v13528_v59 = vmax.f32 %v1318_v58, 0.0  ;;  %v1904_v32 = vrot.slane %v13490_v22, 3  ;;  %v16576_v8 = vmax.f32 %v16574_v36, %v16575_v5  ;;  %9436 = vmatprep.mubr.f32.mxu0 %v13525_v34  ;;  %11263 = vmatprep.subr.bf16.mxu0 %v13379_v0  ;;  %v1227_v15 = vpop.f32.mrb[53].mxu1  ;;  %v16585_v36 = vld [vmem:[#allocation17_spill] sm:$0xff] }
 0x161   : > { %v1295_v13 = vmax.f32 %v16573_v14, %v1277_v19  ;;  %v13545_v24 = vsel %vm1389_vm1, %v1403_v31, %v1405_v18  ;;  %v13548_v62 = vsel %vm1389_vm1, %v1405_v18, %v1407_v60  ;;  %v1279_v61 = vmax.f32 %v16577_v38, %v9241_v27  ;;  %11169 = vmatpush3.bf16.msra.mxu1 %v13377_v40  ;;  %v16579_v31 = vld [vmem:[#allocation6_spill] sm:$0xff] }
 0x162   : > { %v13537_v52 = vmax.f32 %v1317_v50, 0.0  ;;  %v1294_v46 = vmax.f32 %v16576_v8, %v1276_v39  ;;  %9287 = vmatmul.mubr.f32.gmra.mrb[62].mxu1 %v13545_v24  ;;  %v13563_v43 = vsel %vm1886_vm2, %v1900_v45, %v1902_v35  ;;  %v1411_v57 = vrot.slane %v13528_v59, 1  ;;  %11265 = vmatpush3.bf16.msra.mxu0 %v13379_v0  ;;  %v16583_v50 = vld [vmem:[#allocation14_spill] sm:$0xff] }
 0x163   : > { %v13557_v3 = vadd.f32 %v13308_v53, %v1295_v13  ;;  %v1278_v30 = vmax.f32 %v16578_v6, %v1227_v15  ;;  %9437 = vmatmul.mubr.f32.gmra.mrb[22].mxu0 %v13563_v43  ;;  %v13571_v48 = vsel %vm1886_vm2, %v1902_v35, %v1904_v32  ;;  %v16581_v41 = vmax.f32 %v16579_v31, %v16580_v28  ;;  %v9244_v14 = vpop.f32.mrb[54].mxu1  ;;  %v1356_v27 = vld [vmem:[%s16482_s3 + $0x68] sm:$0xff]  ;;  %v7460_v15 = vld [vmem:[%s16482_s3 + $0x260] sm:$0xff] }
 0x164   : > { %v1319_v9 = vadd.f32 %v13308_v53, %v1294_v46  ;;  %v1409_v11 = vrot.slane %v13537_v52, 1  ;;  %9289 = vmatprep.mubr.f32.mxu1 %v13548_v62  ;;  %v1906_v63 = vrot.slane %v13537_v52, 3  ;;  %v1908_v58 = vrot.slane %v13528_v59, 3  ;;  %9439 = vmatprep.mubr.f32.mxu0 %v13571_v48  ;;  %v1237_v8 = vpop.f32.mrb[55].mxu1  ;;  %v16587_v6 = vld [vmem:[#allocation8_spill] sm:$0xff]  ;;  %v16590_v28 = vld [vmem:[#allocation9_spill] sm:$0xff] }
 0x165   : > { %v1297_v45 = vmax.f32 %v16581_v41, %v1279_v61  ;;  %v11270_v40 = vpack.c.bf16 %v7459_v1, %v7458_v47  ;;  %v16584_v39 = vmax.f32 %v16582_v12, %v16583_v50  ;;  %11171 = vmatprep.subr.bf16.mxu1 %v13386_v10  ;;  %v1281_v5 = vmax.f32 %v16585_v36, %v9244_v14  ;;  %v16586_v1 = vld [vmem:[#allocation18_spill] sm:$0xff]  ;;  %v16591_v41 = vld [vmem:[#allocation16_spill] sm:$0xff] }
 0x166   : > { %v13581_v19 = vmax.f32 %v1319_v9, 0.0  ;;  %v13589_v0 = vsel %vm1389_vm1, %v1407_v60, %v1409_v11  ;;  %v13592_v13 = vsel %vm1389_vm1, %v1409_v11, %v1411_v57  ;;  %11267 = vmatprep.subr.bf16.mxu0 %v13388_v33  ;;  %v13601_v46 = vsel %vm1886_vm2, %v1904_v32, %v1906_v63  ;;  %v1355_v60 = vld [vmem:[%s16482_s3 + $0x60] sm:$0xff]  ;;  %11173 = vmatpush3.bf16.msra.mxu1 %v13386_v10  ;;  %v7461_v9 = vld [vmem:[%s16482_s3 + $0x268] sm:$0xff]  ;;  %v7462_v36 = vld [vmem:[%s16482_s3 + $0x270] sm:$0xff] }
 0x167   : > { %v1296_v18 = vmax.f32 %v16584_v39, %v1278_v30  ;;  %v13595_v35 = vadd.f32 %v13308_v53, %v1297_v45  ;;  %9290 = vmatmul.mubr.f32.gmra.mrb[64].mxu1 %v13589_v0  ;;  %v1280_v38 = vmax.f32 %v16586_v1, %v1237_v8  ;;  %9440 = vmatmul.mubr.f32.gmra.mrb[24].mxu0 %v13601_v46  ;;  %v16588_v30 = vld [vmem:[#allocation15_spill] sm:$0xff]  ;;  %v1696_v1 = vrot.slane %v13372_v49, 2 }
 0x168   : > { %v13616_v32 = vsel %vm1886_vm2, %v1906_v63, %v1908_v58  ;;  %v16501_v61 = vrot.slane %v13581_v19, 1  ;;  %v16589_v11 = vmax.f32 %v16587_v6, %v16588_v30  ;;  %11269 = vmatpush3.bf16.msra.mxu0 %v13388_v33  ;;  %9292 = vmatprep.mubr.f32.mxu1 %v13592_v13  ;;  %v16499_v10 = vrot.slane %v13581_v19, 3  ;;  %v1357_v33 = vld [vmem:[%s16482_s3 + $0x70] sm:$0xff]  ;;  %v1358_v39 = vld [vmem:[%s16482_s3 + $0x78] sm:$0xff] }
 0x169   : > { %v13610_v47 = vadd.f32 %v13308_v53, %v1296_v18  ;;  %v16592_v45 = vmax.f32 %v16590_v28, %v16591_v41  ;;  %9442 = vmatprep.mubr.f32.mxu0 %v13616_v32  ;;  %11175 = vmatprep.subr.bf16.mxu1 %v13431_v51  ;;  %v11178_v50 = vpack.c.bf16 %v1356_v27, %v1355_v60  ;;  %v7416_v27 = vld [vmem:[%s16482_s3 + $0x100] sm:$0xff]  ;;  %v2082_v6 = vrot.slane %v13405_v37, 4  ;;  %v7418_v30 = vld [vmem:[%s16482_s3 + $0x110] sm:$0xff]  ;;  %v7467_v28 = vld [vmem:[%s16482_s3 + $0x298] sm:$0xff] }
 0x16a   : > { %v1299_v31 = vmax.f32 %v16589_v11, %v1281_v5  ;;  %v13639_v12 = vsel %vm1389_vm1, %v1411_v57, %v16501_v61  ;;  %11271 = vmatprep.subr.bf16.mxu0 %v11270_v40  ;;  %v13654_v57 = vsel %vm1886_vm2, %v1908_v58, %v16499_v10  ;;  %v11274_v14 = vpack.c.bf16 %v7461_v9, %v7460_v15  ;;  %v7463_v5 = vld [vmem:[%s16482_s3 + $0x278] sm:$0xff] }
 0x16b   : > { %v1298_v63 = vmax.f32 %v16592_v45, %v1280_v38  ;;  %9293 = vmatmul.mubr.f32.gmra.mrb[66].mxu1 %v13639_v12  ;;  %9443 = vmatmul.mubr.f32.gmra.mrb[26].mxu0 %v13654_v57  ;;  %v11182_v58 = vpack.c.bf16 %v1358_v39, %v1357_v33  ;;  %v11278_v60 = vpack.c.bf16 %v7463_v5, %v7462_v36  ;;  %v2084_v11 = vrot.slane %v13398_v55, 4  ;;  %v7420_v33 = vld [vmem:[%s16482_s3 + $0x120] sm:$0xff]  ;;  %v7421_v39 = vld [vmem:[%s16482_s3 + $0x128] sm:$0xff] }
 0x16c   : > { %v13648_v18 = vadd.f32 %v13308_v53, %v1299_v31  ;;  %11177 = vmatpush3.bf16.msra.mxu1 %v13431_v51  ;;  %11273 = vmatpush3.bf16.msra.mxu0 %v11270_v40  ;;  %v7464_v51 = vld [vmem:[%s16482_s3 + $0x280] sm:$0xff]  ;;  %v7465_v40 = vld [vmem:[%s16482_s3 + $0x288] sm:$0xff]  ;;  %v7466_v31 = vld [vmem:[%s16482_s3 + $0x290] sm:$0xff]  ;;  %v13706_v45 = vsel %vm2078_vm3, %v2080_v4, %v2082_v6  ;;  %v2088_v4 = vrot.slane %v13426_v42, 4 }
 0x16d   : > { %v13663_v8 = vadd.f32 %v13308_v53, %v1298_v63  ;;  %9327 = vmatprep.mubr.f32.mxu1 %v13381_v25  ;;  %9477 = vmatprep.mubr.f32.mxu0 %v13436_v7  ;;  %v7417_v53 = vld [vmem:[%s16482_s3 + $0x108] sm:$0xff]  ;;  %v1695_v7 = vrot.slane %v13381_v25, 2  ;;  %v11282_v15 = vpack.c.bf16 %v7465_v40, %v7464_v51  ;;  %v7419_v25 = vld [vmem:[%s16482_s3 + $0x118] sm:$0xff]  ;;  %v2086_v63 = vrot.slane %v13438_v44, 4  ;;  %v7468_v36 = vld [vmem:[%s16482_s3 + $0x2a0] sm:$0xff] }
 0x16e   : > { %16593 = vst [vmem:[#allocation5_spill] sm:$0xff] %v13648_v18  ;;  %11179 = vmatprep.subr.bf16.mxu1 %v11178_v50  ;;  %11275 = vmatprep.subr.bf16.mxu0 %v11274_v14  ;;  %v11186_v38 = vpack.c.bf16 %v7417_v53, %v7416_v27  ;;  %v11190_v41 = vpack.c.bf16 %v7419_v25, %v7418_v30  ;;  %v7469_v5 = vld [vmem:[%s16482_s3 + $0x2a8] sm:$0xff]  ;;  %v2090_v27 = vrot.slane %v13462_v2, 4  ;;  %v7422_v51 = vld [vmem:[%s16482_s3 + $0x130] sm:$0xff]  ;;  %v7423_v40 = vld [vmem:[%s16482_s3 + $0x138] sm:$0xff] }
 0x16f   : > { %v13686_v9 = vsel %vm1694_vm4, %v1695_v7, %v1696_v1  ;;  %v11290_v53 = vpack.c.bf16 %v7469_v5, %v7468_v36  ;;  %v13742_v7 = vsel %vm2078_vm3, %v2086_v63, %v2088_v4  ;;  %v11198_v30 = vpack.c.bf16 %v7423_v40, %v7422_v51  ;;  %v7426_v51 = vld [vmem:[%s16482_s3 + $0x150] sm:$0xff]  ;;  %v7492_v18 = vld [vmem:[%s16482_s3 + $0x360] sm:$0xff] }
 0x170   : > { %11181 = vmatpush3.bf16.msra.mxu1 %v11178_v50  ;;  %11277 = vmatpush3.bf16.msra.mxu0 %v11274_v14  ;;  %v11286_v50 = vpack.c.bf16 %v7467_v28, %v7466_v31  ;;  %v13718_v14 = vsel %vm2078_vm3, %v2082_v6, %v2084_v11  ;;  %v7471_v6 = vld [vmem:[%s16482_s3 + $0x2b8] sm:$0xff]  ;;  %v13754_v25 = vsel %vm2078_vm3, %v2088_v4, %v2090_v27  ;;  %v7424_v28 = vld [vmem:[%s16482_s3 + $0x140] sm:$0xff]  ;;  %v2098_v5 = vrot.slane %v13537_v52, 4 }
 0x171   : > { %11183 = vmatprep.subr.bf16.mxu1 %v11182_v58  ;;  %11279 = vmatprep.subr.bf16.mxu0 %v11278_v60  ;;  %v2100_v40 = vrot.slane %v13528_v59, 4 }
 0x174   : > { %11185 = vmatpush3.bf16.msra.mxu1 %v11182_v58  ;;  %11281 = vmatpush3.bf16.msra.mxu0 %v11278_v60  ;;  %v11194_v58 = vpack.c.bf16 %v7421_v39, %v7420_v33  ;;  %v13730_v60 = vsel %vm2078_vm3, %v2084_v11, %v2086_v63  ;;  %v2094_v11 = vrot.slane %v13499_v23, 4  ;;  %v7472_v33 = vld [vmem:[%s16482_s3 + $0x2c0] sm:$0xff]  ;;  %v7473_v39 = vld [vmem:[%s16482_s3 + $0x2c8] sm:$0xff] }
 0x175   : > { %11187 = vmatprep.subr.bf16.mxu1 %v11186_v38  ;;  %11283 = vmatprep.subr.bf16.mxu0 %v11282_v15 }
 0x177   : > { %9328 = vmatmul.mubr.f32.vlgmr.msra.gmra.mrb[56].mxu1 %v13372_v49  ;;  %9478 = vmatmul.mubr.f32.vlgmr.msra.gmra.mrb[16].mxu0 %v13706_v45 }
 0x178   : > { %9330 = vmatprep.mubr.f32.mxu1 %v13405_v37  ;;  %11189 = vmatpush3.bf16.msra.mxu1 %v11186_v38  ;;  %v2092_v38 = vrot.slane %v13455_v26, 4 }
 0x179   : > { %9480 = vmatprep.mubr.f32.mxu0 %v13718_v14  ;;  %11285 = vmatpush3.bf16.msra.mxu0 %v11282_v15  ;;  %v7470_v15 = vld [vmem:[%s16482_s3 + $0x2b0] sm:$0xff] }
 0x17a   : > { %11191 = vmatprep.subr.bf16.mxu1 %v11190_v41  ;;  %11287 = vmatprep.subr.bf16.mxu0 %v11286_v50  ;;  %v11294_v31 = vpack.c.bf16 %v7471_v6, %v7470_v15  ;;  %v13766_v63 = vsel %vm2078_vm3, %v2090_v27, %v2092_v38  ;;  %v13778_v36 = vsel %vm2078_vm3, %v2092_v38, %v2094_v11  ;;  %v7474_v38 = vld [vmem:[%s16482_s3 + $0x2d0] sm:$0xff]  ;;  %v7475_v15 = vld [vmem:[%s16482_s3 + $0x2d8] sm:$0xff] }
 0x17b   : > { %9331 = vmatmul.mubr.f32.gmra.mrb[58].mxu1 %v13398_v55  ;;  %9481 = vmatmul.mubr.f32.gmra.mrb[18].mxu0 %v13730_v60  ;;  %v11298_v27 = vpack.c.bf16 %v7473_v39, %v7472_v33  ;;  %v7428_v33 = vld [vmem:[%s16482_s3 + $0x160] sm:$0xff]  ;;  %v7477_v39 = vld [vmem:[%s16482_s3 + $0x2e8] sm:$0xff] }
 0x17c   : > { %9333 = vmatprep.mubr.f32.mxu1 %v13438_v44  ;;  %11193 = vmatpush3.bf16.msra.mxu1 %v11190_v41  ;;  %v7425_v41 = vld [vmem:[%s16482_s3 + $0x148] sm:$0xff] }
 0x17d   : > { %9483 = vmatprep.mubr.f32.mxu0 %v13742_v7  ;;  %11289 = vmatpush3.bf16.msra.mxu0 %v11286_v50  ;;  %v2096_v50 = vrot.slane %v13490_v22, 4  ;;  %v11202_v4 = vpack.c.bf16 %v7425_v41, %v7424_v28  ;;  %v16508_v28 = vrot.slane %v13581_v19, 4  ;;  %v11302_v41 = vpack.c.bf16 %v7475_v15, %v7474_v38 }
 0x17e   : > { %11195 = vmatprep.subr.bf16.mxu1 %v11194_v58  ;;  %11291 = vmatprep.subr.bf16.mxu0 %v11290_v53  ;;  %v16509_v15 = vrot.slane %v13581_v19, 2 }
 0x17f   : > { %9334 = vmatmul.mubr.f32.gmra.mrb[60].mxu1 %v13426_v42  ;;  %9484 = vmatmul.mubr.f32.gmra.mrb[20].mxu0 %v13754_v25 }
 0x180   : > { %9336 = vmatprep.mubr.f32.mxu1 %v13462_v2  ;;  %11197 = vmatpush3.bf16.msra.mxu1 %v11194_v58  ;;  %v7427_v58 = vld [vmem:[%s16482_s3 + $0x158] sm:$0xff] }
 0x181   : > { %9486 = vmatprep.mubr.f32.mxu0 %v13766_v63  ;;  %11293 = vmatpush3.bf16.msra.mxu0 %v11290_v53  ;;  %v13790_v53 = vsel %vm2078_vm3, %v2094_v11, %v2096_v50  ;;  %v11206_v6 = vpack.c.bf16 %v7427_v58, %v7426_v51  ;;  %v13802_v11 = vsel %vm2078_vm3, %v2096_v50, %v2098_v5  ;;  %v7476_v50 = vld [vmem:[%s16482_s3 + $0x2e0] sm:$0xff]  ;;  %v13824_v58 = vmax.f32 %v13557_v3, 0.0  ;;  %v7478_v3 = vld [vmem:[%s16482_s3 + $0x2f0] sm:$0xff] }
 0x182   : > { %11199 = vmatprep.subr.bf16.mxu1 %v11198_v30  ;;  %11295 = vmatprep.subr.bf16.mxu0 %v11294_v31  ;;  %v11306_v38 = vpack.c.bf16 %v7477_v39, %v7476_v50  ;;  %v13850_v50 = vmax.f32 %v13610_v47, 0.0  ;;  %v7480_v39 = vld [vmem:[%s16482_s3 + $0x300] sm:$0xff]  ;;  %v1698_v47 = vrot.slane %v13405_v37, 2 }
 0x183   : > { %9337 = vmatmul.mubr.f32.gmra.mrb[62].mxu1 %v13455_v26  ;;  %9487 = vmatmul.mubr.f32.gmra.mrb[22].mxu0 %v13778_v36 }
 0x184   : > { %9339 = vmatprep.mubr.f32.mxu1 %v13499_v23  ;;  %11201 = vmatpush3.bf16.msra.mxu1 %v11198_v30  ;;  %v7429_v30 = vld [vmem:[%s16482_s3 + $0x168] sm:$0xff]  ;;  %v16503_v10 = vrot.slane %v13850_v50, 6 }
 0x185   : > { %9489 = vmatprep.mubr.f32.mxu0 %v13790_v53  ;;  %11297 = vmatpush3.bf16.msra.mxu0 %v11294_v31  ;;  %v13814_v31 = vsel %vm2078_vm3, %v2098_v5, %v2100_v40  ;;  %v11210_v51 = vpack.c.bf16 %v7429_v30, %v7428_v33  ;;  %v13830_v5 = vsel %vm2078_vm3, %v2100_v40, %v16508_v28  ;;  %v7479_v40 = vld [vmem:[%s16482_s3 + $0x2f8] sm:$0xff]  ;;  %v7488_v28 = vld [vmem:[%s16482_s3 + $0x340] sm:$0xff] }
 0x186   : > { %11203 = vmatprep.subr.bf16.mxu1 %v11202_v4  ;;  %11299 = vmatprep.subr.bf16.mxu0 %v11298_v27  ;;  %16594 = vst [vmem:[#allocation12_spill] sm:$0xff] %v13814_v31  ;;  %16595 = vst [vmem:[#allocation10_spill] sm:$0xff] %v13830_v5  ;;  %v11310_v30 = vpack.c.bf16 %v7479_v40, %v7478_v3  ;;  %v16507_v3 = vrot.slane %v13824_v58, 5  ;;  %v13876_v40 = vmax.f32 %v13595_v35, 0.0 }
 0x187   : > { %9340 = vmatmul.mubr.f32.gmra.mrb[64].mxu1 %v13490_v22  ;;  %9490 = vmatmul.mubr.f32.gmra.mrb[24].mxu0 %v13802_v11  ;;  %v1699_v35 = vsel %vm1694_vm4, %v1696_v1, %v1698_v47  ;;  %v7484_v1 = vld [vmem:[%s16482_s3 + $0x320] sm:$0xff] }
 0x188   : > { %9342 = vmatprep.mubr.f32.mxu1 %v13537_v52  ;;  %11205 = vmatpush3.bf16.msra.mxu1 %v11202_v4  ;;  %v7430_v4 = vld [vmem:[%s16482_s3 + $0x170] sm:$0xff] }
 0x189   : > { %9492 = vmatprep.mubr.f32.mxu0 %v13814_v31  ;;  %11301 = vmatpush3.bf16.msra.mxu0 %v11298_v27  ;;  %v7431_v27 = vld [vmem:[%s16482_s3 + $0x178] sm:$0xff] }
 0x18a   : > { %11207 = vmatprep.subr.bf16.mxu1 %v11206_v6  ;;  %11303 = vmatprep.subr.bf16.mxu0 %v11302_v41  ;;  %v11214_v33 = vpack.c.bf16 %v7431_v27, %v7430_v4  ;;  %v1700_v4 = vrot.slane %v13398_v55, 2  ;;  %v7482_v27 = vld [vmem:[%s16482_s3 + $0x310] sm:$0xff] }
 0x18b   : > { %9343 = vmatmul.mubr.f32.gmra.mrb[66].mxu1 %v13528_v59  ;;  %9493 = vmatmul.mubr.f32.gmra.mrb[26].mxu0 %v13830_v5 }
 0x18c   : > { %9377 = vmatprep.mubr.f32.mxu1 %v13686_v9  ;;  %11209 = vmatpush3.bf16.msra.mxu1 %v11206_v6  ;;  %v16500_v9 = vrot.slane %v13824_v58, 2  ;;  %v1701_v61 = vsel %vm1694_vm4, %v1698_v47, %v1700_v4 }
 0x18d   : > { %9527 = vmatprep.mubr.f32.mxu0 %v13706_v45  ;;  %11305 = vmatpush3.bf16.msra.mxu0 %v11302_v41  ;;  %v7481_v45 = vld [vmem:[%s16482_s3 + $0x308] sm:$0xff] }
 0x18e   : > { %11211 = vmatprep.subr.bf16.mxu1 %v11210_v51  ;;  %11307 = vmatprep.subr.bf16.mxu0 %v11306_v38  ;;  %v13863_v6 = vsel %vm1694_vm4, %v16509_v15, %v16500_v9  ;;  %v11314_v41 = vpack.c.bf16 %v7481_v45, %v7480_v39  ;;  %v13879_v39 = vmax.f32 %v13663_v8, 0.0  ;;  %v16504_v45 = vrot.slane %v13824_v58, 6 }
 0x18f   : > { %v1702_v8 = vrot.slane %v13438_v44, 2  ;;  %v1716_v15 = vrot.slane %v13528_v59, 2 }
 0x190   : > { %11213 = vmatpush3.bf16.msra.mxu1 %v11210_v51  ;;  %v7483_v51 = vld [vmem:[%s16482_s3 + $0x318] sm:$0xff]  ;;  %16596 = vst [vmem:[#allocation11_spill] sm:$0xff] %v13879_v39 }
 0x191   : > { %11309 = vmatpush3.bf16.msra.mxu0 %v11306_v38  ;;  %11215 = vmatprep.subr.bf16.mxu1 %v11214_v33  ;;  %v16502_v38 = vrot.slane %v13850_v50, 5  ;;  %v13914_v47 = vsel %vm1694_vm4, %v1700_v4, %v1702_v8  ;;  %v7486_v4 = vld [vmem:[%s16482_s3 + $0x330] sm:$0xff] }
 0x192   : > { %11311 = vmatprep.subr.bf16.mxu0 %v11310_v30 }
 0x193   : > { %v13888_v9 = vsel %vm2428_vm5, %v16507_v3, %v16502_v38  ;;  %v1704_v38 = vrot.slane %v13426_v42, 2  ;;  %v1712_v3 = vrot.slane %v13490_v22, 2 }
 0x194   : > { %11217 = vmatpush3.bf16.msra.mxu1 %v11214_v33  ;;  %16597 = vst [vmem:[#allocation6_spill] sm:$0xff] %v13888_v9  ;;  %v11318_v33 = vpack.c.bf16 %v7483_v51, %v7482_v27  ;;  %v7485_v27 = vld [vmem:[%s16482_s3 + $0x328] sm:$0xff]  ;;  %v16506_v51 = vrot.slane %v13876_v40, 2  ;;  %v16602_v9 = vrot.slane %v13581_v19, 4 }
 0x195   : > { %11313 = vmatpush3.bf16.msra.mxu0 %v11310_v30  ;;  %v13899_v30 = vsel %vm2620_vm6, %v16504_v45, %v16503_v10  ;;  %v16505_v10 = vrot.slane %v13879_v39, 2  ;;  %v11322_v45 = vpack.c.bf16 %v7485_v27, %v7484_v1  ;;  %v7487_v1 = vld [vmem:[%s16482_s3 + $0x338] sm:$0xff]  ;;  %v1710_v27 = vrot.slane %v13499_v23, 2 }
 0x196   : > { %11315 = vmatprep.subr.bf16.mxu0 %v11314_v41  ;;  %16598 = vst [vmem:[#allocation13_spill] sm:$0xff] %v13899_v30  ;;  %v16601_v30 = vrot.slane %v13824_v58, 4 }
 0x197   : > { %9378 = vmatmul.mubr.f32.vlgmr.msra.gmra.mrb[56].mxu1 %v1699_v35  ;;  %v1706_v35 = vrot.slane %v13462_v2, 2 }
 0x198   : > { %9528 = vmatmul.mubr.f32.vlgmr.msra.gmra.mrb[16].mxu0 %v13718_v14  ;;  %9380 = vmatprep.mubr.f32.mxu1 %v1701_v61  ;;  %v13922_v61 = vsel %vm1694_vm4, %v16506_v51, %v16505_v10  ;;  %v13926_v14 = vsel %vm1694_vm4, %v1702_v8, %v1704_v38  ;;  %v11326_v10 = vpack.c.bf16 %v7487_v1, %v7486_v4 }
 0x199   : > { %9530 = vmatprep.mubr.f32.mxu0 %v13730_v60  ;;  %11317 = vmatpush3.bf16.msra.mxu0 %v11314_v41  ;;  %16599 = vst [vmem:[#allocation7_spill] sm:$0xff] %v13922_v61  ;;  %v1708_v41 = vrot.slane %v13455_v26, 2  ;;  %v13939_v8 = vsel %vm1694_vm4, %v1704_v38, %v1706_v35  ;;  %v7489_v38 = vld [vmem:[%s16482_s3 + $0x348] sm:$0xff]  ;;  %v13962_v1 = vsel %vm1694_vm4, %v1710_v27, %v1712_v3  ;;  %v7490_v61 = vld [vmem:[%s16482_s3 + $0x350] sm:$0xff] }
 0x19a   : > { %11319 = vmatprep.subr.bf16.mxu0 %v11318_v33  ;;  %v11330_v4 = vpack.c.bf16 %v7489_v38, %v7488_v28  ;;  %v14004_v39 = vsel %vm2078_vm3, %v16602_v9, %v16601_v30  ;;  %v7496_v9 = vld [vmem:[%s16482_s3 + $0x380] sm:$0xff]  ;;  %v7497_v30 = vld [vmem:[%s16482_s3 + $0x388] sm:$0xff] }
 0x19b   : > { %9381 = vmatmul.mubr.f32.gmra.mrb[58].mxu1 %v13914_v47  ;;  %v13944_v51 = vsel %vm1694_vm4, %v1706_v35, %v1708_v41  ;;  %v1714_v35 = vrot.slane %v13537_v52, 2  ;;  %16603 = vst [vmem:[#allocation14_spill] sm:$0xff] %v14004_v39 }
 0x19c   : > { %9531 = vmatmul.mubr.f32.gmra.mrb[18].mxu0 %v13742_v7  ;;  %9383 = vmatprep.mubr.f32.mxu1 %v13926_v14 }
 0x19d   : > { %9533 = vmatprep.mubr.f32.mxu0 %v13754_v25  ;;  %11321 = vmatpush3.bf16.msra.mxu0 %v11318_v33  ;;  %v13957_v33 = vsel %vm1694_vm4, %v1708_v41, %v1710_v27  ;;  %v13975_v28 = vsel %vm1694_vm4, %v1712_v3, %v1714_v35  ;;  %v13979_v27 = vsel %vm1694_vm4, %v1714_v35, %v1716_v15  ;;  %v2430_v3 = vrot.slane %v13405_v37, 5 }
 0x19e   : > { %11323 = vmatprep.subr.bf16.mxu0 %v11322_v45 }
 0x19f   : > { %9384 = vmatmul.mubr.f32.gmra.mrb[60].mxu1 %v13939_v8 }
 0x1a0   : > { %9534 = vmatmul.mubr.f32.gmra.mrb[20].mxu0 %v13766_v63  ;;  %9386 = vmatprep.mubr.f32.mxu1 %v13944_v51 }
 0x1a1   : > { %9536 = vmatprep.mubr.f32.mxu0 %v13778_v36  ;;  %11325 = vmatpush3.bf16.msra.mxu0 %v11322_v45  ;;  %v7491_v45 = vld [vmem:[%s16482_s3 + $0x358] sm:$0xff] }
 0x1a2   : > { %11327 = vmatprep.subr.bf16.mxu0 %v11326_v10  ;;  %v11334_v41 = vpack.c.bf16 %v7491_v45, %v7490_v61  ;;  %v16600_v61 = vrot.slane %v13581_v19, 2  ;;  %v2429_v45 = vrot.slane %v13372_v49, 5 }
 0x1a3   : > { %9387 = vmatmul.mubr.f32.gmra.mrb[62].mxu1 %v13957_v33 }
 0x1a4   : > { %9537 = vmatmul.mubr.f32.gmra.mrb[22].mxu0 %v13790_v53  ;;  %9389 = vmatprep.mubr.f32.mxu1 %v13962_v1  ;;  %v13995_v35 = vsel %vm1694_vm4, %v1716_v15, %v16600_v61  ;;  %v7495_v15 = vld [vmem:[%s16482_s3 + $0x378] sm:$0xff]  ;;  %v11346_v61 = vpack.c.bf16 %v7497_v30, %v7496_v9  ;;  %v7500_v9 = vld [vmem:[%s16482_s3 + $0x3a0] sm:$0xff]  ;;  %v7501_v30 = vld [vmem:[%s16482_s3 + $0x3a8] sm:$0xff] }
 0x1a5   : > { %9539 = vmatprep.mubr.f32.mxu0 %v13802_v11  ;;  %11329 = vmatpush3.bf16.msra.mxu0 %v11326_v10  ;;  %v7493_v10 = vld [vmem:[%s16482_s3 + $0x368] sm:$0xff] }
 0x1a6   : > { %11331 = vmatprep.subr.bf16.mxu0 %v11330_v4  ;;  %v11338_v38 = vpack.c.bf16 %v7493_v10, %v7492_v18  ;;  %v2431_v18 = vsel %vm2428_vm5, %v2429_v45, %v2430_v3  ;;  %v7499_v45 = vld [vmem:[%s16482_s3 + $0x398] sm:$0xff] }
 0x1a7   : > { %9390 = vmatmul.mubr.f32.gmra.mrb[64].mxu1 %v13975_v28 }
 0x1a8   : > { %9540 = vmatmul.mubr.f32.gmra.mrb[24].mxu0 %v13814_v31  ;;  %9392 = vmatprep.mubr.f32.mxu1 %v13979_v27  ;;  %v2438_v31 = vrot.slane %v13462_v2, 5 }
 0x1a9   : > { %9542 = vmatprep.mubr.f32.mxu0 %v13830_v5  ;;  %11333 = vmatpush3.bf16.msra.mxu0 %v11330_v4  ;;  %v7494_v4 = vld [vmem:[%s16482_s3 + $0x370] sm:$0xff]  ;;  %v2432_v5 = vrot.slane %v13398_v55, 5 }
 0x1aa   : > { %11335 = vmatprep.subr.bf16.mxu0 %v11334_v41  ;;  %v11342_v10 = vpack.c.bf16 %v7495_v15, %v7494_v4  ;;  %v2434_v4 = vrot.slane %v13438_v44, 5 }
 0x1ab   : > { %9393 = vmatmul.mubr.f32.gmra.mrb[66].mxu1 %v13995_v35 }
 0x1ac   : > { %9543 = vmatmul.mubr.f32.gmra.mrb[26].mxu0 %v14004_v39  ;;  %v2435_v39 = vsel %vm2428_vm5, %v2432_v5, %v2434_v4 }
 0x1ad   : > { %11337 = vmatpush3.bf16.msra.mxu0 %v11334_v41  ;;  %9577 = vmatprep.mubr.f32.mxu0 %v2431_v18  ;;  %v7498_v41 = vld [vmem:[%s16482_s3 + $0x390] sm:$0xff]  ;;  %v2433_v18 = vsel %vm2428_vm5, %v2430_v3, %v2432_v5 }
 0x1ae   : > { %11339 = vmatprep.subr.bf16.mxu0 %v11338_v38  ;;  %v11350_v15 = vpack.c.bf16 %v7499_v45, %v7498_v41  ;;  %v2440_v41 = vrot.slane %v13455_v26, 5  ;;  %v7502_v45 = vld [vmem:[%s16482_s3 + $0x3b0] sm:$0xff] }
 0x1b1   : > { %11341 = vmatpush3.bf16.msra.mxu0 %v11338_v38  ;;  %v2436_v38 = vrot.slane %v13426_v42, 5 }
 0x1b2   : > { %11343 = vmatprep.subr.bf16.mxu0 %v11342_v10 }
 0x1b3   : > { %v14039_v3 = vsel %vm2428_vm5, %v2434_v4, %v2436_v38  ;;  %v14050_v5 = vsel %vm2428_vm5, %v2436_v38, %v2438_v31  ;;  %v14055_v4 = vsel %vm2428_vm5, %v2438_v31, %v2440_v41  ;;  %v7505_v38 = vld [vmem:[%s16482_s3 + $0x3c8] sm:$0xff] }
 0x1b4   : > { %16604 = vst [vmem:[#allocation17_spill] sm:$0xff] %v14039_v3  ;;  %16605 = vst [vmem:[#allocation18_spill] sm:$0xff] %v14050_v5 }
 0x1b5   : > { %11345 = vmatpush3.bf16.msra.mxu0 %v11342_v10  ;;  %v11354_v10 = vpack.c.bf16 %v7501_v30, %v7500_v9  ;;  %16606 = vst [vmem:[#allocation8_spill] sm:$0xff] %v14055_v4  ;;  %v2444_v9 = vrot.slane %v13490_v22, 5  ;;  %v7504_v30 = vld [vmem:[%s16482_s3 + $0x3c0] sm:$0xff] }
 0x1b6   : > { %11347 = vmatprep.subr.bf16.mxu0 %v11346_v61  ;;  %v11362_v31 = vpack.c.bf16 %v7505_v38, %v7504_v30  ;;  %v7508_v38 = vld [vmem:[%s16482_s3 + $0x3e0] sm:$0xff] }
 0x1b8   : > { %9578 = vmatmul.mubr.f32.vlgmr.msra.gmra.mrb[16].mxu0 %v2433_v18  ;;  %v7503_v18 = vld [vmem:[%s16482_s3 + $0x3b8] sm:$0xff] }
 0x1b9   : > { %9580 = vmatprep.mubr.f32.mxu0 %v2435_v39  ;;  %11349 = vmatpush3.bf16.msra.mxu0 %v11346_v61  ;;  %v2442_v39 = vrot.slane %v13499_v23, 5  ;;  %v11358_v61 = vpack.c.bf16 %v7503_v18, %v7502_v45  ;;  %v2448_v18 = vrot.slane %v13528_v59, 5 }
 0x1ba   : > { %11351 = vmatprep.subr.bf16.mxu0 %v11350_v15 }
 0x1bb   : > { %v14071_v45 = vsel %vm2428_vm5, %v2442_v39, %v2444_v9 }
 0x1bc   : > { %9581 = vmatmul.mubr.f32.gmra.mrb[18].mxu0 %v14039_v3  ;;  %16608 = vst [vmem:[#allocation9_spill] sm:$0xff] %v14071_v45  ;;  %v7506_v3 = vld [vmem:[%s16482_s3 + $0x3d0] sm:$0xff] }
 0x1bd   : > { %9583 = vmatprep.mubr.f32.mxu0 %v14050_v5  ;;  %11353 = vmatpush3.bf16.msra.mxu0 %v11350_v15  ;;  %v14066_v5 = vsel %vm2428_vm5, %v2440_v41, %v2442_v39  ;;  %v2446_v15 = vrot.slane %v13537_v52, 5  ;;  %v7507_v41 = vld [vmem:[%s16482_s3 + $0x3d8] sm:$0xff] }
 0x1be   : > { %11355 = vmatprep.subr.bf16.mxu0 %v11354_v10  ;;  %16607 = vst [vmem:[#allocation15_spill] sm:$0xff] %v14066_v5  ;;  %v11366_v39 = vpack.c.bf16 %v7507_v41, %v7506_v3  ;;  %v2621_v3 = vrot.slane %v13372_v49, 6  ;;  %v16612_v41 = vrot.slane %v13824_v58, 5 }
 0x1bf   : > { %v14087_v30 = vsel %vm2428_vm5, %v2446_v15, %v2448_v18 }
 0x1c0   : > { %9584 = vmatmul.mubr.f32.gmra.mrb[20].mxu0 %v14055_v4  ;;  %16610 = vst [vmem:[#allocation19_spill] sm:$0xff] %v14087_v30  ;;  %v2630_v4 = vrot.slane %v13462_v2, 6 }
 0x1c1   : > { %9586 = vmatprep.mubr.f32.mxu0 %v14066_v5  ;;  %11357 = vmatpush3.bf16.msra.mxu0 %v11354_v10  ;;  %v14082_v5 = vsel %vm2428_vm5, %v2444_v9, %v2446_v15  ;;  %v2450_v10 = vrot.slane %v13581_v19, 5 }
 0x1c2   : > { %11359 = vmatprep.subr.bf16.mxu0 %v11358_v61  ;;  %16609 = vst [vmem:[#allocation16_spill] sm:$0xff] %v14082_v5 }
 0x1c3   : > { %v14097_v9 = vsel %vm2428_vm5, %v2448_v18, %v2450_v10  ;;  %v7511_v18 = vld [vmem:[%s16482_s3 + $0x3f8] sm:$0xff] }
 0x1c4   : > { %9587 = vmatmul.mubr.f32.gmra.mrb[22].mxu0 %v14071_v45  ;;  %v7509_v45 = vld [vmem:[%s16482_s3 + $0x3e8] sm:$0xff]  ;;  %16611 = vst [vmem:[#allocation20_spill] sm:$0xff] %v14097_v9 }
 0x1c5   : > { %9589 = vmatprep.mubr.f32.mxu0 %v14082_v5  ;;  %11361 = vmatpush3.bf16.msra.mxu0 %v11358_v61  ;;  %v2622_v61 = vrot.slane %v13405_v37, 6  ;;  %v11370_v15 = vpack.c.bf16 %v7509_v45, %v7508_v38  ;;  %v14105_v5 = vsel %vm2428_vm5, %v2450_v10, %v16612_v41  ;;  %v7512_v10 = vld [vmem:[%s16482_s3 + $0x400] sm:$0xff]  ;;  %v7513_v38 = vld [vmem:[%s16482_s3 + $0x408] sm:$0xff] }
 0x1c6   : > { %11363 = vmatprep.subr.bf16.mxu0 %v11362_v31  ;;  %16613 = vst [vmem:[#allocation21_spill] sm:$0xff] %v14105_v5  ;;  %v11378_v41 = vpack.c.bf16 %v7513_v38, %v7512_v10  ;;  %v7516_v10 = vld [vmem:[%s16482_s3 + $0x420] sm:$0xff]  ;;  %v7517_v38 = vld [vmem:[%s16482_s3 + $0x428] sm:$0xff] }
 0x1c8   : > { %9590 = vmatmul.mubr.f32.gmra.mrb[24].mxu0 %v14087_v30  ;;  %v7510_v30 = vld [vmem:[%s16482_s3 + $0x3f0] sm:$0xff] }
 0x1c9   : > { %9592 = vmatprep.mubr.f32.mxu0 %v14097_v9  ;;  %11365 = vmatpush3.bf16.msra.mxu0 %v11362_v31  ;;  %v2623_v31 = vsel %vm2620_vm6, %v2621_v3, %v2622_v61  ;;  %v11374_v45 = vpack.c.bf16 %v7511_v18, %v7510_v30  ;;  %v2624_v9 = vrot.slane %v13398_v55, 6  ;;  %v7515_v30 = vld [vmem:[%s16482_s3 + $0x418] sm:$0xff]  ;;  %v2626_v3 = vrot.slane %v13438_v44, 6 }
 0x1ca   : > { %11367 = vmatprep.subr.bf16.mxu0 %v11366_v39 }
 0x1cc   : > { %9593 = vmatmul.mubr.f32.gmra.mrb[26].mxu0 %v14105_v5  ;;  %v2627_v5 = vsel %vm2620_vm6, %v2624_v9, %v2626_v3 }
 0x1cd   : > { %11369 = vmatpush3.bf16.msra.mxu0 %v11366_v39  ;;  %9627 = vmatprep.mubr.f32.mxu0 %v2623_v31  ;;  %v7514_v39 = vld [vmem:[%s16482_s3 + $0x410] sm:$0xff]  ;;  %v2625_v31 = vsel %vm2620_vm6, %v2622_v61, %v2624_v9  ;;  %v2634_v9 = vrot.slane %v13499_v23, 6 }
 0x1ce   : > { %11371 = vmatprep.subr.bf16.mxu0 %v11370_v15  ;;  %v11382_v18 = vpack.c.bf16 %v7515_v30, %v7514_v39  ;;  %v2632_v39 = vrot.slane %v13455_v26, 6  ;;  %v7518_v30 = vld [vmem:[%s16482_s3 + $0x430] sm:$0xff] }
 0x1d1   : > { %11373 = vmatpush3.bf16.msra.mxu0 %v11370_v15  ;;  %v2628_v15 = vrot.slane %v13426_v42, 6 }
 0x1d2   : > { %11375 = vmatprep.subr.bf16.mxu0 %v11374_v45 }
 0x1d3   : > { %v14140_v61 = vsel %vm2620_vm6, %v2626_v3, %v2628_v15  ;;  %v14156_v3 = vsel %vm2620_vm6, %v2630_v4, %v2632_v39 }
 0x1d4   : > { %16614 = vst [vmem:[#allocation22_spill] sm:$0xff] %v14140_v61 }
 0x1d5   : > { %11377 = vmatpush3.bf16.msra.mxu0 %v11374_v45  ;;  %v11386_v45 = vpack.c.bf16 %v7517_v38, %v7516_v10  ;;  %v2636_v10 = vrot.slane %v13490_v22, 6  ;;  %v7520_v38 = vld [vmem:[%s16482_s3 + $0x440] sm:$0xff] }
 0x1d6   : > { %11379 = vmatprep.subr.bf16.mxu0 %v11378_v41 }
 0x1d8   : > { %9628 = vmatmul.mubr.f32.vlgmr.msra.gmra.mrb[16].mxu0 %v2625_v31  ;;  %v7519_v31 = vld [vmem:[%s16482_s3 + $0x438] sm:$0xff] }
 0x1d9   : > { %9630 = vmatprep.mubr.f32.mxu0 %v2627_v5  ;;  %11381 = vmatpush3.bf16.msra.mxu0 %v11378_v41  ;;  %v14151_v5 = vsel %vm2620_vm6, %v2628_v15, %v2630_v4  ;;  %v11390_v41 = vpack.c.bf16 %v7519_v31, %v7518_v30  ;;  %v7521_v15 = vld [vmem:[%s16482_s3 + $0x448] sm:$0xff]  ;;  %v14172_v30 = vsel %vm2620_vm6, %v2634_v9, %v2636_v10  ;;  %v2640_v31 = vrot.slane %v13528_v59, 6 }
 0x1da   : > { %11383 = vmatprep.subr.bf16.mxu0 %v11382_v18  ;;  %16615 = vst [vmem:[#allocation23_spill] sm:$0xff] %v14151_v5  ;;  %v11394_v4 = vpack.c.bf16 %v7521_v15, %v7520_v38  ;;  %16617 = vst [vmem:[#allocation25_spill] sm:$0xff] %v14172_v30  ;;  %v7524_v15 = vld [vmem:[%s16482_s3 + $0x460] sm:$0xff] }
 0x1dc   : > { %9631 = vmatmul.mubr.f32.gmra.mrb[18].mxu0 %v14140_v61  ;;  %v7522_v61 = vld [vmem:[%s16482_s3 + $0x450] sm:$0xff] }
 0x1dd   : > { %9633 = vmatprep.mubr.f32.mxu0 %v14151_v5  ;;  %11385 = vmatpush3.bf16.msra.mxu0 %v11382_v18  ;;  %v14167_v5 = vsel %vm2620_vm6, %v2632_v39, %v2634_v9  ;;  %v2638_v18 = vrot.slane %v13537_v52, 6  ;;  %v7523_v39 = vld [vmem:[%s16482_s3 + $0x458] sm:$0xff] }
 0x1de   : > { %11387 = vmatprep.subr.bf16.mxu0 %v11386_v45  ;;  %16616 = vst [vmem:[#allocation24_spill] sm:$0xff] %v14167_v5  ;;  %v11398_v9 = vpack.c.bf16 %v7523_v39, %v7522_v61  ;;  %v2813_v61 = vrot.slane %v13372_v49, 7  ;;  %v16621_v39 = vrot.slane %v13824_v58, 6 }
 0x1df   : > { %v14188_v38 = vsel %vm2620_vm6, %v2638_v18, %v2640_v31 }
 0x1e0   : > { %9634 = vmatmul.mubr.f32.gmra.mrb[20].mxu0 %v14156_v3  ;;  %16619 = vst [vmem:[#allocation27_spill] sm:$0xff] %v14188_v38 }
 0x1e1   : > { %9636 = vmatprep.mubr.f32.mxu0 %v14167_v5  ;;  %11389 = vmatpush3.bf16.msra.mxu0 %v11386_v45  ;;  %v14183_v5 = vsel %vm2620_vm6, %v2636_v10, %v2638_v18  ;;  %v2642_v45 = vrot.slane %v13581_v19, 6 }
 0x1e2   : > { %11391 = vmatprep.subr.bf16.mxu0 %v11390_v41  ;;  %16618 = vst [vmem:[#allocation26_spill] sm:$0xff] %v14183_v5 }
 0x1e3   : > { %v14198_v10 = vsel %vm2620_vm6, %v2640_v31, %v2642_v45  ;;  %v7526_v31 = vld [vmem:[%s16482_s3 + $0x470] sm:$0xff] }
 0x1e4   : > { %9637 = vmatmul.mubr.f32.gmra.mrb[22].mxu0 %v14172_v30  ;;  %v7525_v30 = vld [vmem:[%s16482_s3 + $0x468] sm:$0xff]  ;;  %16620 = vst [vmem:[#allocation28_spill] sm:$0xff] %v14198_v10 }
 0x1e5   : > { %9639 = vmatprep.mubr.f32.mxu0 %v14183_v5  ;;  %11393 = vmatpush3.bf16.msra.mxu0 %v11390_v41  ;;  %v2814_v41 = vrot.slane %v13405_v37, 7  ;;  %v11402_v18 = vpack.c.bf16 %v7525_v30, %v7524_v15  ;;  %v14206_v5 = vsel %vm2620_vm6, %v2642_v45, %v16621_v39  ;;  %v7528_v30 = vld [vmem:[%s16482_s3 + $0x480] sm:$0xff]  ;;  %v7529_v45 = vld [vmem:[%s16482_s3 + $0x488] sm:$0xff]  ;;  %v2816_v39 = vrot.slane %v13398_v55, 7 }
 0x1e6   : > { %11395 = vmatprep.subr.bf16.mxu0 %v11394_v4  ;;  %16622 = vst [vmem:[#allocation29_spill] sm:$0xff] %v14206_v5  ;;  %v11410_v15 = vpack.c.bf16 %v7529_v45, %v7528_v30  ;;  %v7532_v30 = vld [vmem:[%s16482_s3 + $0x4a0] sm:$0xff]  ;;  %v7533_v45 = vld [vmem:[%s16482_s3 + $0x4a8] sm:$0xff] }
 0x1e8   : > { %9640 = vmatmul.mubr.f32.gmra.mrb[24].mxu0 %v14188_v38  ;;  %v7527_v38 = vld [vmem:[%s16482_s3 + $0x478] sm:$0xff] }
 0x1e9   : > { %9642 = vmatprep.mubr.f32.mxu0 %v14198_v10  ;;  %11397 = vmatpush3.bf16.msra.mxu0 %v11394_v4  ;;  %v2815_v4 = vsel %vm2812_vm7, %v2813_v61, %v2814_v41  ;;  %v11406_v49 = vpack.c.bf16 %v7527_v38, %v7526_v31  ;;  %v7531_v38 = vld [vmem:[%s16482_s3 + $0x498] sm:$0xff]  ;;  %v2818_v61 = vrot.slane %v13438_v44, 7  ;;  %v2822_v10 = vrot.slane %v13462_v2, 7 }
 0x1ea   : > { %11399 = vmatprep.subr.bf16.mxu0 %v11398_v9 }
 0x1ec   : > { %9643 = vmatmul.mubr.f32.gmra.mrb[26].mxu0 %v14206_v5  ;;  %v2819_v5 = vsel %vm2812_vm7, %v2816_v39, %v2818_v61 }
 0x1ed   : > { %11401 = vmatpush3.bf16.msra.mxu0 %v11398_v9  ;;  %9677 = vmatprep.mubr.f32.mxu0 %v2815_v4  ;;  %v7530_v9 = vld [vmem:[%s16482_s3 + $0x490] sm:$0xff]  ;;  %v2817_v4 = vsel %vm2812_vm7, %v2814_v41, %v2816_v39 }
 0x1ee   : > { %11403 = vmatprep.subr.bf16.mxu0 %v11402_v18  ;;  %v11414_v31 = vpack.c.bf16 %v7531_v38, %v7530_v9  ;;  %v2824_v9 = vrot.slane %v13455_v26, 7  ;;  %v7534_v38 = vld [vmem:[%s16482_s3 + $0x4b0] sm:$0xff] }
 0x1f1   : > { %11405 = vmatpush3.bf16.msra.mxu0 %v11402_v18  ;;  %v2820_v18 = vrot.slane %v13426_v42, 7 }
 0x1f2   : > { %11407 = vmatprep.subr.bf16.mxu0 %v11406_v49 }
 0x1f3   : > { %v14241_v41 = vsel %vm2812_vm7, %v2818_v61, %v2820_v18  ;;  %v14257_v61 = vsel %vm2812_vm7, %v2822_v10, %v2824_v9 }
 0x1f4   : > { %16623 = vst [vmem:[#allocation30_spill] sm:$0xff] %v14241_v41  ;;  %16625 = vst [vmem:[#allocation32_spill] sm:$0xff] %v14257_v61 }
 0x1f5   : > { %11409 = vmatpush3.bf16.msra.mxu0 %v11406_v49  ;;  %v11418_v49 = vpack.c.bf16 %v7533_v45, %v7532_v30  ;;  %v2828_v30 = vrot.slane %v13490_v22, 7  ;;  %v7536_v45 = vld [vmem:[%s16482_s3 + $0x4c0] sm:$0xff] }
 0x1f6   : > { %11411 = vmatprep.subr.bf16.mxu0 %v11410_v15 }
 0x1f8   : > { %9678 = vmatmul.mubr.f32.vlgmr.msra.gmra.mrb[16].mxu0 %v2817_v4  ;;  %v7535_v4 = vld [vmem:[%s16482_s3 + $0x4b8] sm:$0xff] }
 0x1f9   : > { %9680 = vmatprep.mubr.f32.mxu0 %v2819_v5  ;;  %11413 = vmatpush3.bf16.msra.mxu0 %v11410_v15  ;;  %v14252_v5 = vsel %vm2812_vm7, %v2820_v18, %v2822_v10  ;;  %v2826_v15 = vrot.slane %v13499_v23, 7  ;;  %v11422_v39 = vpack.c.bf16 %v7535_v4, %v7534_v38  ;;  %v7537_v18 = vld [vmem:[%s16482_s3 + $0x4c8] sm:$0xff]  ;;  %v2832_v4 = vrot.slane %v13528_v59, 7 }
 0x1fa   : > { %11415 = vmatprep.subr.bf16.mxu0 %v11414_v31  ;;  %16624 = vst [vmem:[#allocation31_spill] sm:$0xff] %v14252_v5  ;;  %v11426_v10 = vpack.c.bf16 %v7537_v18, %v7536_v45  ;;  %v16541_v18 = vrot.slane %v13824_v58, 7 }
 0x1fb   : > { %v14273_v38 = vsel %vm2812_vm7, %v2826_v15, %v2828_v30 }
 0x1fc   : > { %9681 = vmatmul.mubr.f32.gmra.mrb[18].mxu0 %v14241_v41  ;;  %v7538_v41 = vld [vmem:[%s16482_s3 + $0x4d0] sm:$0xff] }
 0x1fd   : > { %9683 = vmatprep.mubr.f32.mxu0 %v14252_v5  ;;  %11417 = vmatpush3.bf16.msra.mxu0 %v11414_v31  ;;  %v14268_v5 = vsel %vm2812_vm7, %v2824_v9, %v2826_v15  ;;  %v2830_v31 = vrot.slane %v13537_v52, 7  ;;  %v7539_v9 = vld [vmem:[%s16482_s3 + $0x4d8] sm:$0xff] }
 0x1fe   : > { %11419 = vmatprep.subr.bf16.mxu0 %v11418_v49  ;;  %16626 = vst [vmem:[#allocation33_spill] sm:$0xff] %v14268_v5  ;;  %v11430_v15 = vpack.c.bf16 %v7539_v9, %v7538_v41  ;;  %v7543_v9 = vld [vmem:[%s16482_s3 + $0x4f8] sm:$0xff] }
 0x1ff   : > { %v14289_v45 = vsel %vm2812_vm7, %v2830_v31, %v2832_v4 }
 0x200   : > { %9684 = vmatmul.mubr.f32.gmra.mrb[20].mxu0 %v14257_v61  ;;  %v7540_v61 = vld [vmem:[%s16482_s3 + $0x4e0] sm:$0xff] }
 0x201   : > { %9686 = vmatprep.mubr.f32.mxu0 %v14268_v5  ;;  %11421 = vmatpush3.bf16.msra.mxu0 %v11418_v49  ;;  %v14284_v5 = vsel %vm2812_vm7, %v2828_v30, %v2830_v31  ;;  %v2834_v49 = vrot.slane %v13581_v19, 7  ;;  %v7541_v30 = vld [vmem:[%s16482_s3 + $0x4e8] sm:$0xff]  ;;  %v7542_v31 = vld [vmem:[%s16482_s3 + $0x4f0] sm:$0xff] }
 0x202   : > { %11423 = vmatprep.subr.bf16.mxu0 %v11422_v39  ;;  %16627 = vst [vmem:[#allocation34_spill] sm:$0xff] %v14284_v5  ;;  %v11434_v41 = vpack.c.bf16 %v7541_v30, %v7540_v61  ;;  %v11438_v61 = vpack.c.bf16 %v7543_v9, %v7542_v31  ;;  %v7546_v30 = vld [vmem:[%s16482_s3 + $0x510] sm:$0xff]  ;;  %v7548_v31 = vld [vmem:[%s16482_s3 + $0x520] sm:$0xff] }
 0x204   : > { %9687 = vmatmul.mubr.f32.gmra.mrb[22].mxu0 %v14273_v38 }
 0x205   : > { %9689 = vmatprep.mubr.f32.mxu0 %v14284_v5  ;;  %11425 = vmatpush3.bf16.msra.mxu0 %v11422_v39  ;;  %v14300_v5 = vsel %vm2812_vm7, %v2832_v4, %v2834_v49  ;;  %v14306_v39 = vsel %vm2812_vm7, %v2834_v49, %v16541_v18  ;;  %v7545_v4 = vld [vmem:[%s16482_s3 + $0x508] sm:$0xff] }
 0x206   : > { %11427 = vmatprep.subr.bf16.mxu0 %v11426_v10 }
 0x208   : > { %9690 = vmatmul.mubr.f32.gmra.mrb[24].mxu0 %v14289_v45 }
 0x209   : > { %9692 = vmatprep.mubr.f32.mxu0 %v14300_v5  ;;  %11429 = vmatpush3.bf16.msra.mxu0 %v11426_v10  ;;  %v7544_v10 = vld [vmem:[%s16482_s3 + $0x500] sm:$0xff] }
 0x20a   : > { %11431 = vmatprep.subr.bf16.mxu0 %v11430_v15  ;;  %v11442_v49 = vpack.c.bf16 %v7545_v4, %v7544_v10  ;;  %v7551_v10 = vld [vmem:[%s16482_s3 + $0x538] sm:$0xff] }
 0x20c   : > { %9693 = vmatmul.mubr.f32.gmra.mrb[26].mxu0 %v14306_v39 }
 0x20d   : > { %11433 = vmatpush3.bf16.msra.mxu0 %v11430_v15  ;;  %9727 = vmatprep.mubr.f32.mxu0 %v13405_v37  ;;  %v7547_v37 = vld [vmem:[%s16482_s3 + $0x518] sm:$0xff] }
 0x20e   : > { %11435 = vmatprep.subr.bf16.mxu0 %v11434_v41  ;;  %v11446_v15 = vpack.c.bf16 %v7547_v37, %v7546_v30  ;;  %v7553_v30 = vld [vmem:[%s16482_s3 + $0x548] sm:$0xff] }
 0x211   : > { %11437 = vmatpush3.bf16.msra.mxu0 %v11434_v41  ;;  %v7549_v41 = vld [vmem:[%s16482_s3 + $0x528] sm:$0xff] }
 0x212   : > { %11439 = vmatprep.subr.bf16.mxu0 %v11438_v61  ;;  %v11450_v9 = vpack.c.bf16 %v7549_v41, %v7548_v31  ;;  %v7555_v31 = vld [vmem:[%s16482_s3 + $0x558] sm:$0xff] }
 0x215   : > { %11441 = vmatpush3.bf16.msra.mxu0 %v11438_v61  ;;  %v7550_v61 = vld [vmem:[%s16482_s3 + $0x530] sm:$0xff] }
 0x216   : > { %11443 = vmatprep.subr.bf16.mxu0 %v11442_v49  ;;  %v11454_v4 = vpack.c.bf16 %v7551_v10, %v7550_v61  ;;  %v7557_v61 = vld [vmem:[%s16482_s3 + $0x568] sm:$0xff] }
 0x218   : > { %9728 = vmatmul.mubr.f32.vlgmr.msra.gmra.mrb[16].mxu0 %v13398_v55 }
 0x219   : > { %9730 = vmatprep.mubr.f32.mxu0 %v13438_v44  ;;  %11445 = vmatpush3.bf16.msra.mxu0 %v11442_v49  ;;  %v7552_v49 = vld [vmem:[%s16482_s3 + $0x540] sm:$0xff] }
 0x21a   : > { %11447 = vmatprep.subr.bf16.mxu0 %v11446_v15  ;;  %v11458_v37 = vpack.c.bf16 %v7553_v30, %v7552_v49  ;;  %v7559_v49 = vld [vmem:[%s16482_s3 + $0x578] sm:$0xff] }
 0x21c   : > { %9731 = vmatmul.mubr.f32.gmra.mrb[18].mxu0 %v13426_v42 }
 0x21d   : > { %9733 = vmatprep.mubr.f32.mxu0 %v13462_v2  ;;  %11449 = vmatpush3.bf16.msra.mxu0 %v11446_v15  ;;  %v7554_v15 = vld [vmem:[%s16482_s3 + $0x550] sm:$0xff] }
 0x21e   : > { %11451 = vmatprep.subr.bf16.mxu0 %v11450_v9  ;;  %v11462_v41 = vpack.c.bf16 %v7555_v31, %v7554_v15  ;;  %v7561_v15 = vld [vmem:[%s16482_s3 + $0x588] sm:$0xff] }
 0x220   : > { %9734 = vmatmul.mubr.f32.gmra.mrb[20].mxu0 %v13455_v26 }
 0x221   : > { %9736 = vmatprep.mubr.f32.mxu0 %v13499_v23  ;;  %11453 = vmatpush3.bf16.msra.mxu0 %v11450_v9  ;;  %v7556_v9 = vld [vmem:[%s16482_s3 + $0x560] sm:$0xff] }
 0x222   : > { %11455 = vmatprep.subr.bf16.mxu0 %v11454_v4  ;;  %v11466_v10 = vpack.c.bf16 %v7557_v61, %v7556_v9  ;;  %v7562_v9 = vld [vmem:[%s16482_s3 + $0x590] sm:$0xff]  ;;  %v7564_v61 = vld [vmem:[%s16482_s3 + $0x5a0] sm:$0xff] }
 0x224   : > { %9737 = vmatmul.mubr.f32.gmra.mrb[22].mxu0 %v13490_v22 }
 0x225   : > { %9739 = vmatprep.mubr.f32.mxu0 %v13537_v52  ;;  %11457 = vmatpush3.bf16.msra.mxu0 %v11454_v4  ;;  %v7558_v4 = vld [vmem:[%s16482_s3 + $0x570] sm:$0xff] }
 0x226   : > { %11459 = vmatprep.subr.bf16.mxu0 %v11458_v37  ;;  %v11470_v30 = vpack.c.bf16 %v7559_v49, %v7558_v4  ;;  %v7566_v49 = vld [vmem:[%s16482_s3 + $0x5b0] sm:$0xff] }
 0x228   : > { %9740 = vmatmul.mubr.f32.gmra.mrb[24].mxu0 %v13528_v59 }
 0x229   : > { %9742 = vmatprep.mubr.f32.mxu0 %v13581_v19  ;;  %11461 = vmatpush3.bf16.msra.mxu0 %v11458_v37  ;;  %v7560_v37 = vld [vmem:[%s16482_s3 + $0x580] sm:$0xff] }
 0x22a   : > { %11463 = vmatprep.subr.bf16.mxu0 %v11462_v41  ;;  %v11474_v31 = vpack.c.bf16 %v7561_v15, %v7560_v37  ;;  %v7568_v37 = vld [vmem:[%s16482_s3 + $0x5c0] sm:$0xff]  ;;  %v7569_v15 = vld [vmem:[%s16482_s3 + $0x5c8] sm:$0xff] }
 0x22c   : > { %9743 = vmatmul.mubr.f32.gmra.mrb[26].mxu0 %v13824_v58 }
 0x22d   : > { %11465 = vmatpush3.bf16.msra.mxu0 %v11462_v41  ;;  %9777 = vmatprep.mubr.f32.mxu0 %v13398_v55  ;;  %v7563_v55 = vld [vmem:[%s16482_s3 + $0x598] sm:$0xff] }
 0x22e   : > { %11467 = vmatprep.subr.bf16.mxu0 %v11466_v10  ;;  %v11478_v41 = vpack.c.bf16 %v7563_v55, %v7562_v9  ;;  %v7570_v9 = vld [vmem:[%s16482_s3 + $0x5d0] sm:$0xff]  ;;  %v7571_v55 = vld [vmem:[%s16482_s3 + $0x5d8] sm:$0xff] }
 0x231   : > { %11469 = vmatpush3.bf16.msra.mxu0 %v11466_v10  ;;  %v7565_v10 = vld [vmem:[%s16482_s3 + $0x5a8] sm:$0xff] }
 0x232   : > { %11471 = vmatprep.subr.bf16.mxu0 %v11470_v30  ;;  %v11482_v4 = vpack.c.bf16 %v7565_v10, %v7564_v61  ;;  %v7572_v61 = vld [vmem:[%s16482_s3 + $0x5e0] sm:$0xff]  ;;  %v7573_v10 = vld [vmem:[%s16482_s3 + $0x5e8] sm:$0xff] }
 0x235   : > { %11473 = vmatpush3.bf16.msra.mxu0 %v11470_v30  ;;  %v7567_v30 = vld [vmem:[%s16482_s3 + $0x5b8] sm:$0xff] }
 0x236   : > { %11475 = vmatprep.subr.bf16.mxu0 %v11474_v31 }
 0x238   : > { %9778 = vmatmul.mubr.f32.vlgmr.msra.gmra.mrb[16].mxu0 %v13438_v44  ;;  %v11486_v44 = vpack.c.bf16 %v7567_v30, %v7566_v49  ;;  %v7574_v49 = vld [vmem:[%s16482_s3 + $0x5f0] sm:$0xff]  ;;  %v7575_v30 = vld [vmem:[%s16482_s3 + $0x5f8] sm:$0xff] }
 0x239   : > { %9780 = vmatprep.mubr.f32.mxu0 %v13426_v42  ;;  %11477 = vmatpush3.bf16.msra.mxu0 %v11474_v31  ;;  %v11490_v31 = vpack.c.bf16 %v7569_v15, %v7568_v37  ;;  %v7576_v37 = vld [vmem:[%s16482_s3 + $0x600] sm:$0xff]  ;;  %v7577_v15 = vld [vmem:[%s16482_s3 + $0x608] sm:$0xff] }
 0x23a   : > { %11479 = vmatprep.subr.bf16.mxu0 %v11478_v41 }
 0x23c   : > { %9781 = vmatmul.mubr.f32.gmra.mrb[18].mxu0 %v13462_v2 }
 0x23d   : > { %9783 = vmatprep.mubr.f32.mxu0 %v13455_v26  ;;  %11481 = vmatpush3.bf16.msra.mxu0 %v11478_v41  ;;  %v11494_v41 = vpack.c.bf16 %v7571_v55, %v7570_v9  ;;  %v7578_v9 = vld [vmem:[%s16482_s3 + $0x610] sm:$0xff] }
 0x23e   : > { %11483 = vmatprep.subr.bf16.mxu0 %v11482_v4 }
 0x240   : > { %9784 = vmatmul.mubr.f32.gmra.mrb[20].mxu0 %v13499_v23 }
 0x241   : > { %9786 = vmatprep.mubr.f32.mxu0 %v13490_v22  ;;  %11485 = vmatpush3.bf16.msra.mxu0 %v11482_v4  ;;  %v11498_v4 = vpack.c.bf16 %v7573_v10, %v7572_v61  ;;  %v7581_v61 = vld [vmem:[%s16482_s3 + $0x628] sm:$0xff] }
 0x242   : > { %11487 = vmatprep.subr.bf16.mxu0 %v11486_v44 }
 0x244   : > { %9787 = vmatmul.mubr.f32.gmra.mrb[22].mxu0 %v13537_v52 }
 0x245   : > { %9789 = vmatprep.mubr.f32.mxu0 %v13528_v59  ;;  %11489 = vmatpush3.bf16.msra.mxu0 %v11486_v44  ;;  %v11502_v44 = vpack.c.bf16 %v7575_v30, %v7574_v49  ;;  %v7583_v49 = vld [vmem:[%s16482_s3 + $0x638] sm:$0xff]  ;;  %v7585_v30 = vld [vmem:[%s16482_s3 + $0x648] sm:$0xff] }
 0x246   : > { %11491 = vmatprep.subr.bf16.mxu0 %v11490_v31 }
 0x248   : > { %9790 = vmatmul.mubr.f32.gmra.mrb[24].mxu0 %v13581_v19 }
 0x249   : > { %9792 = vmatprep.mubr.f32.mxu0 %v13824_v58  ;;  %11493 = vmatpush3.bf16.msra.mxu0 %v11490_v31  ;;  %v11506_v31 = vpack.c.bf16 %v7577_v15, %v7576_v37  ;;  %v3314_v37 = vrot.slane %v13824_v58, 1  ;;  %v7586_v15 = vld [vmem:[%s16482_s3 + $0x650] sm:$0xff] }
 0x24a   : > { %11495 = vmatprep.subr.bf16.mxu0 %v11494_v41 }
 0x24c   : > { %9793 = vmatmul.mubr.f32.gmra.mrb[26].mxu0 %v13850_v50 }
 0x24d   : > { %11497 = vmatpush3.bf16.msra.mxu0 %v11494_v41  ;;  %9827 = vmatprep.mubr.f32.mxu0 %v13470_v16  ;;  %v7579_v16 = vld [vmem:[%s16482_s3 + $0x618] sm:$0xff]  ;;  %v7580_v41 = vld [vmem:[%s16482_s3 + $0x620] sm:$0xff] }
 0x24e   : > { %11499 = vmatprep.subr.bf16.mxu0 %v11498_v4  ;;  %v11510_v55 = vpack.c.bf16 %v7579_v16, %v7578_v9  ;;  %v11514_v10 = vpack.c.bf16 %v7581_v61, %v7580_v41  ;;  %v3316_v9 = vrot.slane %v13850_v50, 1  ;;  %v16540_v61 = vrot.slane %v13876_v40, 1 }
 0x251   : > { %11501 = vmatpush3.bf16.msra.mxu0 %v11498_v4  ;;  %v7582_v4 = vld [vmem:[%s16482_s3 + $0x630] sm:$0xff] }
 0x252   : > { %11503 = vmatprep.subr.bf16.mxu0 %v11502_v44 }
 0x255   : > { %11505 = vmatpush3.bf16.msra.mxu0 %v11502_v44 }
 0x256   : > { %11507 = vmatprep.subr.bf16.mxu0 %v11506_v31 }
 0x258   : > { %9828 = vmatmul.mubr.f32.vlgmr.msra.gmra.mrb[16].mxu0 %v13473_v54  ;;  %v11518_v54 = vpack.c.bf16 %v7583_v49, %v7582_v4  ;;  %v7589_v4 = vld [vmem:[%s16482_s3 + $0x668] sm:$0xff]  ;;  %v14496_v49 = vsel %vm1389_vm1, %v3314_v37, %v3316_v9 }
 0x259   : > { %9830 = vmatprep.mubr.f32.mxu0 %v13507_v20  ;;  %11509 = vmatpush3.bf16.msra.mxu0 %v11506_v31  ;;  %v7584_v20 = vld [vmem:[%s16482_s3 + $0x640] sm:$0xff]  ;;  %v7587_v31 = vld [vmem:[%s16482_s3 + $0x658] sm:$0xff] }
 0x25a   : > { %11511 = vmatprep.subr.bf16.mxu0 %v11510_v55  ;;  %v11522_v44 = vpack.c.bf16 %v7585_v30, %v7584_v20  ;;  %v11526_v16 = vpack.c.bf16 %v7587_v31, %v7586_v15  ;;  %v14506_v15 = vsel %vm1389_vm1, %v3316_v9, %v16540_v61  ;;  %v7590_v31 = vld [vmem:[%s16482_s3 + $0x670] sm:$0xff]  ;;  %v7592_v9 = vld [vmem:[%s16482_s3 + $0x680] sm:$0xff] }
 0x25c   : > { %9831 = vmatmul.mubr.f32.gmra.mrb[18].mxu0 %v13517_v21 }
 0x25d   : > { %9833 = vmatprep.mubr.f32.mxu0 %v13545_v24  ;;  %11513 = vmatpush3.bf16.msra.mxu0 %v11510_v55  ;;  %v16628_v55 = vrot.slane %v13581_v19, 1 }
 0x25e   : > { %11515 = vmatprep.subr.bf16.mxu0 %v11514_v10 }
 0x25f   : > { %v14485_v41 = vsel %vm1389_vm1, %v16628_v55, %v3314_v37  ;;  %v7591_v37 = vld [vmem:[%s16482_s3 + $0x678] sm:$0xff] }
 0x260   : > { %9834 = vmatmul.mubr.f32.gmra.mrb[20].mxu0 %v13548_v62  ;;  %v11534_v55 = vpack.c.bf16 %v7591_v37, %v7590_v31  ;;  %v7594_v31 = vld [vmem:[%s16482_s3 + $0x690] sm:$0xff]  ;;  %v7595_v37 = vld [vmem:[%s16482_s3 + $0x698] sm:$0xff] }
 0x261   : > { %9836 = vmatprep.mubr.f32.mxu0 %v13589_v0  ;;  %11517 = vmatpush3.bf16.msra.mxu0 %v11514_v10  ;;  %v7588_v10 = vld [vmem:[%s16482_s3 + $0x660] sm:$0xff] }
 0x262   : > { %11519 = vmatprep.subr.bf16.mxu0 %v11518_v54  ;;  %v11530_v20 = vpack.c.bf16 %v7589_v4, %v7588_v10  ;;  %v7593_v4 = vld [vmem:[%s16482_s3 + $0x688] sm:$0xff] }
 0x264   : > { %9837 = vmatmul.mubr.f32.gmra.mrb[22].mxu0 %v13592_v13 }
 0x265   : > { %9839 = vmatprep.mubr.f32.mxu0 %v13639_v12  ;;  %11521 = vmatpush3.bf16.msra.mxu0 %v11518_v54 }
 0x266   : > { %11523 = vmatprep.subr.bf16.mxu0 %v11522_v44 }
 0x268   : > { %9840 = vmatmul.mubr.f32.gmra.mrb[24].mxu0 %v14485_v41 }
 0x269   : > { %9842 = vmatprep.mubr.f32.mxu0 %v14496_v49  ;;  %11525 = vmatpush3.bf16.msra.mxu0 %v11522_v44 }
 0x26a   : > { %v14499_v54 = vpop.f32.mrb[56].mxu1  ;;  %11527 = vmatprep.subr.bf16.mxu0 %v11526_v16 }
 0x26b   : > { %16629 = vst [vmem:[#allocation35_spill] sm:$0xff] %v14499_v54  ;;  %v14501_v30 = vpop.f32.mrb[57].mxu1  ;;  %v7639_v54 = vld [vmem:[%s16482_s3 + $0x7f8] sm:$0xff] }
 0x26c   : > { %16630 = vst [vmem:[#allocation36_spill] sm:$0xff] %v14501_v30  ;;  %9843 = vmatmul.mubr.f32.gmra.mrb[26].mxu0 %v14506_v15 }
 0x26d   : > { %11529 = vmatpush3.bf16.msra.mxu0 %v11526_v16  ;;  %9877 = vmatprep.mubr.f32.mxu0 %v13914_v47  ;;  %v11538_v16 = vpack.c.bf16 %v7593_v4, %v7592_v9  ;;  %v7596_v9 = vld [vmem:[%s16482_s3 + $0x6a0] sm:$0xff]  ;;  %v7597_v4 = vld [vmem:[%s16482_s3 + $0x6a8] sm:$0xff] }
 0x26e   : > { %v14516_v44 = vpop.f32.mrb[58].mxu1  ;;  %11531 = vmatprep.subr.bf16.mxu0 %v11530_v20 }
 0x26f   : > { %16631 = vst [vmem:[#allocation37_spill] sm:$0xff] %v14516_v44  ;;  %v14518_v10 = vpop.f32.mrb[59].mxu1  ;;  %v16647_v44 = vrot.slane %v13824_v58, 4 }
 0x270   : > { %16632 = vst [vmem:[#allocation38_spill] sm:$0xff] %v14518_v10  ;;  %v11542_v10 = vpack.c.bf16 %v7595_v37, %v7594_v31  ;;  %v7598_v37 = vld [vmem:[%s16482_s3 + $0x6b0] sm:$0xff] }
 0x271   : > { %11533 = vmatpush3.bf16.msra.mxu0 %v11530_v20 }
 0x272   : > { %v14526_v61 = vpop.f32.mrb[60].mxu1  ;;  %11535 = vmatprep.subr.bf16.mxu0 %v11534_v55 }
 0x273   : > { %16633 = vst [vmem:[#allocation39_spill] sm:$0xff] %v14526_v61  ;;  %v14528_v47 = vpop.f32.mrb[61].mxu1  ;;  %v16646_v61 = vld [vmem:[#allocation14_spill] sm:$0xff] }
 0x274   : > { %16634 = vst [vmem:[#allocation40_spill] sm:$0xff] %v14528_v47  ;;  %v7607_v47 = vld [vmem:[%s16482_s3 + $0x6f8] sm:$0xff] }
 0x275   : > { %11537 = vmatpush3.bf16.msra.mxu0 %v11534_v55 }
 0x276   : > { %v14536_v18 = vpop.f32.mrb[62].mxu1  ;;  %11539 = vmatprep.subr.bf16.mxu0 %v11538_v16 }
 0x277   : > { %16635 = vst [vmem:[#allocation41_spill] sm:$0xff] %v14536_v18  ;;  %v14538_v20 = vpop.f32.mrb[63].mxu1  ;;  %v11546_v18 = vpack.c.bf16 %v7597_v4, %v7596_v9  ;;  %v7600_v9 = vld [vmem:[%s16482_s3 + $0x6c0] sm:$0xff]  ;;  %v7601_v4 = vld [vmem:[%s16482_s3 + $0x6c8] sm:$0xff] }
 0x278   : > { %16636 = vst [vmem:[#allocation42_spill] sm:$0xff] %v14538_v20  ;;  %9878 = vmatmul.mubr.f32.vlgmr.msra.gmra.mrb[16].mxu0 %v13926_v14  ;;  %v7599_v20 = vld [vmem:[%s16482_s3 + $0x6b8] sm:$0xff] }
 0x279   : > { %9880 = vmatprep.mubr.f32.mxu0 %v13939_v8  ;;  %11541 = vmatpush3.bf16.msra.mxu0 %v11538_v16  ;;  %v11550_v8 = vpack.c.bf16 %v7599_v20, %v7598_v37  ;;  %v7602_v20 = vld [vmem:[%s16482_s3 + $0x6d0] sm:$0xff]  ;;  %v7603_v37 = vld [vmem:[%s16482_s3 + $0x6d8] sm:$0xff] }
 0x27a   : > { %v14548_v55 = vpop.f32.mrb[64].mxu1  ;;  %11543 = vmatprep.subr.bf16.mxu0 %v11542_v10 }
 0x27b   : > { %16637 = vst [vmem:[#allocation43_spill] sm:$0xff] %v14548_v55  ;;  %v14550_v31 = vpop.f32.mrb[65].mxu1  ;;  %v7606_v55 = vld [vmem:[%s16482_s3 + $0x6f0] sm:$0xff] }
 0x27c   : > { %16638 = vst [vmem:[#allocation44_spill] sm:$0xff] %v14550_v31  ;;  %9881 = vmatmul.mubr.f32.gmra.mrb[18].mxu0 %v13944_v51 }
 0x27d   : > { %9883 = vmatprep.mubr.f32.mxu0 %v13957_v33  ;;  %11545 = vmatpush3.bf16.msra.mxu0 %v11542_v10  ;;  %v11554_v10 = vpack.c.bf16 %v7601_v4, %v7600_v9  ;;  %v7605_v9 = vld [vmem:[%s16482_s3 + $0x6e8] sm:$0xff]  ;;  %v16641_v4 = vrot.slane %v13824_v58, 2 }
 0x27e   : > { %v14560_v14 = vpop.f32.mrb[66].mxu1  ;;  %11547 = vmatprep.subr.bf16.mxu0 %v11546_v18 }
 0x27f   : > { %16639 = vst [vmem:[#allocation45_spill] sm:$0xff] %v14560_v14  ;;  %v14562_v16 = vpop.f32.mrb[67].mxu1  ;;  %v11558_v14 = vpack.c.bf16 %v7603_v37, %v7602_v20  ;;  %v16642_v20 = vrot.slane %v13876_v40, 2 }
 0x280   : > { %16640 = vst [vmem:[#allocation46_spill] sm:$0xff] %v14562_v16  ;;  %9884 = vmatmul.mubr.f32.gmra.mrb[20].mxu0 %v13962_v1  ;;  %v3479_v16 = vrot.slane %v13850_v50, 2 }
 0x281   : > { %9886 = vmatprep.mubr.f32.mxu0 %v13975_v28  ;;  %11549 = vmatpush3.bf16.msra.mxu0 %v11546_v18  ;;  %v7604_v18 = vld [vmem:[%s16482_s3 + $0x6e0] sm:$0xff] }
 0x282   : > { %11551 = vmatprep.subr.bf16.mxu0 %v11550_v8  ;;  %v14591_v31 = vsel %vm1694_vm4, %v16641_v4, %v3479_v16  ;;  %v14597_v37 = vsel %vm1694_vm4, %v3479_v16, %v16642_v20  ;;  %v7608_v16 = vld [vmem:[%s16482_s3 + $0x700] sm:$0xff]  ;;  %v7610_v4 = vld [vmem:[%s16482_s3 + $0x710] sm:$0xff] }
 0x283   : > { %v7614_v20 = vld [vmem:[%s16482_s3 + $0x730] sm:$0xff] }
 0x284   : > { %9887 = vmatmul.mubr.f32.gmra.mrb[22].mxu0 %v13979_v27 }
 0x285   : > { %9889 = vmatprep.mubr.f32.mxu0 %v13995_v35  ;;  %11553 = vmatpush3.bf16.msra.mxu0 %v11550_v8  ;;  %v11562_v8 = vpack.c.bf16 %v7605_v9, %v7604_v18  ;;  %v7609_v18 = vld [vmem:[%s16482_s3 + $0x708] sm:$0xff] }
 0x286   : > { %11555 = vmatprep.subr.bf16.mxu0 %v11554_v10  ;;  %v11570_v9 = vpack.c.bf16 %v7609_v18, %v7608_v16  ;;  %v7617_v16 = vld [vmem:[%s16482_s3 + $0x748] sm:$0xff] }
 0x288   : > { %9890 = vmatmul.mubr.f32.gmra.mrb[24].mxu0 %v13863_v6 }
 0x289   : > { %9892 = vmatprep.mubr.f32.mxu0 %v14591_v31  ;;  %11557 = vmatpush3.bf16.msra.mxu0 %v11554_v10  ;;  %v11566_v10 = vpack.c.bf16 %v7607_v47, %v7606_v55  ;;  %v7612_v55 = vld [vmem:[%s16482_s3 + $0x720] sm:$0xff] }
 0x28a   : > { %11559 = vmatprep.subr.bf16.mxu0 %v11558_v14 }
 0x28c   : > { %9893 = vmatmul.mubr.f32.gmra.mrb[26].mxu0 %v14597_v37 }
 0x28d   : > { %11561 = vmatpush3.bf16.msra.mxu0 %v11558_v14  ;;  %9927 = vmatprep.mubr.f32.mxu0 %v13479_v17  ;;  %v7611_v17 = vld [vmem:[%s16482_s3 + $0x718] sm:$0xff]  ;;  %v7613_v14 = vld [vmem:[%s16482_s3 + $0x728] sm:$0xff] }
 0x28e   : > { %11563 = vmatprep.subr.bf16.mxu0 %v11562_v8  ;;  %v11574_v47 = vpack.c.bf16 %v7611_v17, %v7610_v4  ;;  %v7618_v4 = vld [vmem:[%s16482_s3 + $0x750] sm:$0xff]  ;;  %v7619_v17 = vld [vmem:[%s16482_s3 + $0x758] sm:$0xff] }
 0x291   : > { %11565 = vmatpush3.bf16.msra.mxu0 %v11562_v8  ;;  %v11578_v8 = vpack.c.bf16 %v7613_v14, %v7612_v55  ;;  %v11590_v55 = vpack.c.bf16 %v7619_v17, %v7618_v4  ;;  %v16643_v14 = vrot.slane %v13581_v19, 3  ;;  %v7622_v17 = vld [vmem:[%s16482_s3 + $0x770] sm:$0xff] }
 0x292   : > { %11567 = vmatprep.subr.bf16.mxu0 %v11566_v10 }
 0x295   : > { %11569 = vmatpush3.bf16.msra.mxu0 %v11566_v10  ;;  %v7615_v10 = vld [vmem:[%s16482_s3 + $0x738] sm:$0xff] }
 0x296   : > { %11571 = vmatprep.subr.bf16.mxu0 %v11570_v9 }
 0x298   : > { %9928 = vmatmul.mubr.f32.vlgmr.msra.gmra.mrb[16].mxu0 %v13482_v56  ;;  %v11582_v56 = vpack.c.bf16 %v7615_v10, %v7614_v20  ;;  %v16542_v20 = vrot.slane %v13876_v40, 3  ;;  %v7620_v10 = vld [vmem:[%s16482_s3 + $0x760] sm:$0xff] }
 0x299   : > { %9930 = vmatprep.mubr.f32.mxu0 %v13510_v29  ;;  %11573 = vmatpush3.bf16.msra.mxu0 %v11570_v9  ;;  %v7616_v29 = vld [vmem:[%s16482_s3 + $0x740] sm:$0xff]  ;;  %v3640_v9 = vrot.slane %v13824_v58, 3 }
 0x29a   : > { %11575 = vmatprep.subr.bf16.mxu0 %v11574_v47  ;;  %v11586_v18 = vpack.c.bf16 %v7617_v16, %v7616_v29  ;;  %v7621_v29 = vld [vmem:[%s16482_s3 + $0x768] sm:$0xff] }
 0x29b   : > { %v11594_v16 = vpack.c.bf16 %v7621_v29, %v7620_v10  ;;  %v7626_v29 = vld [vmem:[%s16482_s3 + $0x790] sm:$0xff] }
 0x29c   : > { %9931 = vmatmul.mubr.f32.gmra.mrb[18].mxu0 %v13525_v34 }
 0x29d   : > { %9933 = vmatprep.mubr.f32.mxu0 %v13563_v43  ;;  %11577 = vmatpush3.bf16.msra.mxu0 %v11574_v47  ;;  %v3642_v47 = vrot.slane %v13850_v50, 3 }
 0x29e   : > { %11579 = vmatprep.subr.bf16.mxu0 %v11578_v8 }
 0x29f   : > { %v14673_v4 = vsel %vm1886_vm2, %v3642_v47, %v16542_v20 }
 0x2a0   : > { %9934 = vmatmul.mubr.f32.gmra.mrb[20].mxu0 %v13571_v48 }
 0x2a1   : > { %9936 = vmatprep.mubr.f32.mxu0 %v13601_v46  ;;  %11581 = vmatpush3.bf16.msra.mxu0 %v11578_v8  ;;  %v14656_v8 = vsel %vm1886_vm2, %v16643_v14, %v3640_v9  ;;  %v7623_v14 = vld [vmem:[%s16482_s3 + $0x778] sm:$0xff] }
 0x2a2   : > { %11583 = vmatprep.subr.bf16.mxu0 %v11582_v56 }
 0x2a4   : > { %9937 = vmatmul.mubr.f32.gmra.mrb[22].mxu0 %v13616_v32 }
 0x2a5   : > { %9939 = vmatprep.mubr.f32.mxu0 %v13654_v57  ;;  %11585 = vmatpush3.bf16.msra.mxu0 %v11582_v56  ;;  %v14667_v56 = vsel %vm1886_vm2, %v3640_v9, %v3642_v47  ;;  %v7624_v9 = vld [vmem:[%s16482_s3 + $0x780] sm:$0xff]  ;;  %v7625_v47 = vld [vmem:[%s16482_s3 + $0x788] sm:$0xff] }
 0x2a6   : > { %11587 = vmatprep.subr.bf16.mxu0 %v11586_v18  ;;  %v11602_v10 = vpack.c.bf16 %v7625_v47, %v7624_v9  ;;  %v7631_v9 = vld [vmem:[%s16482_s3 + $0x7b8] sm:$0xff] }
 0x2a8   : > { %9940 = vmatmul.mubr.f32.gmra.mrb[24].mxu0 %v14656_v8 }
 0x2a9   : > { %9942 = vmatprep.mubr.f32.mxu0 %v14667_v56  ;;  %11589 = vmatpush3.bf16.msra.mxu0 %v11586_v18  ;;  %v11598_v18 = vpack.c.bf16 %v7623_v14, %v7622_v17  ;;  %v7628_v17 = vld [vmem:[%s16482_s3 + $0x7a0] sm:$0xff] }
 0x2aa   : > { %11591 = vmatprep.subr.bf16.mxu0 %v11590_v55 }
 0x2ac   : > { %9943 = vmatmul.mubr.f32.gmra.mrb[26].mxu0 %v14673_v4 }
 0x2ad   : > { %11593 = vmatpush3.bf16.msra.mxu0 %v11590_v55  ;;  %9977 = vmatprep.mubr.f32.mxu0 %v13730_v60  ;;  %v7627_v60 = vld [vmem:[%s16482_s3 + $0x798] sm:$0xff] }
 0x2ae   : > { %11595 = vmatprep.subr.bf16.mxu0 %v11594_v16  ;;  %v11606_v55 = vpack.c.bf16 %v7627_v60, %v7626_v29  ;;  %v7633_v29 = vld [vmem:[%s16482_s3 + $0x7c8] sm:$0xff] }
 0x2b1   : > { %11597 = vmatpush3.bf16.msra.mxu0 %v11594_v16  ;;  %v7629_v16 = vld [vmem:[%s16482_s3 + $0x7a8] sm:$0xff] }
 0x2b2   : > { %11599 = vmatprep.subr.bf16.mxu0 %v11598_v18  ;;  %v11610_v14 = vpack.c.bf16 %v7629_v16, %v7628_v17  ;;  %v7635_v17 = vld [vmem:[%s16482_s3 + $0x7d8] sm:$0xff] }
 0x2b3   : > { %v16644_v16 = vld [vmem:[#allocation12_spill] sm:$0xff] }
 0x2b5   : > { %11601 = vmatpush3.bf16.msra.mxu0 %v11598_v18  ;;  %v7630_v18 = vld [vmem:[%s16482_s3 + $0x7b0] sm:$0xff] }
 0x2b6   : > { %11603 = vmatprep.subr.bf16.mxu0 %v11602_v10  ;;  %v11614_v47 = vpack.c.bf16 %v7631_v9, %v7630_v18  ;;  %v3803_v18 = vrot.slane %v13850_v50, 4  ;;  %v16645_v9 = vld [vmem:[#allocation10_spill] sm:$0xff] }
 0x2b8   : > { %9978 = vmatmul.mubr.f32.vlgmr.msra.gmra.mrb[16].mxu0 %v13742_v7  ;;  %v14739_v30 = vsel %vm2078_vm3, %v16647_v44, %v3803_v18 }
 0x2b9   : > { %9980 = vmatprep.mubr.f32.mxu0 %v13754_v25  ;;  %11605 = vmatpush3.bf16.msra.mxu0 %v11602_v10  ;;  %v7632_v10 = vld [vmem:[%s16482_s3 + $0x7c0] sm:$0xff]  ;;  %16648 = vst [vmem:[#allocation12_spill] sm:$0xff] %v14739_v30 }
 0x2ba   : > { %11607 = vmatprep.subr.bf16.mxu0 %v11606_v55  ;;  %v11618_v60 = vpack.c.bf16 %v7633_v29, %v7632_v10  ;;  %v7636_v10 = vld [vmem:[%s16482_s3 + $0x7e0] sm:$0xff]  ;;  %v7637_v29 = vld [vmem:[%s16482_s3 + $0x7e8] sm:$0xff] }
 0x2bc   : > { %9981 = vmatmul.mubr.f32.gmra.mrb[18].mxu0 %v13766_v63 }
 0x2bd   : > { %9983 = vmatprep.mubr.f32.mxu0 %v13778_v36  ;;  %11609 = vmatpush3.bf16.msra.mxu0 %v11606_v55  ;;  %v7634_v55 = vld [vmem:[%s16482_s3 + $0x7d0] sm:$0xff] }
 0x2be   : > { %11611 = vmatprep.subr.bf16.mxu0 %v11610_v14  ;;  %v11622_v20 = vpack.c.bf16 %v7635_v17, %v7634_v55  ;;  %v7638_v17 = vld [vmem:[%s16482_s3 + $0x7f0] sm:$0xff] }
 0x2bf   : > { %v11630_v44 = vpack.c.bf16 %v7639_v54, %v7638_v17 }
 0x2c0   : > { %9984 = vmatmul.mubr.f32.gmra.mrb[20].mxu0 %v13790_v53 }
 0x2c1   : > { %9986 = vmatprep.mubr.f32.mxu0 %v13802_v11  ;;  %11613 = vmatpush3.bf16.msra.mxu0 %v11610_v14  ;;  %v3805_v14 = vrot.slane %v13876_v40, 4 }
 0x2c2   : > { %11615 = vmatprep.subr.bf16.mxu0 %v11614_v47 }
 0x2c3   : > { %v14745_v55 = vsel %vm2078_vm3, %v3803_v18, %v3805_v14  ;;  %v7641_v18 = vld [vmem:[%s16482_s3 + $0x808] sm:$0xff] }
 0x2c4   : > { %9987 = vmatmul.mubr.f32.gmra.mrb[22].mxu0 %v16644_v16  ;;  %16649 = vst [vmem:[#allocation10_spill] sm:$0xff] %v14745_v55 }
 0x2c5   : > { %9989 = vmatprep.mubr.f32.mxu0 %v16645_v9  ;;  %11617 = vmatpush3.bf16.msra.mxu0 %v11614_v47  ;;  %v11626_v47 = vpack.c.bf16 %v7637_v29, %v7636_v10  ;;  %v7642_v29 = vld [vmem:[%s16482_s3 + $0x810] sm:$0xff] }
 0x2c6   : > { %11619 = vmatprep.subr.bf16.mxu0 %v11618_v60 }
 0x2c8   : > { %9990 = vmatmul.mubr.f32.gmra.mrb[24].mxu0 %v16646_v61 }
 0x2c9   : > { %9992 = vmatprep.mubr.f32.mxu0 %v14739_v30  ;;  %11621 = vmatpush3.bf16.msra.mxu0 %v11618_v60  ;;  %v7640_v60 = vld [vmem:[%s16482_s3 + $0x800] sm:$0xff] }
 0x2ca   : > { %11623 = vmatprep.subr.bf16.mxu0 %v11622_v20  ;;  %v11634_v10 = vpack.c.bf16 %v7641_v18, %v7640_v60  ;;  %v7647_v60 = vld [vmem:[%s16482_s3 + $0x838] sm:$0xff]  ;;  %v7648_v18 = vld [vmem:[%s16482_s3 + $0x840] sm:$0xff] }
 0x2cc   : > { %9993 = vmatmul.mubr.f32.gmra.mrb[26].mxu0 %v14745_v55 }
 0x2cd   : > { %11625 = vmatpush3.bf16.msra.mxu0 %v11622_v20  ;;  %10027 = vmatprep.mubr.f32.mxu0 %v13742_v7  ;;  %v7643_v7 = vld [vmem:[%s16482_s3 + $0x818] sm:$0xff]  ;;  %v7644_v20 = vld [vmem:[%s16482_s3 + $0x820] sm:$0xff] }
 0x2ce   : > { %11627 = vmatprep.subr.bf16.mxu0 %v11626_v47  ;;  %v11638_v54 = vpack.c.bf16 %v7643_v7, %v7642_v29  ;;  %v7650_v7 = vld [vmem:[%s16482_s3 + $0x850] sm:$0xff] }
 0x2d1   : > { %11629 = vmatpush3.bf16.msra.mxu0 %v11626_v47  ;;  %v7645_v47 = vld [vmem:[%s16482_s3 + $0x828] sm:$0xff] }
 0x2d2   : > { %11631 = vmatprep.subr.bf16.mxu0 %v11630_v44  ;;  %v11642_v17 = vpack.c.bf16 %v7645_v47, %v7644_v20  ;;  %v16650_v47 = vld [vmem:[#allocation11_spill] sm:$0xff] }
 0x2d5   : > { %11633 = vmatpush3.bf16.msra.mxu0 %v11630_v44  ;;  %v7646_v44 = vld [vmem:[%s16482_s3 + $0x830] sm:$0xff] }
 0x2d6   : > { %11635 = vmatprep.subr.bf16.mxu0 %v11634_v10 }
 0x2d8   : > { %10028 = vmatmul.mubr.f32.vlgmr.msra.gmra.mrb[16].mxu0 %v13754_v25  ;;  %v11646_v25 = vpack.c.bf16 %v7647_v60, %v7646_v44  ;;  %v16543_v44 = vrot.slane %v16650_v47, 4  ;;  %v7653_v60 = vld [vmem:[%s16482_s3 + $0x868] sm:$0xff] }
 0x2d9   : > { %10030 = vmatprep.mubr.f32.mxu0 %v13766_v63  ;;  %11637 = vmatpush3.bf16.msra.mxu0 %v11634_v10  ;;  %v7649_v10 = vld [vmem:[%s16482_s3 + $0x848] sm:$0xff] }
 0x2da   : > { %11639 = vmatprep.subr.bf16.mxu0 %v11638_v54  ;;  %v11650_v29 = vpack.c.bf16 %v7649_v10, %v7648_v18  ;;  %v7654_v10 = vld [vmem:[%s16482_s3 + $0x870] sm:$0xff] }
 0x2dc   : > { %10031 = vmatmul.mubr.f32.gmra.mrb[18].mxu0 %v13778_v36 }
 0x2dd   : > { %10033 = vmatprep.mubr.f32.mxu0 %v13790_v53  ;;  %11641 = vmatpush3.bf16.msra.mxu0 %v11638_v54  ;;  %v7651_v54 = vld [vmem:[%s16482_s3 + $0x858] sm:$0xff] }
 0x2de   : > { %11643 = vmatprep.subr.bf16.mxu0 %v11642_v17  ;;  %v11654_v20 = vpack.c.bf16 %v7651_v54, %v7650_v7  ;;  %v7655_v7 = vld [vmem:[%s16482_s3 + $0x878] sm:$0xff] }
 0x2df   : > { %v11662_v54 = vpack.c.bf16 %v7655_v7, %v7654_v10  ;;  %v7660_v7 = vld [vmem:[%s16482_s3 + $0x8a0] sm:$0xff] }
 0x2e0   : > { %10034 = vmatmul.mubr.f32.gmra.mrb[20].mxu0 %v13802_v11 }
 0x2e1   : > { %10036 = vmatprep.mubr.f32.mxu0 %v16644_v16  ;;  %11645 = vmatpush3.bf16.msra.mxu0 %v11642_v17  ;;  %v7652_v17 = vld [vmem:[%s16482_s3 + $0x860] sm:$0xff] }
 0x2e2   : > { %11647 = vmatprep.subr.bf16.mxu0 %v11646_v25  ;;  %v11658_v18 = vpack.c.bf16 %v7653_v60, %v7652_v17  ;;  %v7657_v17 = vld [vmem:[%s16482_s3 + $0x888] sm:$0xff] }
 0x2e4   : > { %10037 = vmatmul.mubr.f32.gmra.mrb[22].mxu0 %v16645_v9 }
 0x2e5   : > { %10039 = vmatprep.mubr.f32.mxu0 %v16646_v61  ;;  %11649 = vmatpush3.bf16.msra.mxu0 %v11646_v25  ;;  %v14813_v25 = vsel %vm2078_vm3, %v3805_v14, %v16543_v44  ;;  %v7656_v14 = vld [vmem:[%s16482_s3 + $0x880] sm:$0xff]  ;;  %v7658_v44 = vld [vmem:[%s16482_s3 + $0x890] sm:$0xff] }
 0x2e6   : > { %11651 = vmatprep.subr.bf16.mxu0 %v11650_v29  ;;  %16651 = vst [vmem:[#allocation14_spill] sm:$0xff] %v14813_v25  ;;  %v11666_v60 = vpack.c.bf16 %v7657_v17, %v7656_v14  ;;  %v16654_v14 = vld [vmem:[#allocation8_spill] sm:$0xff] }
 0x2e8   : > { %10040 = vmatmul.mubr.f32.gmra.mrb[24].mxu0 %v14739_v30 }
 0x2e9   : > { %10042 = vmatprep.mubr.f32.mxu0 %v14745_v55  ;;  %11653 = vmatpush3.bf16.msra.mxu0 %v11650_v29  ;;  %v16652_v29 = vld [vmem:[#allocation17_spill] sm:$0xff] }
 0x2ea   : > { %11655 = vmatprep.subr.bf16.mxu0 %v11654_v20  ;;  %v16660_v55 = vld [vmem:[#allocation21_spill] sm:$0xff] }
 0x2ec   : > { %10043 = vmatmul.mubr.f32.gmra.mrb[26].mxu0 %v14813_v25  ;;  %v16656_v25 = vld [vmem:[#allocation9_spill] sm:$0xff] }
 0x2ed   : > { %11657 = vmatpush3.bf16.msra.mxu0 %v11654_v20  ;;  %10077 = vmatprep.mubr.f32.mxu0 %v16652_v29  ;;  %v7659_v20 = vld [vmem:[%s16482_s3 + $0x898] sm:$0xff]  ;;  %v16653_v29 = vld [vmem:[#allocation18_spill] sm:$0xff] }
 0x2ee   : > { %11659 = vmatprep.subr.bf16.mxu0 %v11658_v18  ;;  %v11670_v10 = vpack.c.bf16 %v7659_v20, %v7658_v44  ;;  %v7663_v44 = vld [vmem:[%s16482_s3 + $0x8b8] sm:$0xff] }
 0x2ef   : > { %v16655_v20 = vld [vmem:[#allocation15_spill] sm:$0xff] }
 0x2f1   : > { %11661 = vmatpush3.bf16.msra.mxu0 %v11658_v18  ;;  %v7661_v18 = vld [vmem:[%s16482_s3 + $0x8a8] sm:$0xff] }
 0x2f2   : > { %11663 = vmatprep.subr.bf16.mxu0 %v11662_v54  ;;  %v11674_v17 = vpack.c.bf16 %v7661_v18, %v7660_v7  ;;  %v7665_v7 = vld [vmem:[%s16482_s3 + $0x8c8] sm:$0xff]  ;;  %v16657_v18 = vld [vmem:[#allocation16_spill] sm:$0xff] }
 0x2f5   : > { %11665 = vmatpush3.bf16.msra.mxu0 %v11662_v54  ;;  %v7662_v54 = vld [vmem:[%s16482_s3 + $0x8b0] sm:$0xff] }
 0x2f6   : > { %11667 = vmatprep.subr.bf16.mxu0 %v11666_v60 }
 0x2f8   : > { %10078 = vmatmul.mubr.f32.vlgmr.msra.gmra.mrb[16].mxu0 %v16653_v29  ;;  %v11678_v29 = vpack.c.bf16 %v7663_v44, %v7662_v54  ;;  %v16659_v54 = vld [vmem:[#allocation20_spill] sm:$0xff]  ;;  %v4123_v44 = vrot.slane %v13876_v40, 5 }
 0x2f9   : > { %10080 = vmatprep.mubr.f32.mxu0 %v16654_v14  ;;  %11669 = vmatpush3.bf16.msra.mxu0 %v11666_v60  ;;  %v7664_v60 = vld [vmem:[%s16482_s3 + $0x8c0] sm:$0xff]  ;;  %v16658_v14 = vld [vmem:[#allocation19_spill] sm:$0xff] }
 0x2fa   : > { %11671 = vmatprep.subr.bf16.mxu0 %v11670_v10 }
 0x2fc   : > { %10081 = vmatmul.mubr.f32.gmra.mrb[18].mxu0 %v16655_v20  ;;  %v11682_v20 = vpack.c.bf16 %v7665_v7, %v7664_v60  ;;  %v7668_v60 = vld [vmem:[%s16482_s3 + $0x8e0] sm:$0xff]  ;;  %v7669_v7 = vld [vmem:[%s16482_s3 + $0x8e8] sm:$0xff] }
 0x2fd   : > { %10083 = vmatprep.mubr.f32.mxu0 %v16656_v25  ;;  %11673 = vmatpush3.bf16.msra.mxu0 %v11670_v10  ;;  %v7666_v25 = vld [vmem:[%s16482_s3 + $0x8d0] sm:$0xff]  ;;  %v7667_v10 = vld [vmem:[%s16482_s3 + $0x8d8] sm:$0xff] }
 0x2fe   : > { %11675 = vmatprep.subr.bf16.mxu0 %v11674_v17 }
 0x300   : > { %10084 = vmatmul.mubr.f32.gmra.mrb[20].mxu0 %v16657_v18  ;;  %v11686_v18 = vpack.c.bf16 %v7667_v10, %v7666_v25  ;;  %v7670_v25 = vld [vmem:[%s16482_s3 + $0x8f0] sm:$0xff]  ;;  %v7671_v10 = vld [vmem:[%s16482_s3 + $0x8f8] sm:$0xff] }
 0x301   : > { %10086 = vmatprep.mubr.f32.mxu0 %v16658_v14  ;;  %11677 = vmatpush3.bf16.msra.mxu0 %v11674_v17  ;;  %v4125_v17 = vrot.slane %v16650_v47, 5  ;;  %v16661_v14 = vld [vmem:[#allocation6_spill] sm:$0xff] }
 0x302   : > { %11679 = vmatprep.subr.bf16.mxu0 %v11678_v29 }
 0x304   : > { %10087 = vmatmul.mubr.f32.gmra.mrb[22].mxu0 %v16659_v54  ;;  %v16662_v54 = vrot.slane %v13850_v50, 5 }
 0x305   : > { %10089 = vmatprep.mubr.f32.mxu0 %v16660_v55  ;;  %11681 = vmatpush3.bf16.msra.mxu0 %v11678_v29  ;;  %v11690_v55 = vpack.c.bf16 %v7669_v7, %v7668_v60  ;;  %v4126_v29 = vsel %vm2428_vm5, %v4123_v44, %v4125_v17  ;;  %v7674_v17 = vld [vmem:[%s16482_s3 + $0x910] sm:$0xff]  ;;  %v7676_v7 = vld [vmem:[%s16482_s3 + $0x920] sm:$0xff] }
 0x306   : > { %11683 = vmatprep.subr.bf16.mxu0 %v11682_v20  ;;  %v4124_v30 = vsel %vm2428_vm5, %v16662_v54, %v4123_v44  ;;  %v11694_v54 = vpack.c.bf16 %v7671_v10, %v7670_v25  ;;  %v7678_v10 = vld [vmem:[%s16482_s3 + $0x930] sm:$0xff] }
 0x308   : > { %10090 = vmatmul.mubr.f32.gmra.mrb[24].mxu0 %v16661_v14  ;;  %v16663_v14 = vld [vmem:[#allocation22_spill] sm:$0xff] }
 0x309   : > { %10092 = vmatprep.mubr.f32.mxu0 %v4124_v30  ;;  %11685 = vmatpush3.bf16.msra.mxu0 %v11682_v20  ;;  %v7672_v30 = vld [vmem:[%s16482_s3 + $0x900] sm:$0xff]  ;;  %v7673_v20 = vld [vmem:[%s16482_s3 + $0x908] sm:$0xff] }
 0x30a   : > { %11687 = vmatprep.subr.bf16.mxu0 %v11686_v18  ;;  %v11698_v44 = vpack.c.bf16 %v7673_v20, %v7672_v30  ;;  %v16666_v30 = vld [vmem:[#allocation25_spill] sm:$0xff] }
 0x30c   : > { %10093 = vmatmul.mubr.f32.gmra.mrb[26].mxu0 %v4126_v29  ;;  %v16664_v29 = vld [vmem:[#allocation23_spill] sm:$0xff] }
 0x30d   : > { %11689 = vmatpush3.bf16.msra.mxu0 %v11686_v18  ;;  %10127 = vmatprep.mubr.f32.mxu0 %v16663_v14  ;;  %v7675_v18 = vld [vmem:[%s16482_s3 + $0x918] sm:$0xff] }
 0x30e   : > { %11691 = vmatprep.subr.bf16.mxu0 %v11690_v55  ;;  %v11702_v60 = vpack.c.bf16 %v7675_v18, %v7674_v17  ;;  %v7679_v14 = vld [vmem:[%s16482_s3 + $0x938] sm:$0xff]  ;;  %v16667_v17 = vld [vmem:[#allocation26_spill] sm:$0xff] }
 0x30f   : > { %v11710_v20 = vpack.c.bf16 %v7679_v14, %v7678_v10  ;;  %v16668_v18 = vld [vmem:[#allocation27_spill] sm:$0xff]  ;;  %v4286_v10 = vrot.slane %v13876_v40, 6  ;;  %v16670_v14 = vld [vmem:[#allocation29_spill] sm:$0xff] }
 0x311   : > { %11693 = vmatpush3.bf16.msra.mxu0 %v11690_v55  ;;  %v7677_v55 = vld [vmem:[%s16482_s3 + $0x928] sm:$0xff] }
 0x312   : > { %11695 = vmatprep.subr.bf16.mxu0 %v11694_v54  ;;  %v11706_v25 = vpack.c.bf16 %v7677_v55, %v7676_v7  ;;  %v7683_v55 = vld [vmem:[%s16482_s3 + $0x958] sm:$0xff] }
 0x315   : > { %11697 = vmatpush3.bf16.msra.mxu0 %v11694_v54  ;;  %v16665_v54 = vld [vmem:[#allocation24_spill] sm:$0xff] }
 0x316   : > { %11699 = vmatprep.subr.bf16.mxu0 %v11698_v44 }
 0x318   : > { %10128 = vmatmul.mubr.f32.vlgmr.msra.gmra.mrb[16].mxu0 %v16664_v29  ;;  %v16669_v29 = vld [vmem:[#allocation28_spill] sm:$0xff] }
 0x319   : > { %10130 = vmatprep.mubr.f32.mxu0 %v14156_v3  ;;  %11701 = vmatpush3.bf16.msra.mxu0 %v11698_v44  ;;  %v7680_v3 = vld [vmem:[%s16482_s3 + $0x940] sm:$0xff]  ;;  %v7681_v44 = vld [vmem:[%s16482_s3 + $0x948] sm:$0xff] }
 0x31a   : > { %11703 = vmatprep.subr.bf16.mxu0 %v11702_v60  ;;  %v11714_v7 = vpack.c.bf16 %v7681_v44, %v7680_v3  ;;  %v7685_v3 = vld [vmem:[%s16482_s3 + $0x968] sm:$0xff] }
 0x31b   : > { %v16671_v44 = vld [vmem:[#allocation13_spill] sm:$0xff] }
 0x31c   : > { %10131 = vmatmul.mubr.f32.gmra.mrb[18].mxu0 %v16665_v54 }
 0x31d   : > { %10133 = vmatprep.mubr.f32.mxu0 %v16666_v30  ;;  %11705 = vmatpush3.bf16.msra.mxu0 %v11702_v60  ;;  %v7682_v60 = vld [vmem:[%s16482_s3 + $0x950] sm:$0xff]  ;;  %v7684_v30 = vld [vmem:[%s16482_s3 + $0x960] sm:$0xff] }
 0x31e   : > { %11707 = vmatprep.subr.bf16.mxu0 %v11706_v25  ;;  %v11718_v54 = vpack.c.bf16 %v7683_v55, %v7682_v60  ;;  %v7686_v55 = vld [vmem:[%s16482_s3 + $0x970] sm:$0xff] }
 0x320   : > { %10134 = vmatmul.mubr.f32.gmra.mrb[20].mxu0 %v16667_v17  ;;  %v16672_v17 = vrot.slane %v13850_v50, 6 }
 0x321   : > { %10136 = vmatprep.mubr.f32.mxu0 %v16668_v18  ;;  %11709 = vmatpush3.bf16.msra.mxu0 %v11706_v25  ;;  %v4288_v25 = vrot.slane %v16650_v47, 6 }
 0x322   : > { %11711 = vmatprep.subr.bf16.mxu0 %v11710_v20  ;;  %v4287_v18 = vsel %vm2620_vm6, %v16672_v17, %v4286_v10  ;;  %v7692_v17 = vld [vmem:[%s16482_s3 + $0x9a0] sm:$0xff] }
 0x323   : > { %v4289_v60 = vsel %vm2620_vm6, %v4286_v10, %v4288_v25  ;;  %v7689_v10 = vld [vmem:[%s16482_s3 + $0x988] sm:$0xff] }
 0x324   : > { %10137 = vmatmul.mubr.f32.gmra.mrb[22].mxu0 %v16669_v29  ;;  %v7687_v29 = vld [vmem:[%s16482_s3 + $0x978] sm:$0xff] }
 0x325   : > { %10139 = vmatprep.mubr.f32.mxu0 %v16670_v14  ;;  %11713 = vmatpush3.bf16.msra.mxu0 %v11710_v20  ;;  %v11722_v20 = vpack.c.bf16 %v7685_v3, %v7684_v30  ;;  %v16673_v14 = vld [vmem:[#allocation30_spill] sm:$0xff] }
 0x326   : > { %11715 = vmatprep.subr.bf16.mxu0 %v11714_v7  ;;  %v7690_v30 = vld [vmem:[%s16482_s3 + $0x990] sm:$0xff] }
 0x328   : > { %10140 = vmatmul.mubr.f32.gmra.mrb[24].mxu0 %v16671_v44  ;;  %v11726_v44 = vpack.c.bf16 %v7687_v29, %v7686_v55  ;;  %v7694_v29 = vld [vmem:[%s16482_s3 + $0x9b0] sm:$0xff] }
 0x329   : > { %10142 = vmatprep.mubr.f32.mxu0 %v4287_v18  ;;  %11717 = vmatpush3.bf16.msra.mxu0 %v11714_v7  ;;  %v7688_v7 = vld [vmem:[%s16482_s3 + $0x980] sm:$0xff]  ;;  %v7693_v18 = vld [vmem:[%s16482_s3 + $0x9a8] sm:$0xff] }
 0x32a   : > { %11719 = vmatprep.subr.bf16.mxu0 %v11718_v54  ;;  %v11730_v25 = vpack.c.bf16 %v7689_v10, %v7688_v7  ;;  %v11738_v55 = vpack.c.bf16 %v7693_v18, %v7692_v17  ;;  %v7696_v10 = vld [vmem:[%s16482_s3 + $0x9c0] sm:$0xff]  ;;  %v7699_v17 = vld [vmem:[%s16482_s3 + $0x9d8] sm:$0xff]  ;;  %v4449_v18 = vrot.slane %v13876_v40, 7 }
 0x32c   : > { %10143 = vmatmul.mubr.f32.gmra.mrb[26].mxu0 %v4289_v60  ;;  %v16675_v60 = vld [vmem:[#allocation32_spill] sm:$0xff] }
 0x32d   : > { %11721 = vmatpush3.bf16.msra.mxu0 %v11718_v54  ;;  %10177 = vmatprep.mubr.f32.mxu0 %v16673_v14  ;;  %v7691_v54 = vld [vmem:[%s16482_s3 + $0x998] sm:$0xff] }
 0x32e   : > { %11723 = vmatprep.subr.bf16.mxu0 %v11722_v20  ;;  %v11734_v3 = vpack.c.bf16 %v7691_v54, %v7690_v30  ;;  %v7695_v14 = vld [vmem:[%s16482_s3 + $0x9b8] sm:$0xff]  ;;  %v16677_v30 = vld [vmem:[#allocation34_spill] sm:$0xff] }
 0x32f   : > { %v11742_v7 = vpack.c.bf16 %v7695_v14, %v7694_v29  ;;  %v7700_v29 = vld [vmem:[%s16482_s3 + $0x9e0] sm:$0xff] }
 0x331   : > { %11725 = vmatpush3.bf16.msra.mxu0 %v11722_v20  ;;  %v16674_v20 = vld [vmem:[#allocation31_spill] sm:$0xff] }
 0x332   : > { %11727 = vmatprep.subr.bf16.mxu0 %v11726_v44 }
 0x335   : > { %11729 = vmatpush3.bf16.msra.mxu0 %v11726_v44  ;;  %v16676_v44 = vld [vmem:[#allocation33_spill] sm:$0xff] }
 0x336   : > { %11731 = vmatprep.subr.bf16.mxu0 %v11730_v25 }
 0x338   : > { %10178 = vmatmul.mubr.f32.vlgmr.msra.gmra.mrb[16].mxu0 %v16674_v20  ;;  %v16678_v20 = vrot.slane %v13824_v58, 7 }
 0x339   : > { %10180 = vmatprep.mubr.f32.mxu0 %v16675_v60  ;;  %11733 = vmatpush3.bf16.msra.mxu0 %v11730_v25  ;;  %v7697_v25 = vld [vmem:[%s16482_s3 + $0x9c8] sm:$0xff] }
 0x33a   : > { %11735 = vmatprep.subr.bf16.mxu0 %v11734_v3  ;;  %v11746_v54 = vpack.c.bf16 %v7697_v25, %v7696_v10  ;;  %v7703_v10 = vld [vmem:[%s16482_s3 + $0x9f8] sm:$0xff] }
 0x33c   : > { %10181 = vmatmul.mubr.f32.gmra.mrb[18].mxu0 %v16676_v44 }
 0x33d   : > { %10183 = vmatprep.mubr.f32.mxu0 %v14273_v38  ;;  %11737 = vmatpush3.bf16.msra.mxu0 %v11734_v3  ;;  %v4447_v38 = vrot.slane %v13850_v50, 7  ;;  %v7698_v3 = vld [vmem:[%s16482_s3 + $0x9d0] sm:$0xff] }
 0x33e   : > { %11739 = vmatprep.subr.bf16.mxu0 %v11738_v55 }
 0x33f   : > { %v4448_v60 = vsel %vm2812_vm7, %v16678_v20, %v4447_v38 }
 0x340   : > { %10184 = vmatmul.mubr.f32.gmra.mrb[20].mxu0 %v16677_v30  ;;  %v7704_v30 = vld [vmem:[%s16482_s3 + $0xa00] sm:$0xff] }
 0x341   : > { %10186 = vmatprep.mubr.f32.mxu0 %v14289_v45  ;;  %11741 = vmatpush3.bf16.msra.mxu0 %v11738_v55  ;;  %v11750_v45 = vpack.c.bf16 %v7699_v17, %v7698_v3  ;;  %v4451_v55 = vrot.slane %v16650_v47, 7  ;;  %v7706_v3 = vld [vmem:[%s16482_s3 + $0xa10] sm:$0xff] }
 0x342   : > { %11743 = vmatprep.subr.bf16.mxu0 %v11742_v7 }
 0x343   : > { %v4452_v44 = vsel %vm2812_vm7, %v4449_v18, %v4451_v55  ;;  %v7711_v55 = vld [vmem:[%s16482_s3 + $0xa38] sm:$0xff] }
 0x344   : > { %10187 = vmatmul.mubr.f32.gmra.mrb[22].mxu0 %v14300_v5  ;;  %v7701_v5 = vld [vmem:[%s16482_s3 + $0x9e8] sm:$0xff] }
 0x345   : > { %10189 = vmatprep.mubr.f32.mxu0 %v14306_v39  ;;  %11745 = vmatpush3.bf16.msra.mxu0 %v11742_v7  ;;  %v4450_v39 = vsel %vm2812_vm7, %v4447_v38, %v4449_v18  ;;  %v11754_v14 = vpack.c.bf16 %v7701_v5, %v7700_v29  ;;  %v7702_v7 = vld [vmem:[%s16482_s3 + $0x9f0] sm:$0xff]  ;;  %v7708_v18 = vld [vmem:[%s16482_s3 + $0xa20] sm:$0xff] }
 0x346   : > { %11747 = vmatprep.subr.bf16.mxu0 %v11746_v54  ;;  %v11758_v25 = vpack.c.bf16 %v7703_v10, %v7702_v7  ;;  %v7712_v5 = vld [vmem:[%s16482_s3 + $0xa40] sm:$0xff]  ;;  %v7715_v7 = vld [vmem:[%s16482_s3 + $0xa58] sm:$0xff] }
 0x348   : > { %10190 = vmatmul.mubr.f32.gmra.mrb[24].mxu0 %v4448_v60  ;;  %v7710_v60 = vld [vmem:[%s16482_s3 + $0xa30] sm:$0xff] }
 0x349   : > { %10192 = vmatprep.mubr.f32.mxu0 %v4450_v39  ;;  %11749 = vmatpush3.bf16.msra.mxu0 %v11746_v54  ;;  %v7705_v54 = vld [vmem:[%s16482_s3 + $0xa08] sm:$0xff]  ;;  %v11774_v29 = vpack.c.bf16 %v7711_v55, %v7710_v60  ;;  %v7724_v55 = vld [vmem:[%s16482_s3 + $0xaa0] sm:$0xff] }
 0x34a   : > { %11751 = vmatprep.subr.bf16.mxu0 %v11750_v45  ;;  %v11762_v38 = vpack.c.bf16 %v7705_v54, %v7704_v30  ;;  %v7713_v39 = vld [vmem:[%s16482_s3 + $0xa48] sm:$0xff] }
 0x34b   : > { %v7717_v30 = vld [vmem:[%s16482_s3 + $0xa68] sm:$0xff] }
 0x34c   : > { %10193 = vmatmul.mubr.f32.gmra.mrb[26].mxu0 %v4452_v44  ;;  %v7714_v44 = vld [vmem:[%s16482_s3 + $0xa50] sm:$0xff] }
 0x34d   : > { %11753 = vmatpush3.bf16.msra.mxu0 %v11750_v45  ;;  %10227 = vmatprep.mubr.f32.mxu0 %v13426_v42  ;;  %v7707_v42 = vld [vmem:[%s16482_s3 + $0xa18] sm:$0xff]  ;;  %v7709_v45 = vld [vmem:[%s16482_s3 + $0xa28] sm:$0xff]  ;;  %v11782_v10 = vpack.c.bf16 %v7715_v7, %v7714_v44 }
 0x34e   : > { %11755 = vmatprep.subr.bf16.mxu0 %v11754_v14  ;;  %v11766_v17 = vpack.c.bf16 %v7707_v42, %v7706_v3  ;;  %v11770_v20 = vpack.c.bf16 %v7709_v45, %v7708_v18  ;;  %v7719_v3 = vld [vmem:[%s16482_s3 + $0xa78] sm:$0xff]  ;;  %v7721_v18 = vld [vmem:[%s16482_s3 + $0xa88] sm:$0xff] }
 0x34f   : > { %v7729_v44 = vld [vmem:[%s16482_s3 + $0xac8] sm:$0xff]  ;;  %v7731_v7 = vld [vmem:[%s16482_s3 + $0xad8] sm:$0xff] }
 0x351   : > { %11757 = vmatpush3.bf16.msra.mxu0 %v11754_v14  ;;  %v11778_v14 = vpack.c.bf16 %v7713_v39, %v7712_v5  ;;  %v7726_v39 = vld [vmem:[%s16482_s3 + $0xab0] sm:$0xff] }
 0x352   : > { %11759 = vmatprep.subr.bf16.mxu0 %v11758_v25 }
 0x355   : > { %11761 = vmatpush3.bf16.msra.mxu0 %v11758_v25  ;;  %v7716_v25 = vld [vmem:[%s16482_s3 + $0xa60] sm:$0xff] }
 0x356   : > { %11763 = vmatprep.subr.bf16.mxu0 %v11762_v38  ;;  %v11786_v54 = vpack.c.bf16 %v7717_v30, %v7716_v25  ;;  %v16679_v25 = vld [vmem:[#allocation5_spill] sm:$0xff]  ;;  %v7734_v30 = vld [vmem:[%s16482_s3 + $0xaf0] sm:$0xff] }
 0x358   : > { %10228 = vmatmul.mubr.f32.vlgmr.msra.gmra.mrb[16].mxu0 %v13462_v2 }
 0x359   : > { %10230 = vmatprep.mubr.f32.mxu0 %v13455_v26  ;;  %11765 = vmatpush3.bf16.msra.mxu0 %v11762_v38  ;;  %v7718_v38 = vld [vmem:[%s16482_s3 + $0xa70] sm:$0xff] }
 0x35a   : > { %11767 = vmatprep.subr.bf16.mxu0 %v11766_v17  ;;  %v11790_v42 = vpack.c.bf16 %v7719_v3, %v7718_v38  ;;  %v5661_v38 = vld [vmem:[%s16484_s5] sm:$0xff]  ;;  %v5662_v3 = vld [vmem:[%s16484_s5 + $0x8] sm:$0xff] }
 0x35c   : > { %10231 = vmatmul.mubr.f32.gmra.mrb[18].mxu0 %v13499_v23 }
 0x35d   : > { %10233 = vmatprep.mubr.f32.mxu0 %v13490_v22  ;;  %11769 = vmatpush3.bf16.msra.mxu0 %v11766_v17  ;;  %v7720_v17 = vld [vmem:[%s16482_s3 + $0xa80] sm:$0xff] }
 0x35e   : > { %11771 = vmatprep.subr.bf16.mxu0 %v11770_v20  ;;  %v11794_v45 = vpack.c.bf16 %v7721_v18, %v7720_v17  ;;  %v11923_v17 = vpack.c.bf16 %v5662_v3, %v5661_v38  ;;  %v5664_v18 = vld [vmem:[%s16484_s5 + $0x18] sm:$0xff]  ;;  %v7748_v3 = vld [vmem:[%s16482_s3 + $0xb60] sm:$0xff] }
 0x360   : > { %10234 = vmatmul.mubr.f32.gmra.mrb[20].mxu0 %v13537_v52 }
 0x361   : > { %10236 = vmatprep.mubr.f32.mxu0 %v13528_v59  ;;  %11773 = vmatpush3.bf16.msra.mxu0 %v11770_v20  ;;  %v7722_v20 = vld [vmem:[%s16482_s3 + $0xa90] sm:$0xff] }
 0x362   : > { %11775 = vmatprep.subr.bf16.mxu0 %v11774_v29 }
 0x364   : > { %10237 = vmatmul.mubr.f32.gmra.mrb[22].mxu0 %v13581_v19 }
 0x365   : > { %10239 = vmatprep.mubr.f32.mxu0 %v13824_v58  ;;  %11777 = vmatpush3.bf16.msra.mxu0 %v11774_v29  ;;  %v7725_v29 = vld [vmem:[%s16482_s3 + $0xaa8] sm:$0xff] }
 0x366   : > { %11779 = vmatprep.subr.bf16.mxu0 %v11778_v14  ;;  %v11802_v5 = vpack.c.bf16 %v7725_v29, %v7724_v55  ;;  %v5665_v55 = vld [vmem:[%s16484_s5 + $0x20] sm:$0xff]  ;;  %v5666_v29 = vld [vmem:[%s16484_s5 + $0x28] sm:$0xff] }
 0x368   : > { %10240 = vmatmul.mubr.f32.gmra.mrb[24].mxu0 %v13850_v50 }
 0x369   : > { %10242 = vmatprep.mubr.f32.mxu0 %v13876_v40  ;;  %11781 = vmatpush3.bf16.msra.mxu0 %v11778_v14  ;;  %v7727_v14 = vld [vmem:[%s16482_s3 + $0xab8] sm:$0xff] }
 0x36a   : > { %11783 = vmatprep.subr.bf16.mxu0 %v11782_v10 }
 0x36c   : > { %10243 = vmatmul.mubr.f32.gmra.mrb[26].mxu0 %v16650_v47 }
 0x36d   : > { %11785 = vmatpush3.bf16.msra.mxu0 %v11782_v10  ;;  %10277 = vmatprep.mubr.f32.mxu0 %v13462_v2  ;;  %v7723_v2 = vld [vmem:[%s16482_s3 + $0xa98] sm:$0xff]  ;;  %v7733_v10 = vld [vmem:[%s16482_s3 + $0xae8] sm:$0xff] }
 0x36e   : > { %11787 = vmatprep.subr.bf16.mxu0 %v11786_v54  ;;  %v11798_v60 = vpack.c.bf16 %v7723_v2, %v7722_v20  ;;  %v12764_v20 = vmov 0.0|0.0   ;;  %v7736_v2 = vld [vmem:[%s16482_s3 + $0xb00] sm:$0xff] }
 0x36f   : > { %11922 = vmatprep.subr.bf16.mxu1 %v12764_v20 }
 0x370   : > { %11924 = vmatpush3.bf16.msra.mxu1 %v11923_v17 }
 0x371   : > { %11789 = vmatpush3.bf16.msra.mxu0 %v11786_v54  ;;  %v7735_v54 = vld [vmem:[%s16482_s3 + $0xaf8] sm:$0xff]  ;;  %11925 = vmatprep.subr.bf16.mxu1 %v12764_v20 }
 0x372   : > { %11791 = vmatprep.subr.bf16.mxu0 %v11790_v42 }
 0x375   : > { %11793 = vmatpush3.bf16.msra.mxu0 %v11790_v42  ;;  %v5663_v42 = vld [vmem:[%s16484_s5 + $0x10] sm:$0xff] }
 0x376   : > { %11795 = vmatprep.subr.bf16.mxu0 %v11794_v45 }
 0x378   : > { %10278 = vmatmul.mubr.f32.vlgmr.msra.gmra.mrb[16].mxu0 %v13455_v26  ;;  %v11806_v26 = vpack.c.bf16 %v7727_v14, %v7726_v39  ;;  %v7738_v39 = vld [vmem:[%s16482_s3 + $0xb10] sm:$0xff]  ;;  %v7739_v14 = vld [vmem:[%s16482_s3 + $0xb18] sm:$0xff] }
 0x379   : > { %10280 = vmatprep.mubr.f32.mxu0 %v13499_v23  ;;  %11797 = vmatpush3.bf16.msra.mxu0 %v11794_v45  ;;  %v7728_v23 = vld [vmem:[%s16482_s3 + $0xac0] sm:$0xff]  ;;  %v11822_v45 = vpack.c.bf16 %v7735_v54, %v7734_v30  ;;  %v12765_v54 = vmov 0.0  }
 0x37a   : > { %11799 = vmatprep.subr.bf16.mxu0 %v11798_v60  ;;  %v15211_v38 = vrot.slane %v12765_v54, 1  ;;  %10527 = vmatprep.mubr.msk.f32.mxu1 %vm12766_vm8, %v12765_v54 }
 0x37c   : > { %10281 = vmatmul.mubr.f32.gmra.mrb[18].mxu0 %v13490_v22  ;;  %v11810_v22 = vpack.c.bf16 %v7729_v44, %v7728_v23  ;;  %v11830_v23 = vpack.c.bf16 %v7739_v14, %v7738_v39  ;;  %v7740_v44 = vld [vmem:[%s16482_s3 + $0xb20] sm:$0xff]  ;;  %v7757_v14 = vld [vmem:[%s16482_s3 + $0xba8] sm:$0xff] }
 0x37d   : > { %10283 = vmatprep.mubr.f32.mxu0 %v13537_v52  ;;  %11801 = vmatpush3.bf16.msra.mxu0 %v11798_v60  ;;  %v7730_v52 = vld [vmem:[%s16482_s3 + $0xad0] sm:$0xff]  ;;  %v7737_v60 = vld [vmem:[%s16482_s3 + $0xb08] sm:$0xff]  ;;  %v7756_v39 = vld [vmem:[%s16482_s3 + $0xba0] sm:$0xff] }
 0x37e   : > { %11803 = vmatprep.subr.bf16.mxu0 %v11802_v5 }
 0x380   : > { %10284 = vmatmul.mubr.f32.gmra.mrb[20].mxu0 %v13528_v59  ;;  %v11814_v59 = vpack.c.bf16 %v7731_v7, %v7730_v52  ;;  %v7742_v7 = vld [vmem:[%s16482_s3 + $0xb30] sm:$0xff] }
 0x381   : > { %10286 = vmatprep.mubr.f32.mxu0 %v13581_v19  ;;  %11805 = vmatpush3.bf16.msra.mxu0 %v11802_v5  ;;  %v7732_v19 = vld [vmem:[%s16482_s3 + $0xae0] sm:$0xff]  ;;  %v11826_v5 = vpack.c.bf16 %v7737_v60, %v7736_v2 }
 0x382   : > { %11807 = vmatprep.subr.bf16.mxu0 %v11806_v26  ;;  %v7752_v60 = vld [vmem:[%s16482_s3 + $0xb80] sm:$0xff] }
 0x384   : > { %10287 = vmatmul.mubr.f32.gmra.mrb[22].mxu0 %v13824_v58  ;;  %v15129_v58 = vmax.f32 %v16679_v25, 0.0  ;;  %v7747_v25 = vld [vmem:[%s16482_s3 + $0xb58] sm:$0xff] }
 0x385   : > { %10289 = vmatprep.mubr.f32.mxu0 %v13850_v50  ;;  %11809 = vmatpush3.bf16.msra.mxu0 %v11806_v26  ;;  %v11818_v50 = vpack.c.bf16 %v7733_v10, %v7732_v19  ;;  %v11929_v26 = vpack.c.bf16 %v5666_v29, %v5665_v55  ;;  %v7745_v19 = vld [vmem:[%s16482_s3 + $0xb48] sm:$0xff]  ;;  %v7746_v10 = vld [vmem:[%s16482_s3 + $0xb50] sm:$0xff] }
 0x386   : > { %11811 = vmatprep.subr.bf16.mxu0 %v11810_v22  ;;  %v7754_v29 = vld [vmem:[%s16482_s3 + $0xb90] sm:$0xff] }
 0x388   : > { %10290 = vmatmul.mubr.f32.gmra.mrb[24].mxu0 %v13876_v40 }
 0x389   : > { %10292 = vmatprep.mubr.f32.mxu0 %v16650_v47  ;;  %11813 = vmatpush3.bf16.msra.mxu0 %v11810_v22  ;;  %v7741_v22 = vld [vmem:[%s16482_s3 + $0xb28] sm:$0xff] }
 0x38a   : > { %11815 = vmatprep.subr.bf16.mxu0 %v11814_v59  ;;  %v11834_v52 = vpack.c.bf16 %v7741_v22, %v7740_v44  ;;  %v7759_v44 = vld [vmem:[%s16482_s3 + $0xbb8] sm:$0xff]  ;;  %v7761_v22 = vld [vmem:[%s16482_s3 + $0xbc8] sm:$0xff] }
 0x38c   : > { %10293 = vmatmul.mubr.f32.gmra.mrb[26].mxu0 %v15129_v58 }
 0x38d   : > { %11817 = vmatpush3.bf16.msra.mxu0 %v11814_v59  ;;  %10327 = vmatprep.mubr.f32.mxu0 %v13517_v21  ;;  %v11926_v21 = vpack.c.bf16 %v5664_v18, %v5663_v42  ;;  %v7743_v59 = vld [vmem:[%s16482_s3 + $0xb38] sm:$0xff]  ;;  %v7750_v18 = vld [vmem:[%s16482_s3 + $0xb70] sm:$0xff] }
 0x38e   : > { %11819 = vmatprep.subr.bf16.mxu0 %v11818_v50 }
 0x38f   : > { %11927 = vmatpush3.bf16.msra.mxu1 %v11926_v21  ;;  %v7753_v21 = vld [vmem:[%s16482_s3 + $0xb88] sm:$0xff] }
 0x390   : > { %11928 = vmatprep.subr.bf16.mxu1 %v12764_v20  ;;  %v11858_v55 = vpack.c.bf16 %v7753_v21, %v7752_v60  ;;  %v7779_v60 = vld [vmem:[%s16482_s3 + $0xc58] sm:$0xff]  ;;  %v5248_v21 = vrot.slane %v15129_v58, 3 }
 0x391   : > { %11821 = vmatpush3.bf16.msra.mxu0 %v11818_v50  ;;  %v4922_v50 = vrot.slane %v15129_v58, 1 }
 0x392   : > { %11823 = vmatprep.subr.bf16.mxu0 %v11822_v45 }
 0x393   : > { %11930 = vmatpush3.bf16.msra.mxu1 %v11929_v26  ;;  %v4925_v17 = vsel %vm1389_vm1, %v4922_v50, %v15211_v38  ;;  %v11866_v26 = vpack.c.bf16 %v7757_v14, %v7756_v39  ;;  %v7782_v39 = vld [vmem:[%s16482_s3 + $0xc70] sm:$0xff]  ;;  %v7783_v14 = vld [vmem:[%s16482_s3 + $0xc78] sm:$0xff] }
 0x394   : > { %11931 = vmatprep.subr.bf16.mxu1 %v12764_v20 }
 0x395   : > { %11825 = vmatpush3.bf16.msra.mxu0 %v11822_v45  ;;  %v7751_v45 = vld [vmem:[%s16482_s3 + $0xb78] sm:$0xff] }
 0x396   : > { %11827 = vmatprep.subr.bf16.mxu0 %v11826_v5  ;;  %v11854_v2 = vpack.c.bf16 %v7751_v45, %v7750_v18  ;;  %v7775_v18 = vld [vmem:[%s16482_s3 + $0xc38] sm:$0xff]  ;;  %v7777_v45 = vld [vmem:[%s16482_s3 + $0xc48] sm:$0xff] }
 0x398   : > { %10328 = vmatmul.mubr.f32.vlgmr.msra.gmra.mrb[16].mxu0 %v13545_v24  ;;  %v11838_v24 = vpack.c.bf16 %v7743_v59, %v7742_v7  ;;  %v5085_v7 = vrot.slane %v15129_v58, 2  ;;  %v7764_v59 = vld [vmem:[%s16482_s3 + $0xbe0] sm:$0xff] }
 0x399   : > { %10330 = vmatprep.mubr.f32.mxu0 %v13548_v62  ;;  %11829 = vmatpush3.bf16.msra.mxu0 %v11826_v5  ;;  %v7744_v62 = vld [vmem:[%s16482_s3 + $0xb40] sm:$0xff] }
 0x39a   : > { %11831 = vmatprep.subr.bf16.mxu0 %v11830_v23 }
 0x39c   : > { %10331 = vmatmul.mubr.f32.gmra.mrb[18].mxu0 %v13589_v0  ;;  %v11842_v0 = vpack.c.bf16 %v7745_v19, %v7744_v62  ;;  %v16681_v62 = vld [vmem:[#allocation7_spill] sm:$0xff] }
 0x39d   : > { %10333 = vmatprep.mubr.f32.mxu0 %v13592_v13  ;;  %11833 = vmatpush3.bf16.msra.mxu0 %v11830_v23  ;;  %v4920_v13 = vrot.slane %v16650_v47, 1  ;;  %v7758_v23 = vld [vmem:[%s16482_s3 + $0xbb0] sm:$0xff] }
 0x39e   : > { %11835 = vmatprep.subr.bf16.mxu0 %v11834_v52 }
 0x3a0   : > { %10334 = vmatmul.mubr.f32.gmra.mrb[20].mxu0 %v13639_v12  ;;  %v11846_v12 = vpack.c.bf16 %v7747_v25, %v7746_v10  ;;  %v7767_v10 = vld [vmem:[%s16482_s3 + $0xbf8] sm:$0xff] }
 0x3a1   : > { %10336 = vmatprep.mubr.f32.mxu0 %v14485_v41  ;;  %11837 = vmatpush3.bf16.msra.mxu0 %v11834_v52  ;;  %v16680_v41 = vrot.slane %v13876_v40, 1  ;;  %v7763_v52 = vld [vmem:[%s16482_s3 + $0xbd8] sm:$0xff] }
 0x3a2   : > { %11839 = vmatprep.subr.bf16.mxu0 %v11838_v24 }
 0x3a3   : > { %v4921_v30 = vsel %vm1389_vm1, %v16680_v41, %v4920_v13 }
 0x3a4   : > { %10337 = vmatmul.mubr.f32.gmra.mrb[22].mxu0 %v14496_v49  ;;  %v7749_v49 = vld [vmem:[%s16482_s3 + $0xb68] sm:$0xff] }
 0x3a5   : > { %10339 = vmatprep.mubr.f32.mxu0 %v14506_v15  ;;  %11841 = vmatpush3.bf16.msra.mxu0 %v11838_v24  ;;  %v4923_v15 = vsel %vm1389_vm1, %v4920_v13, %v4922_v50  ;;  %v11850_v42 = vpack.c.bf16 %v7749_v49, %v7748_v3  ;;  %v7765_v24 = vld [vmem:[%s16482_s3 + $0xbe8] sm:$0xff]  ;;  %v7766_v13 = vld [vmem:[%s16482_s3 + $0xbf0] sm:$0xff]  ;;  %v7768_v50 = vld [vmem:[%s16482_s3 + $0xc00] sm:$0xff] }
 0x3a6   : > { %11843 = vmatprep.subr.bf16.mxu0 %v11842_v0  ;;  %v11886_v25 = vpack.c.bf16 %v7767_v10, %v7766_v13  ;;  %v7772_v49 = vld [vmem:[%s16482_s3 + $0xc20] sm:$0xff] }
 0x3a7   : > { %v16689_v10 = vld [vmem:[#allocation36_spill] sm:$0xff] }
 0x3a8   : > { %10340 = vmatmul.mubr.f32.gmra.mrb[24].mxu0 %v4921_v30  ;;  %v7770_v30 = vld [vmem:[%s16482_s3 + $0xc10] sm:$0xff] }
 0x3a9   : > { %10342 = vmatprep.mubr.f32.mxu0 %v4923_v15  ;;  %11845 = vmatpush3.bf16.msra.mxu0 %v11842_v0  ;;  %v7773_v15 = vld [vmem:[%s16482_s3 + $0xc28] sm:$0xff] }
 0x3aa   : > { %11847 = vmatprep.subr.bf16.mxu0 %v11846_v12 }
 0x3ac   : > { %10343 = vmatmul.mubr.f32.gmra.mrb[26].mxu0 %v4925_v17  ;;  %v7774_v17 = vld [vmem:[%s16482_s3 + $0xc30] sm:$0xff] }
 0x3ad   : > { %11849 = vmatpush3.bf16.msra.mxu0 %v11846_v12  ;;  %10377 = vmatprep.mubr.f32.mxu0 %v13944_v51  ;;  %v7755_v51 = vld [vmem:[%s16482_s3 + $0xb98] sm:$0xff]  ;;  %v7769_v12 = vld [vmem:[%s16482_s3 + $0xc08] sm:$0xff] }
 0x3ae   : > { %11851 = vmatprep.subr.bf16.mxu0 %v11850_v42  ;;  %v11862_v5 = vpack.c.bf16 %v7755_v51, %v7754_v29  ;;  %v11890_v41 = vpack.c.bf16 %v7769_v12, %v7768_v50  ;;  %v5250_v29 = vrot.slane %v12765_v54, 3  ;;  %v7780_v51 = vld [vmem:[%s16482_s3 + $0xc60] sm:$0xff] }
 0x3b1   : > { %11853 = vmatpush3.bf16.msra.mxu0 %v11850_v42  ;;  %v11898_v42 = vpack.c.bf16 %v7773_v15, %v7772_v49 }
 0x3b2   : > { %11855 = vmatprep.subr.bf16.mxu0 %v11854_v2 }
 0x3b5   : > { %11857 = vmatpush3.bf16.msra.mxu0 %v11854_v2  ;;  %v7778_v2 = vld [vmem:[%s16482_s3 + $0xc50] sm:$0xff] }
 0x3b6   : > { %11859 = vmatprep.subr.bf16.mxu0 %v11858_v55 }
 0x3b8   : > { %10378 = vmatmul.mubr.f32.vlgmr.msra.gmra.mrb[16].mxu0 %v13957_v33  ;;  %v11870_v33 = vpack.c.bf16 %v7759_v44, %v7758_v23  ;;  %v16684_v23 = vld [vmem:[#allocation12_spill] sm:$0xff]  ;;  %v16685_v44 = vld [vmem:[#allocation10_spill] sm:$0xff] }
 0x3b9   : > { %10380 = vmatprep.mubr.f32.mxu0 %v13962_v1  ;;  %11861 = vmatpush3.bf16.msra.mxu0 %v11858_v55  ;;  %v7760_v1 = vld [vmem:[%s16482_s3 + $0xbc0] sm:$0xff] }
 0x3ba   : > { %11863 = vmatprep.subr.bf16.mxu0 %v11862_v5 }
 0x3bc   : > { %10381 = vmatmul.mubr.f32.gmra.mrb[18].mxu0 %v13975_v28  ;;  %v11874_v28 = vpack.c.bf16 %v7761_v22, %v7760_v1  ;;  %v16686_v1 = vld [vmem:[#allocation14_spill] sm:$0xff] }
 0x3bd   : > { %10383 = vmatprep.mubr.f32.mxu0 %v13979_v27  ;;  %11865 = vmatpush3.bf16.msra.mxu0 %v11862_v5  ;;  %v7762_v27 = vld [vmem:[%s16482_s3 + $0xbd0] sm:$0xff] }
 0x3be   : > { %11867 = vmatprep.subr.bf16.mxu0 %v11866_v26  ;;  %v5671_v22 = vld [vmem:[%s16484_s5 + $0x50] sm:$0xff] }
 0x3c0   : > { %10384 = vmatmul.mubr.f32.gmra.mrb[20].mxu0 %v13995_v35  ;;  %v5087_v35 = vrot.slane %v12765_v54, 2 }
 0x3c1   : > { %10386 = vmatprep.mubr.f32.mxu0 %v13863_v6  ;;  %11869 = vmatpush3.bf16.msra.mxu0 %v11866_v26  ;;  %v11878_v6 = vpack.c.bf16 %v7763_v52, %v7762_v27  ;;  %v11918_v26 = vpack.c.bf16 %v7783_v14, %v7782_v39  ;;  %v5672_v27 = vld [vmem:[%s16484_s5 + $0x58] sm:$0xff] }
 0x3c2   : > { %11871 = vmatprep.subr.bf16.mxu0 %v11870_v33  ;;  %v5088_v0 = vsel %vm1694_vm4, %v5085_v7, %v5087_v35  ;;  %v11938_v52 = vpack.c.bf16 %v5672_v27, %v5671_v22  ;;  %v7786_v22 = vld [vmem:[%s16484_s5 + $0x88] sm:$0xff] }
 0x3c4   : > { %10387 = vmatmul.mubr.f32.gmra.mrb[22].mxu0 %v14591_v31  ;;  %v16682_v31 = vrot.slane %v16650_v47, 2 }
 0x3c5   : > { %10389 = vmatprep.mubr.f32.mxu0 %v14597_v37  ;;  %11873 = vmatpush3.bf16.msra.mxu0 %v11870_v33  ;;  %v11882_v37 = vpack.c.bf16 %v7765_v24, %v7764_v59  ;;  %v5411_v33 = vrot.slane %v12765_v54, 4  ;;  %v5675_v59 = vld [vmem:[%s16484_s5 + $0x70] sm:$0xff]  ;;  %v5676_v24 = vld [vmem:[%s16484_s5 + $0x78] sm:$0xff] }
 0x3c6   : > { %11875 = vmatprep.subr.bf16.mxu0 %v11874_v28  ;;  %v5086_v19 = vsel %vm1694_vm4, %v16682_v31, %v5085_v7  ;;  %v5673_v7 = vld [vmem:[%s16484_s5 + $0x60] sm:$0xff] }
 0x3c8   : > { %10390 = vmatmul.mubr.f32.gmra.mrb[24].mxu0 %v16681_v62  ;;  %v11944_v62 = vpack.c.bf16 %v5676_v24, %v5675_v59 }
 0x3c9   : > { %10392 = vmatprep.mubr.f32.mxu0 %v5086_v19  ;;  %11877 = vmatpush3.bf16.msra.mxu0 %v11874_v28  ;;  %v15413_v19 = vld [vmem:[%s16483_s4] ss:$0 sm:$0xff] }
 0x3ca   : > { %11879 = vmatprep.subr.bf16.mxu0 %v11878_v6 }
 0x3cc   : > { %10393 = vmatmul.mubr.f32.gmra.mrb[26].mxu0 %v5088_v0 }
 0x3cd   : > { %11881 = vmatpush3.bf16.msra.mxu0 %v11878_v6  ;;  %10427 = vmatprep.mubr.f32.mxu0 %v13525_v34  ;;  %v7771_v34 = vld [vmem:[%s16482_s3 + $0xc18] sm:$0xff]  ;;  %v5674_v6 = vld [vmem:[%s16484_s5 + $0x68] sm:$0xff] }
 0x3ce   : > { %11883 = vmatprep.subr.bf16.mxu0 %v11882_v37  ;;  %v11894_v3 = vpack.c.bf16 %v7771_v34, %v7770_v30  ;;  %v11941_v35 = vpack.c.bf16 %v5674_v6, %v5673_v7  ;;  %v16690_v34 = vld [vmem:[#allocation37_spill] sm:$0xff]  ;;  %v16696_v7 = vld [vmem:[#allocation43_spill] sm:$0xff] }
 0x3d1   : > { %11885 = vmatpush3.bf16.msra.mxu0 %v11882_v37  ;;  %v16688_v37 = vld [vmem:[#allocation35_spill] sm:$0xff] }
 0x3d2   : > { %11887 = vmatprep.subr.bf16.mxu0 %v11886_v25 }
 0x3d5   : > { %11889 = vmatpush3.bf16.msra.mxu0 %v11886_v25 }
 0x3d6   : > { %11891 = vmatprep.subr.bf16.mxu0 %v11890_v41 }
 0x3d8   : > { %10428 = vmatmul.mubr.f32.vlgmr.msra.gmra.mrb[16].mxu0 %v13563_v43  ;;  %v11902_v43 = vpack.c.bf16 %v7775_v18, %v7774_v17 }
 0x3d9   : > { %10430 = vmatprep.mubr.f32.mxu0 %v13571_v48  ;;  %11893 = vmatpush3.bf16.msra.mxu0 %v11890_v41  ;;  %v7776_v48 = vld [vmem:[%s16482_s3 + $0xc40] sm:$0xff] }
 0x3da   : > { %11895 = vmatprep.subr.bf16.mxu0 %v11894_v3 }
 0x3dc   : > { %10431 = vmatmul.mubr.f32.gmra.mrb[18].mxu0 %v13601_v46  ;;  %v11906_v46 = vpack.c.bf16 %v7777_v45, %v7776_v48 }
 0x3dd   : > { %10433 = vmatprep.mubr.f32.mxu0 %v13616_v32  ;;  %11897 = vmatpush3.bf16.msra.mxu0 %v11894_v3  ;;  %v5246_v32 = vrot.slane %v16650_v47, 3 }
 0x3de   : > { %11899 = vmatprep.subr.bf16.mxu0 %v11898_v42 }
 0x3e0   : > { %10434 = vmatmul.mubr.f32.gmra.mrb[20].mxu0 %v13654_v57  ;;  %v11910_v57 = vpack.c.bf16 %v7779_v60, %v7778_v2  ;;  %v16692_v2 = vld [vmem:[#allocation39_spill] sm:$0xff] }
 0x3e1   : > { %10436 = vmatprep.mubr.f32.mxu0 %v14656_v8  ;;  %11901 = vmatpush3.bf16.msra.mxu0 %v11898_v42  ;;  %v16683_v8 = vrot.slane %v13876_v40, 3  ;;  %v5251_v40 = vsel %vm1886_vm2, %v5248_v21, %v5250_v29  ;;  %v16691_v42 = vld [vmem:[#allocation38_spill] sm:$0xff] }
 0x3e2   : > { %11903 = vmatprep.subr.bf16.mxu0 %v11902_v43 }
 0x3e3   : > { %v5247_v55 = vsel %vm1886_vm2, %v16683_v8, %v5246_v32  ;;  %v16693_v8 = vld [vmem:[#allocation40_spill] sm:$0xff] }
 0x3e4   : > { %10437 = vmatmul.mubr.f32.gmra.mrb[22].mxu0 %v14667_v56  ;;  %v7781_v56 = vld [vmem:[%s16482_s3 + $0xc68] sm:$0xff] }
 0x3e5   : > { %10439 = vmatprep.mubr.f32.mxu0 %v14673_v4  ;;  %11905 = vmatpush3.bf16.msra.mxu0 %v11902_v43  ;;  %v5249_v4 = vsel %vm1886_vm2, %v5246_v32, %v5248_v21  ;;  %v11914_v5 = vpack.c.bf16 %v7781_v56, %v7780_v51 }
 0x3e6   : > { %11907 = vmatprep.subr.bf16.mxu0 %v11906_v46 }
 0x3e8   : > { %10440 = vmatmul.mubr.f32.gmra.mrb[24].mxu0 %v5247_v55 }
 0x3e9   : > { %10442 = vmatprep.mubr.f32.mxu0 %v5249_v4  ;;  %11909 = vmatpush3.bf16.msra.mxu0 %v11906_v46 }
 0x3ea   : > { %11911 = vmatprep.subr.bf16.mxu0 %v11910_v57 }
 0x3ec   : > { %10443 = vmatmul.mubr.f32.gmra.mrb[26].mxu0 %v5251_v40 }
 0x3ed   : > { %11913 = vmatpush3.bf16.msra.mxu0 %v11910_v57  ;;  %10477 = vmatprep.mubr.f32.mxu0 %v13766_v63  ;;  %v5409_v63 = vrot.slane %v15129_v58, 4  ;;  %v5670_v58 = vld [vmem:[%s16484_s5 + $0x48] sm:$0xff] }
 0x3ee   : > { %11915 = vmatprep.subr.bf16.mxu0 %v11914_v5 }
 0x3f1   : > { %11917 = vmatpush3.bf16.msra.mxu0 %v11914_v5 }
 0x3f2   : > { %11919 = vmatprep.subr.bf16.mxu0 %v11918_v26 }
 0x3f5   : > { %11921 = vmatpush3.bf16.msra.mxu0 %v11918_v26  ;;  %v16694_v26 = vld [vmem:[#allocation41_spill] sm:$0xff] }
 0x3f8   : > { %10478 = vmatmul.mubr.f32.vlgmr.msra.gmra.mrb[16].mxu0 %v13778_v36  ;;  %v16687_v36 = vrot.slane %v16650_v47, 4  ;;  %v5669_v47 = vld [vmem:[%s16484_s5 + $0x40] sm:$0xff] }
 0x3f9   : > { %10480 = vmatprep.mubr.f32.mxu0 %v13790_v53  ;;  %v11935_v28 = vpack.c.bf16 %v5670_v58, %v5669_v47  ;;  %v7785_v58 = vld [vmem:[%s16484_s5 + $0x80] sm:$0xff] }
 0x3fa   : > { %v5410_v53 = vsel %vm2078_vm3, %v16687_v36, %v5409_v63 }
 0x3fc   : > { %10481 = vmatmul.mubr.f32.gmra.mrb[18].mxu0 %v13802_v11  ;;  %v5412_v11 = vsel %vm2078_vm3, %v5409_v63, %v5411_v33  ;;  %v16695_v33 = vld [vmem:[#allocation42_spill] sm:$0xff] }
 0x3fd   : > { %10483 = vmatprep.mubr.f32.mxu0 %v16644_v16  ;;  %v5668_v16 = vld [vmem:[%s16484_s5 + $0x38] sm:$0xff] }
 0x400   : > { %10484 = vmatmul.mubr.f32.gmra.mrb[20].mxu0 %v16645_v9 }
 0x401   : > { %10486 = vmatprep.mubr.f32.mxu0 %v16646_v61  ;;  %v5667_v61 = vld [vmem:[%s16484_s5 + $0x30] sm:$0xff] }
 0x402   : > { %v11932_v9 = vpack.c.bf16 %v5668_v16, %v5667_v61 }
 0x404   : > { %10487 = vmatmul.mubr.f32.gmra.mrb[22].mxu0 %v16684_v23  ;;  %11933 = vmatpush3.bf16.msra.mxu1 %v11932_v9 }
 0x405   : > { %10489 = vmatprep.mubr.f32.mxu0 %v16685_v44  ;;  %11934 = vmatprep.subr.bf16.mxu1 %v12764_v20 }
 0x408   : > { %10490 = vmatmul.mubr.f32.gmra.mrb[24].mxu0 %v16686_v1  ;;  %11936 = vmatpush3.bf16.msra.mxu1 %v11935_v28 }
 0x409   : > { %10492 = vmatprep.mubr.f32.mxu0 %v5410_v53  ;;  %11937 = vmatprep.subr.bf16.mxu1 %v12764_v20 }
 0x40c   : > { %10493 = vmatmul.mubr.f32.gmra.mrb[26].mxu0 %v5412_v11  ;;  %11939 = vmatpush3.bf16.msra.mxu1 %v11938_v52 }
 0x40d   : > { %11940 = vmatprep.subr.bf16.mxu1 %v12764_v20 }
 0x410   : > { %11942 = vmatpush3.bf16.msra.mxu1 %v11941_v35 }
 0x411   : > { %11943 = vmatprep.subr.bf16.mxu1 %v12764_v20 }
 0x414   : > { %11945 = vmatpush3.bf16.msra.mxu1 %v11944_v62  ;;  %v16697_v62 = vld [vmem:[#allocation44_spill] sm:$0xff] }
 0x415   : > { %11946 = vmatprep.subr.bf16.mxu1 %v12764_v20 }
 0x4cb   : > { %v10479_v31 = vpop.f32.mrb[16].mxu0 }
 0x4cc   : > { %v12334_v0 = vadd.f32 %v10479_v31, %v16688_v37  ;;  %v5481_v13 = vpop.f32.mrb[17].mxu0 }
 0x4cd   : > { %v12335_v25 = vadd.f32 %v5481_v13, %v16689_v10 }
 0x4ce   : > { %v5560_v50 = vadd.f32 %v12334_v0, %v15413_v19  ;;  %v11947_v0 = vpack.c.bf16 %v7786_v22, %v7785_v58  ;;  %v7793_v58 = vld [vmem:[%s16484_s5 + $0xc0] sm:$0xff]  ;;  %v7794_v22 = vld [vmem:[%s16484_s5 + $0xc8] sm:$0xff] }
 0x4cf   : > { %v5559_v12 = vadd.f32 %v12335_v25, %v15413_v19  ;;  %v10482_v41 = vpop.f32.mrb[18].mxu0 }
 0x4d0   : > { %v5584_v30 = vrot.slane %v5560_v50, 1  ;;  %v12336_v3 = vadd.f32 %v10482_v41, %v16690_v34  ;;  %v5491_v49 = vpop.f32.mrb[19].mxu0  ;;  %v7788_v34 = vld [vmem:[%s16484_s5 + $0x98] sm:$0xff] }
 0x4d1   : > { %v5583_v15 = vrot.slane %v5559_v12, 1  ;;  %v12337_v17 = vadd.f32 %v5491_v49, %v16691_v42  ;;  %v16698_v42 = vld [vmem:[#allocation45_spill] sm:$0xff] }
 0x4d2   : > { %v15422_v18 = vadd.f32 %v12336_v3, %v15413_v19 }
 0x4d3   : > { %v5585_v43 = vsel %vm1389_vm1, %v5583_v15, %v5584_v30  ;;  %v5561_v48 = vadd.f32 %v12337_v17, %v15413_v19  ;;  %v10485_v45 = vpop.f32.mrb[20].mxu0 }
 0x4d4   : > { %v5619_v46 = vmax.f32 %v5559_v12, %v5585_v43  ;;  %v5588_v32 = vrot.slane %v15422_v18, 1  ;;  %v12338_v60 = vadd.f32 %v10485_v45, %v16692_v2  ;;  %v5501_v21 = vpop.f32.mrb[21].mxu0 }
 0x4d5   : > { %v5586_v57 = vrot.slane %v5561_v48, 1  ;;  %v12339_v55 = vadd.f32 %v5501_v21, %v16693_v8 }
 0x4d6   : > { %v5564_v29 = vadd.f32 %v12338_v60, %v15413_v19 }
 0x4d7   : > { %v5587_v51 = vsel %vm1389_vm1, %v5584_v30, %v5586_v57  ;;  %v5589_v56 = vsel %vm1389_vm1, %v5586_v57, %v5588_v32  ;;  %v5563_v4 = vadd.f32 %v12339_v55, %v15413_v19  ;;  %v10488_v5 = vpop.f32.mrb[22].mxu0  ;;  %v7787_v30 = vld [vmem:[%s16484_s5 + $0x90] sm:$0xff]  ;;  %v7789_v55 = vld [vmem:[%s16484_s5 + $0xa0] sm:$0xff] }
 0x4d8   : > { %v5620_v40 = vmax.f32 %v5560_v50, %v5587_v51  ;;  %v5621_v39 = vmax.f32 %v5561_v48, %v5589_v56  ;;  %v5592_v14 = vrot.slane %v5564_v29, 1  ;;  %v12340_v23 = vadd.f32 %v10488_v5, %v16694_v26  ;;  %v5511_v63 = vpop.f32.mrb[23].mxu0  ;;  %v16699_v48 = vld [vmem:[#allocation46_spill] sm:$0xff] }
 0x4d9   : > { %v5590_v44 = vrot.slane %v5563_v4, 1  ;;  %v12341_v1 = vadd.f32 %v5511_v63, %v16695_v33  ;;  %v11950_v60 = vpack.c.bf16 %v7788_v34, %v7787_v30  ;;  %v7804_v30 = vld [vmem:[%s16484_s5 + $0x118] sm:$0xff] }
 0x4da   : > { %v5639_v36 = vrot.slane %v5620_v40, 4  ;;  %v5640_v53 = vrot.slane %v5621_v39, 4  ;;  %v5566_v11 = vadd.f32 %v12340_v23, %v15413_v19 }
 0x4db   : > { %v5591_v61 = vsel %vm1389_vm1, %v5588_v32, %v5590_v44  ;;  %v5593_v16 = vsel %vm1389_vm1, %v5590_v44, %v5592_v14  ;;  %v15439_v9 = vadd.f32 %v12341_v1, %v15413_v19  ;;  %v10491_v47 = vpop.f32.mrb[24].mxu0  ;;  %v7791_v1 = vld [vmem:[%s16484_s5 + $0xb0] sm:$0xff] }
 0x4dc   : > { %v5641_v28 = vsel %vm2078_vm3, %v5639_v36, %v5640_v53  ;;  %v5623_v27 = vmax.f32 %v5563_v4, %v5593_v16  ;;  %v5596_v52 = vrot.slane %v5566_v11, 1  ;;  %v12342_v6 = vadd.f32 %v10491_v47, %v16696_v7  ;;  %v5521_v35 = vpop.f32.mrb[25].mxu0  ;;  %v7792_v36 = vld [vmem:[%s16484_s5 + $0xb8] sm:$0xff]  ;;  %v7795_v7 = vld [vmem:[%s16484_s5 + $0xd0] sm:$0xff] }
 0x4dd   : > { %v5655_v59 = vmax.f32 %v5619_v46, %v5641_v28  ;;  %v5594_v24 = vrot.slane %v15439_v9, 1  ;;  %v12343_v31 = vadd.f32 %v5521_v35, %v16697_v62  ;;  %v5622_v13 = vmax.f32 %v15422_v18, %v5591_v61 }
 0x4de   : > { %v5568_v37 = vadd.f32 %v12342_v6, %v15413_v19  ;;  %v5642_v46 = vrot.slane %v5623_v27, 4  ;;  %v7796_v6 = vld [vmem:[%s16484_s5 + $0xd8] sm:$0xff] }
 0x4df   : > { %v15453_v10 = vmax.f32 %v5655_v59, 0.0  ;;  %v5595_v25 = vsel %vm1389_vm1, %v5592_v14, %v5594_v24  ;;  %v5597_v50 = vsel %vm1389_vm1, %v5594_v24, %v5596_v52  ;;  %v5567_v12 = vadd.f32 %v12343_v31, %v15413_v19  ;;  %v10494_v41 = vpop.f32.mrb[26].mxu0  ;;  %v7797_v59 = vld [vmem:[%s16484_s5 + $0xe0] sm:$0xff]  ;;  %v7798_v24 = vld [vmem:[%s16484_s5 + $0xe8] sm:$0xff]  ;;  %v7799_v31 = vld [vmem:[%s16484_s5 + $0xf0] sm:$0xff] }
 0x4e0   : > { %v5624_v3 = vmax.f32 %v5564_v29, %v5595_v25  ;;  %v5625_v49 = vmax.f32 %v15439_v9, %v5597_v50  ;;  %v5600_v15 = vrot.slane %v5568_v37, 1  ;;  %v12344_v17 = vadd.f32 %v10494_v41, %v16698_v42  ;;  %v5531_v18 = vpop.f32.mrb[27].mxu0  ;;  %v7790_v29 = vld [vmem:[%s16484_s5 + $0xa8] sm:$0xff]  ;;  %v7803_v41 = vld [vmem:[%s16484_s5 + $0x110] sm:$0xff] }
 0x4e1   : > { %v5598_v43 = vrot.slane %v5567_v12, 1  ;;  %v12345_v45 = vadd.f32 %v5531_v18, %v16699_v48  ;;  %10528 = vmatmul.mubr.f32.vlgmr.msra.gmra.mrb[68].mxu1 %v15453_v10  ;;  %v11953_v23 = vpack.c.bf16 %v7790_v29, %v7789_v55  ;;  %v11956_v9 = vpack.c.bf16 %v7792_v36, %v7791_v1  ;;  %v7802_v25 = vld [vmem:[%s16484_s5 + $0x108] sm:$0xff]  ;;  %v7807_v42 = vld [vmem:[%s16484_s5 + $0x130] sm:$0xff]  ;;  %v7816_v55 = vld [vmem:[%s16484_s5 + $0x178] sm:$0xff] }
 0x4e2   : > { %v5643_v32 = vrot.slane %v5624_v3, 4  ;;  %v5570_v2 = vadd.f32 %v12344_v17, %v15413_v19  ;;  %11948 = vmatpush3.bf16.msra.mxu1 %v11947_v0  ;;  %10562 = vmatprep.mubr.msk.f32.mxu1 %vm12766_vm8, %v12765_v54  ;;  %v11962_v35 = vpack.c.bf16 %v7796_v6, %v7795_v7  ;;  %v11965_v62 = vpack.c.bf16 %v7798_v24, %v7797_v59  ;;  %v7805_v3 = vld [vmem:[%s16484_s5 + $0x120] sm:$0xff]  ;;  %v7808_v17 = vld [vmem:[%s16484_s5 + $0x138] sm:$0xff]  ;;  %v7810_v48 = vld [vmem:[%s16484_s5 + $0x148] sm:$0xff] }
 0x4e3   : > { %v5599_v21 = vsel %vm1389_vm1, %v5596_v52, %v5598_v43  ;;  %v5601_v57 = vsel %vm1389_vm1, %v5598_v43, %v5600_v15  ;;  %v5569_v8 = vadd.f32 %v12345_v45, %v15413_v19  ;;  %11949 = vmatprep.subr.bf16.mxu1 %v12764_v20  ;;  %v11959_v52 = vpack.c.bf16 %v7794_v22, %v7793_v58  ;;  %v7809_v43 = vld [vmem:[%s16484_s5 + $0x140] sm:$0xff]  ;;  %v7830_v58 = vld [vmem:[%s16484_s5 + $0x1e8] sm:$0xff] }
 0x4e4   : > { %v5626_v51 = vmax.f32 %v5566_v11, %v5599_v21  ;;  %v5627_v56 = vmax.f32 %v5567_v12, %v5601_v57  ;;  %v5604_v4 = vrot.slane %v5570_v2, 1  ;;  %v5644_v5 = vsel %vm2078_vm3, %v5642_v46, %v5643_v32  ;;  %v7811_v46 = vld [vmem:[%s16484_s5 + $0x150] sm:$0xff]  ;;  %v7812_v32 = vld [vmem:[%s16484_s5 + $0x158] sm:$0xff]  ;;  %v7814_v21 = vld [vmem:[%s16484_s5 + $0x168] sm:$0xff] }
 0x4e5   : > { %v5602_v40 = vrot.slane %v5569_v8, 1  ;;  %v15482_v39 = vmax.f32 %v5622_v13, %v5644_v5  ;;  %v7801_v13 = vld [vmem:[%s16484_s5 + $0x100] sm:$0xff]  ;;  %v5766_v12 = vrot.slane %v15453_v10, 2  ;;  %v11974_v34 = vpack.c.bf16 %v7804_v30, %v7803_v41  ;;  %v7842_v30 = vld [vmem:[%s16484_s5 + $0x248] sm:$0xff] }
 0x4e6   : > { %v5645_v14 = vrot.slane %v5626_v51, 4  ;;  %v5646_v19 = vrot.slane %v5627_v56, 4  ;;  %v5606_v26 = vsel %vm1389_vm1, %v5604_v4, %v15211_v38  ;;  %11951 = vmatpush3.bf16.msra.mxu1 %v11950_v60  ;;  %v11971_v50 = vpack.c.bf16 %v7802_v25, %v7801_v13  ;;  %v7813_v60 = vld [vmem:[%s16484_s5 + $0x160] sm:$0xff]  ;;  %v7818_v56 = vld [vmem:[%s16484_s5 + $0x188] sm:$0xff]  ;;  %v7839_v25 = vld [vmem:[%s16484_s5 + $0x230] sm:$0xff] }
 0x4e7   : > { %v5630_v63 = vmax.f32 %v5570_v2, %v5606_v26  ;;  %v5603_v44 = vsel %vm1389_vm1, %v5600_v15, %v5602_v40  ;;  %v5605_v33 = vsel %vm1389_vm1, %v5602_v40, %v5604_v4  ;;  %11952 = vmatprep.subr.bf16.mxu1 %v12764_v20  ;;  %v11980_v18 = vpack.c.bf16 %v7808_v17, %v7807_v42  ;;  %v7817_v51 = vld [vmem:[%s16484_s5 + $0x180] sm:$0xff]  ;;  %v7819_v40 = vld [vmem:[%s16484_s5 + $0x190] sm:$0xff]  ;;  %v7846_v17 = vld [vmem:[%s16484_s5 + $0x268] sm:$0xff] }
 0x4e8   : > { %v5629_v53 = vmax.f32 %v5569_v8, %v5605_v33  ;;  %v5647_v38 = vsel %vm2078_vm3, %v5645_v14, %v5646_v19  ;;  %v5628_v11 = vmax.f32 %v5568_v37, %v5603_v44  ;;  %v7800_v37 = vld [vmem:[%s16484_s5 + $0xf8] sm:$0xff]  ;;  %v11983_v45 = vpack.c.bf16 %v7810_v48, %v7809_v43  ;;  %v7815_v8 = vld [vmem:[%s16484_s5 + $0x170] sm:$0xff]  ;;  %v7821_v26 = vld [vmem:[%s16484_s5 + $0x1a0] sm:$0xff] }
 0x4e9   : > { %v5649_v61 = vrot.slane %v5630_v63, 4  ;;  %v15496_v47 = vmax.f32 %v5625_v49, %v5647_v38  ;;  %v11968_v0 = vpack.c.bf16 %v7800_v37, %v7799_v31  ;;  %v7806_v49 = vld [vmem:[%s16484_s5 + $0x128] sm:$0xff]  ;;  %v11986_v2 = vpack.c.bf16 %v7812_v32, %v7811_v46  ;;  %v7820_v14 = vld [vmem:[%s16484_s5 + $0x198] sm:$0xff]  ;;  %v7823_v44 = vld [vmem:[%s16484_s5 + $0x1b0] sm:$0xff] }
 0x4ea   : > { %v5648_v16 = vrot.slane %v5629_v53, 4  ;;  %11954 = vmatpush3.bf16.msra.mxu1 %v11953_v23  ;;  %v11977_v15 = vpack.c.bf16 %v7806_v49, %v7805_v3  ;;  %v11989_v57 = vpack.c.bf16 %v7814_v21, %v7813_v60  ;;  %v11992_v29 = vpack.c.bf16 %v7816_v55, %v7815_v8  ;;  %v7822_v23 = vld [vmem:[%s16484_s5 + $0x1a8] sm:$0xff]  ;;  %v7824_v33 = vld [vmem:[%s16484_s5 + $0x1b8] sm:$0xff]  ;;  %v7825_v36 = vld [vmem:[%s16484_s5 + $0x1c0] sm:$0xff] }
 0x4eb   : > { %11955 = vmatprep.subr.bf16.mxu1 %v12764_v20  ;;  %v11995_v4 = vpack.c.bf16 %v7818_v56, %v7817_v51  ;;  %v5856_v5 = vrot.slane %v15453_v10, 4  ;;  %v11998_v19 = vpack.c.bf16 %v7820_v14, %v7819_v40  ;;  %v12001_v63 = vpack.c.bf16 %v7822_v23, %v7821_v26  ;;  %v7826_v53 = vld [vmem:[%s16484_s5 + $0x1c8] sm:$0xff]  ;;  %v7833_v6 = vld [vmem:[%s16484_s5 + $0x200] sm:$0xff]  ;;  %v7836_v31 = vld [vmem:[%s16484_s5 + $0x218] sm:$0xff] }
 0x4ec   : > { %v5650_v28 = vsel %vm2078_vm3, %v5648_v16, %v5649_v61  ;;  %v12004_v1 = vpack.c.bf16 %v7824_v33, %v7823_v44  ;;  %v12007_v38 = vpack.c.bf16 %v7826_v53, %v7825_v36  ;;  %v7828_v61 = vld [vmem:[%s16484_s5 + $0x1d8] sm:$0xff]  ;;  %v5946_v24 = vrot.slane %v15453_v10, 6  ;;  %v7837_v10 = vld [vmem:[%s16484_s5 + $0x220] sm:$0xff]  ;;  %v7843_v3 = vld [vmem:[%s16484_s5 + $0x250] sm:$0xff] }
 0x4ed   : > { %v15506_v27 = vmax.f32 %v5628_v11, %v5650_v28  ;;  %v7827_v11 = vld [vmem:[%s16484_s5 + $0x1d0] sm:$0xff]  ;;  %v7841_v41 = vld [vmem:[%s16484_s5 + $0x240] sm:$0xff]  ;;  %v7844_v49 = vld [vmem:[%s16484_s5 + $0x258] sm:$0xff]  ;;  %v15714_v60 = vmax.f32 %v15482_v39, 0.0 }
 0x4ee   : > { %11957 = vmatpush3.bf16.msra.mxu1 %v11956_v9  ;;  %v12010_v16 = vpack.c.bf16 %v7828_v61, %v7827_v11  ;;  %v7829_v9 = vld [vmem:[%s16484_s5 + $0x1e0] sm:$0xff]  ;;  %v7831_v28 = vld [vmem:[%s16484_s5 + $0x1f0] sm:$0xff]  ;;  %v7848_v48 = vld [vmem:[%s16484_s5 + $0x278] sm:$0xff] }
 0x4ef   : > { %11958 = vmatprep.subr.bf16.mxu1 %v12764_v20  ;;  %v12013_v22 = vpack.c.bf16 %v7830_v58, %v7829_v9  ;;  %v7845_v42 = vld [vmem:[%s16484_s5 + $0x260] sm:$0xff]  ;;  %v7847_v43 = vld [vmem:[%s16484_s5 + $0x270] sm:$0xff]  ;;  %v7850_v32 = vld [vmem:[%s16484_s5 + $0x288] sm:$0xff] }
 0x4f0   : > { %v7849_v46 = vld [vmem:[%s16484_s5 + $0x280] sm:$0xff]  ;;  %v7851_v21 = vld [vmem:[%s16484_s5 + $0x290] sm:$0xff]  ;;  %v7854_v55 = vld [vmem:[%s16484_s5 + $0x2a8] sm:$0xff] }
 0x4f1   : > { %v7853_v39 = vld [vmem:[%s16484_s5 + $0x2a0] sm:$0xff]  ;;  %v7855_v51 = vld [vmem:[%s16484_s5 + $0x2b0] sm:$0xff]  ;;  %v7856_v56 = vld [vmem:[%s16484_s5 + $0x2b8] sm:$0xff] }
 0x4f2   : > { %11960 = vmatpush3.bf16.msra.mxu1 %v11959_v52  ;;  %v7832_v52 = vld [vmem:[%s16484_s5 + $0x1f8] sm:$0xff]  ;;  %v7858_v40 = vld [vmem:[%s16484_s5 + $0x2c8] sm:$0xff]  ;;  %v7867_v9 = vld [vmem:[%s16484_s5 + $0x310] sm:$0xff] }
 0x4f3   : > { %11961 = vmatprep.subr.bf16.mxu1 %v12764_v20  ;;  %v12016_v7 = vpack.c.bf16 %v7832_v52, %v7831_v28  ;;  %v7860_v26 = vld [vmem:[%s16484_s5 + $0x2d8] sm:$0xff]  ;;  %v7862_v44 = vld [vmem:[%s16484_s5 + $0x2e8] sm:$0xff]  ;;  %v7869_v28 = vld [vmem:[%s16484_s5 + $0x320] sm:$0xff] }
 0x4f4   : > { %v7864_v36 = vld [vmem:[%s16484_s5 + $0x2f8] sm:$0xff]  ;;  %v7866_v11 = vld [vmem:[%s16484_s5 + $0x308] sm:$0xff] }
 0x4f5   : > { %v7868_v58 = vld [vmem:[%s16484_s5 + $0x318] sm:$0xff]  ;;  %v7870_v52 = vld [vmem:[%s16484_s5 + $0x328] sm:$0xff] }
 0x4f6   : > { %11963 = vmatpush3.bf16.msra.mxu1 %v11962_v35  ;;  %v7834_v35 = vld [vmem:[%s16484_s5 + $0x208] sm:$0xff] }
 0x4f7   : > { %11964 = vmatprep.subr.bf16.mxu1 %v12764_v20  ;;  %v12019_v59 = vpack.c.bf16 %v7834_v35, %v7833_v6  ;;  %v7871_v6 = vld [vmem:[%s16484_s5 + $0x330] sm:$0xff]  ;;  %v7872_v35 = vld [vmem:[%s16484_s5 + $0x338] sm:$0xff] }
 0x4fa   : > { %11966 = vmatpush3.bf16.msra.mxu1 %v11965_v62  ;;  %v7835_v62 = vld [vmem:[%s16484_s5 + $0x210] sm:$0xff] }
 0x4fb   : > { %11967 = vmatprep.subr.bf16.mxu1 %v12764_v20  ;;  %v12022_v37 = vpack.c.bf16 %v7836_v31, %v7835_v62  ;;  %v7874_v62 = vld [vmem:[%s16484_s5 + $0x348] sm:$0xff] }
 0x4fe   : > { %11969 = vmatpush3.bf16.msra.mxu1 %v11968_v0  ;;  %v7838_v0 = vld [vmem:[%s16484_s5 + $0x228] sm:$0xff] }
 0x4ff   : > { %11970 = vmatprep.subr.bf16.mxu1 %v12764_v20  ;;  %v12025_v13 = vpack.c.bf16 %v7838_v0, %v7837_v10  ;;  %v7876_v10 = vld [vmem:[%s16484_s5 + $0x358] sm:$0xff] }
 0x501   : > { %10563 = vmatmul.mubr.f32.vlgmr.msra.gmra.mrb[68].mxu1 %v5766_v12 }
 0x502   : > { %11972 = vmatpush3.bf16.msra.mxu1 %v11971_v50  ;;  %10597 = vmatprep.mubr.msk.f32.mxu1 %vm12766_vm8, %v12765_v54  ;;  %v7840_v50 = vld [vmem:[%s16484_s5 + $0x238] sm:$0xff] }
 0x503   : > { %11973 = vmatprep.subr.bf16.mxu1 %v12764_v20  ;;  %v12028_v12 = vpack.c.bf16 %v7840_v50, %v7839_v25  ;;  %v7878_v25 = vld [vmem:[%s16484_s5 + $0x368] sm:$0xff] }
 0x506   : > { %11975 = vmatpush3.bf16.msra.mxu1 %v11974_v34  ;;  %v12031_v34 = vpack.c.bf16 %v7842_v30, %v7841_v41  ;;  %v7880_v41 = vld [vmem:[%s16484_s5 + $0x378] sm:$0xff] }
 0x507   : > { %11976 = vmatprep.subr.bf16.mxu1 %v12764_v20 }
 0x50a   : > { %11978 = vmatpush3.bf16.msra.mxu1 %v11977_v15  ;;  %v12034_v15 = vpack.c.bf16 %v7844_v49, %v7843_v3  ;;  %v7882_v3 = vld [vmem:[%s16484_s5 + $0x388] sm:$0xff] }
 0x50b   : > { %11979 = vmatprep.subr.bf16.mxu1 %v12764_v20 }
 0x50e   : > { %11981 = vmatpush3.bf16.msra.mxu1 %v11980_v18  ;;  %v12037_v18 = vpack.c.bf16 %v7846_v17, %v7845_v42  ;;  %v7883_v42 = vld [vmem:[%s16484_s5 + $0x390] sm:$0xff]  ;;  %v7884_v17 = vld [vmem:[%s16484_s5 + $0x398] sm:$0xff] }
 0x50f   : > { %11982 = vmatprep.subr.bf16.mxu1 %v12764_v20 }
 0x512   : > { %11984 = vmatpush3.bf16.msra.mxu1 %v11983_v45  ;;  %v12040_v45 = vpack.c.bf16 %v7848_v48, %v7847_v43  ;;  %v7885_v43 = vld [vmem:[%s16484_s5 + $0x3a0] sm:$0xff]  ;;  %v7886_v48 = vld [vmem:[%s16484_s5 + $0x3a8] sm:$0xff] }
 0x513   : > { %11985 = vmatprep.subr.bf16.mxu1 %v12764_v20 }
 0x516   : > { %11987 = vmatpush3.bf16.msra.mxu1 %v11986_v2  ;;  %v12043_v2 = vpack.c.bf16 %v7850_v32, %v7849_v46  ;;  %v7887_v46 = vld [vmem:[%s16484_s5 + $0x3b0] sm:$0xff]  ;;  %v7888_v32 = vld [vmem:[%s16484_s5 + $0x3b8] sm:$0xff] }
 0x517   : > { %11988 = vmatprep.subr.bf16.mxu1 %v12764_v20 }
 0x51a   : > { %11990 = vmatpush3.bf16.msra.mxu1 %v11989_v57  ;;  %v7852_v57 = vld [vmem:[%s16484_s5 + $0x298] sm:$0xff] }
 0x51b   : > { %11991 = vmatprep.subr.bf16.mxu1 %v12764_v20  ;;  %v12046_v8 = vpack.c.bf16 %v7852_v57, %v7851_v21  ;;  %v7889_v21 = vld [vmem:[%s16484_s5 + $0x3c0] sm:$0xff]  ;;  %v7890_v57 = vld [vmem:[%s16484_s5 + $0x3c8] sm:$0xff] }
 0x51e   : > { %11993 = vmatpush3.bf16.msra.mxu1 %v11992_v29  ;;  %v12049_v29 = vpack.c.bf16 %v7854_v55, %v7853_v39  ;;  %v7891_v39 = vld [vmem:[%s16484_s5 + $0x3d0] sm:$0xff]  ;;  %v7892_v55 = vld [vmem:[%s16484_s5 + $0x3d8] sm:$0xff] }
 0x51f   : > { %11994 = vmatprep.subr.bf16.mxu1 %v12764_v20 }
 0x521   : > { %10598 = vmatmul.mubr.f32.vlgmr.msra.gmra.mrb[68].mxu1 %v5856_v5  ;;  %v7857_v5 = vld [vmem:[%s16484_s5 + $0x2c0] sm:$0xff] }
 0x522   : > { %11996 = vmatpush3.bf16.msra.mxu1 %v11995_v4  ;;  %10632 = vmatprep.mubr.msk.f32.mxu1 %vm12766_vm8, %v12765_v54  ;;  %v12052_v4 = vpack.c.bf16 %v7856_v56, %v7855_v51  ;;  %v12055_v14 = vpack.c.bf16 %v7858_v40, %v7857_v5  ;;  %v7893_v51 = vld [vmem:[%s16484_s5 + $0x3e0] sm:$0xff]  ;;  %v7894_v56 = vld [vmem:[%s16484_s5 + $0x3e8] sm:$0xff]  ;;  %v7895_v5 = vld [vmem:[%s16484_s5 + $0x3f0] sm:$0xff] }
 0x523   : > { %11997 = vmatprep.subr.bf16.mxu1 %v12764_v20  ;;  %v7896_v40 = vld [vmem:[%s16484_s5 + $0x3f8] sm:$0xff] }
 0x526   : > { %11999 = vmatpush3.bf16.msra.mxu1 %v11998_v19  ;;  %v7859_v19 = vld [vmem:[%s16484_s5 + $0x2d0] sm:$0xff] }
 0x527   : > { %12000 = vmatprep.subr.bf16.mxu1 %v12764_v20  ;;  %v12058_v23 = vpack.c.bf16 %v7860_v26, %v7859_v19  ;;  %v7897_v19 = vld [vmem:[%s16484_s5 + $0x400] sm:$0xff]  ;;  %v7898_v26 = vld [vmem:[%s16484_s5 + $0x408] sm:$0xff] }
 0x52a   : > { %12002 = vmatpush3.bf16.msra.mxu1 %v12001_v63  ;;  %v7861_v63 = vld [vmem:[%s16484_s5 + $0x2e0] sm:$0xff] }
 0x52b   : > { %12003 = vmatprep.subr.bf16.mxu1 %v12764_v20  ;;  %v12061_v33 = vpack.c.bf16 %v7862_v44, %v7861_v63  ;;  %v6306_v63 = vrot.slane %v15714_v60, 6  ;;  %v7899_v44 = vld [vmem:[%s16484_s5 + $0x410] sm:$0xff] }
 0x52e   : > { %12005 = vmatpush3.bf16.msra.mxu1 %v12004_v1  ;;  %v7863_v1 = vld [vmem:[%s16484_s5 + $0x2f0] sm:$0xff] }
 0x52f   : > { %12006 = vmatprep.subr.bf16.mxu1 %v12764_v20  ;;  %v12064_v53 = vpack.c.bf16 %v7864_v36, %v7863_v1  ;;  %v7902_v36 = vld [vmem:[%s16484_s5 + $0x428] sm:$0xff] }
 0x532   : > { %12008 = vmatpush3.bf16.msra.mxu1 %v12007_v38  ;;  %v7865_v38 = vld [vmem:[%s16484_s5 + $0x300] sm:$0xff] }
 0x533   : > { %12009 = vmatprep.subr.bf16.mxu1 %v12764_v20  ;;  %v12067_v61 = vpack.c.bf16 %v7866_v11, %v7865_v38  ;;  %v7903_v38 = vld [vmem:[%s16484_s5 + $0x430] sm:$0xff]  ;;  %v7904_v11 = vld [vmem:[%s16484_s5 + $0x438] sm:$0xff] }
 0x536   : > { %12011 = vmatpush3.bf16.msra.mxu1 %v12010_v16  ;;  %v6126_v16 = vrot.slane %v15714_v60, 2 }
 0x537   : > { %12012 = vmatprep.subr.bf16.mxu1 %v12764_v20 }
 0x53a   : > { %12014 = vmatpush3.bf16.msra.mxu1 %v12013_v22  ;;  %v12070_v22 = vpack.c.bf16 %v7868_v58, %v7867_v9  ;;  %v7906_v9 = vld [vmem:[%s16484_s5 + $0x448] sm:$0xff] }
 0x53b   : > { %12015 = vmatprep.subr.bf16.mxu1 %v12764_v20 }
 0x53e   : > { %12017 = vmatpush3.bf16.msra.mxu1 %v12016_v7  ;;  %v12073_v7 = vpack.c.bf16 %v7870_v52, %v7869_v28  ;;  %v7908_v28 = vld [vmem:[%s16484_s5 + $0x458] sm:$0xff] }
 0x53f   : > { %12018 = vmatprep.subr.bf16.mxu1 %v12764_v20 }
 0x541   : > { %10633 = vmatmul.mubr.f32.vlgmr.msra.gmra.mrb[68].mxu1 %v5946_v24  ;;  %v7873_v24 = vld [vmem:[%s16484_s5 + $0x340] sm:$0xff] }
 0x542   : > { %12020 = vmatpush3.bf16.msra.mxu1 %v12019_v59  ;;  %10667 = vmatprep.mubr.msk.f32.mxu1 %vm12766_vm8, %v12765_v54  ;;  %v12076_v59 = vpack.c.bf16 %v7872_v35, %v7871_v6  ;;  %v12079_v31 = vpack.c.bf16 %v7874_v62, %v7873_v24  ;;  %v7910_v6 = vld [vmem:[%s16484_s5 + $0x468] sm:$0xff]  ;;  %v7912_v24 = vld [vmem:[%s16484_s5 + $0x478] sm:$0xff] }
 0x543   : > { %12021 = vmatprep.subr.bf16.mxu1 %v12764_v20 }
 0x546   : > { %12023 = vmatpush3.bf16.msra.mxu1 %v12022_v37  ;;  %v7875_v37 = vld [vmem:[%s16484_s5 + $0x350] sm:$0xff] }
 0x547   : > { %12024 = vmatprep.subr.bf16.mxu1 %v12764_v20  ;;  %v12082_v0 = vpack.c.bf16 %v7876_v10, %v7875_v37  ;;  %v7914_v37 = vld [vmem:[%s16484_s5 + $0x488] sm:$0xff] }
 0x54a   : > { %12026 = vmatpush3.bf16.msra.mxu1 %v12025_v13  ;;  %v7877_v13 = vld [vmem:[%s16484_s5 + $0x360] sm:$0xff] }
 0x54b   : > { %12027 = vmatprep.subr.bf16.mxu1 %v12764_v20  ;;  %v12085_v50 = vpack.c.bf16 %v7878_v25, %v7877_v13  ;;  %v7915_v13 = vld [vmem:[%s16484_s5 + $0x490] sm:$0xff]  ;;  %v7916_v25 = vld [vmem:[%s16484_s5 + $0x498] sm:$0xff] }
 0x54e   : > { %12029 = vmatpush3.bf16.msra.mxu1 %v12028_v12  ;;  %v7879_v12 = vld [vmem:[%s16484_s5 + $0x370] sm:$0xff] }
 0x54f   : > { %12030 = vmatprep.subr.bf16.mxu1 %v12764_v20  ;;  %v12088_v30 = vpack.c.bf16 %v7880_v41, %v7879_v12  ;;  %v7918_v12 = vld [vmem:[%s16484_s5 + $0x4a8] sm:$0xff] }
 0x552   : > { %12032 = vmatpush3.bf16.msra.mxu1 %v12031_v34  ;;  %v7881_v34 = vld [vmem:[%s16484_s5 + $0x380] sm:$0xff] }
 0x553   : > { %12033 = vmatprep.subr.bf16.mxu1 %v12764_v20  ;;  %v12091_v49 = vpack.c.bf16 %v7882_v3, %v7881_v34  ;;  %v7920_v34 = vld [vmem:[%s16484_s5 + $0x4b8] sm:$0xff] }
 0x556   : > { %12035 = vmatpush3.bf16.msra.mxu1 %v12034_v15  ;;  %v6216_v15 = vrot.slane %v15714_v60, 4 }
 0x557   : > { %12036 = vmatprep.subr.bf16.mxu1 %v12764_v20 }
 0x55a   : > { %12038 = vmatpush3.bf16.msra.mxu1 %v12037_v18  ;;  %v12094_v18 = vpack.c.bf16 %v7884_v17, %v7883_v42  ;;  %v7923_v17 = vld [vmem:[%s16484_s5 + $0x4d0] sm:$0xff] }
 0x55b   : > { %12039 = vmatprep.subr.bf16.mxu1 %v12764_v20 }
 0x55e   : > { %12041 = vmatpush3.bf16.msra.mxu1 %v12040_v45  ;;  %v12097_v45 = vpack.c.bf16 %v7886_v48, %v7885_v43  ;;  %v7925_v48 = vld [vmem:[%s16484_s5 + $0x4e0] sm:$0xff] }
 0x55f   : > { %12042 = vmatprep.subr.bf16.mxu1 %v12764_v20 }
 0x561   : > { %10668 = vmatmul.mubr.f32.vlgmr.msra.gmra.mrb[68].mxu1 %v15714_v60  ;;  %v7901_v60 = vld [vmem:[%s16484_s5 + $0x420] sm:$0xff] }
 0x562   : > { %12044 = vmatpush3.bf16.msra.mxu1 %v12043_v2  ;;  %10702 = vmatprep.mubr.msk.f32.mxu1 %vm12766_vm8, %v12765_v54  ;;  %v12100_v2 = vpack.c.bf16 %v7888_v32, %v7887_v46  ;;  %v7927_v32 = vld [vmem:[%s16484_s5 + $0x4f0] sm:$0xff] }
 0x563   : > { %12045 = vmatprep.subr.bf16.mxu1 %v12764_v20 }
 0x566   : > { %12047 = vmatpush3.bf16.msra.mxu1 %v12046_v8  ;;  %v12103_v8 = vpack.c.bf16 %v7890_v57, %v7889_v21  ;;  %v7929_v57 = vld [vmem:[%s16484_s5 + $0x500] sm:$0xff] }
 0x567   : > { %12048 = vmatprep.subr.bf16.mxu1 %v12764_v20 }
 0x56a   : > { %12050 = vmatpush3.bf16.msra.mxu1 %v12049_v29  ;;  %v12106_v29 = vpack.c.bf16 %v7892_v55, %v7891_v39 }
 0x56b   : > { %12051 = vmatprep.subr.bf16.mxu1 %v12764_v20 }
 0x56e   : > { %12053 = vmatpush3.bf16.msra.mxu1 %v12052_v4  ;;  %v12109_v4 = vpack.c.bf16 %v7894_v56, %v7893_v51  ;;  %v7932_v51 = vld [vmem:[%s16484_s5 + $0x518] sm:$0xff] }
 0x56f   : > { %12054 = vmatprep.subr.bf16.mxu1 %v12764_v20 }
 0x572   : > { %12056 = vmatpush3.bf16.msra.mxu1 %v12055_v14  ;;  %v12112_v14 = vpack.c.bf16 %v7896_v40, %v7895_v5  ;;  %v7934_v5 = vld [vmem:[%s16484_s5 + $0x528] sm:$0xff] }
 0x573   : > { %12057 = vmatprep.subr.bf16.mxu1 %v12764_v20 }
 0x576   : > { %12059 = vmatpush3.bf16.msra.mxu1 %v12058_v23  ;;  %v12115_v23 = vpack.c.bf16 %v7898_v26, %v7897_v19  ;;  %v7936_v19 = vld [vmem:[%s16484_s5 + $0x538] sm:$0xff] }
 0x577   : > { %12060 = vmatprep.subr.bf16.mxu1 %v12764_v20 }
 0x57a   : > { %12062 = vmatpush3.bf16.msra.mxu1 %v12061_v33  ;;  %v7900_v33 = vld [vmem:[%s16484_s5 + $0x418] sm:$0xff] }
 0x57b   : > { %12063 = vmatprep.subr.bf16.mxu1 %v12764_v20  ;;  %v12118_v1 = vpack.c.bf16 %v7900_v33, %v7899_v44  ;;  %v7939_v33 = vld [vmem:[%s16484_s5 + $0x550] sm:$0xff] }
 0x57e   : > { %12065 = vmatpush3.bf16.msra.mxu1 %v12064_v53  ;;  %v12121_v53 = vpack.c.bf16 %v7902_v36, %v7901_v60  ;;  %v7941_v36 = vld [vmem:[%s16484_s5 + $0x560] sm:$0xff] }
 0x57f   : > { %12066 = vmatprep.subr.bf16.mxu1 %v12764_v20 }
 0x581   : > { %10703 = vmatmul.mubr.f32.vlgmr.msra.gmra.mrb[68].mxu1 %v6126_v16  ;;  %v7905_v16 = vld [vmem:[%s16484_s5 + $0x440] sm:$0xff] }
 0x582   : > { %12068 = vmatpush3.bf16.msra.mxu1 %v12067_v61  ;;  %10737 = vmatprep.mubr.msk.f32.mxu1 %vm12766_vm8, %v12765_v54  ;;  %v12124_v61 = vpack.c.bf16 %v7904_v11, %v7903_v38  ;;  %v12127_v58 = vpack.c.bf16 %v7906_v9, %v7905_v16  ;;  %v7943_v11 = vld [vmem:[%s16484_s5 + $0x570] sm:$0xff]  ;;  %v7945_v9 = vld [vmem:[%s16484_s5 + $0x580] sm:$0xff] }
 0x583   : > { %12069 = vmatprep.subr.bf16.mxu1 %v12764_v20 }
 0x586   : > { %12071 = vmatpush3.bf16.msra.mxu1 %v12070_v22  ;;  %v7907_v22 = vld [vmem:[%s16484_s5 + $0x450] sm:$0xff] }
 0x587   : > { %12072 = vmatprep.subr.bf16.mxu1 %v12764_v20  ;;  %v12130_v52 = vpack.c.bf16 %v7908_v28, %v7907_v22 }
 0x58a   : > { %12074 = vmatpush3.bf16.msra.mxu1 %v12073_v7  ;;  %v7909_v7 = vld [vmem:[%s16484_s5 + $0x460] sm:$0xff] }
 0x58b   : > { %12075 = vmatprep.subr.bf16.mxu1 %v12764_v20  ;;  %v12133_v35 = vpack.c.bf16 %v7910_v6, %v7909_v7  ;;  %v7948_v7 = vld [vmem:[%s16484_s5 + $0x598] sm:$0xff] }
 0x58e   : > { %12077 = vmatpush3.bf16.msra.mxu1 %v12076_v59  ;;  %v7911_v59 = vld [vmem:[%s16484_s5 + $0x470] sm:$0xff] }
 0x58f   : > { %12078 = vmatprep.subr.bf16.mxu1 %v12764_v20  ;;  %v12136_v62 = vpack.c.bf16 %v7912_v24, %v7911_v59  ;;  %v7950_v59 = vld [vmem:[%s16484_s5 + $0x5a8] sm:$0xff] }
 0x592   : > { %12080 = vmatpush3.bf16.msra.mxu1 %v12079_v31  ;;  %v7913_v31 = vld [vmem:[%s16484_s5 + $0x480] sm:$0xff] }
 0x593   : > { %12081 = vmatprep.subr.bf16.mxu1 %v12764_v20  ;;  %v12139_v10 = vpack.c.bf16 %v7914_v37, %v7913_v31  ;;  %v7952_v31 = vld [vmem:[%s16484_s5 + $0x5b8] sm:$0xff] }
 0x596   : > { %12083 = vmatpush3.bf16.msra.mxu1 %v12082_v0  ;;  %v15953_v0 = vmax.f32 %v15496_v47, 0.0  ;;  %v7917_v47 = vld [vmem:[%s16484_s5 + $0x4a0] sm:$0xff] }
 0x597   : > { %12084 = vmatprep.subr.bf16.mxu1 %v12764_v20  ;;  %v12145_v41 = vpack.c.bf16 %v7918_v12, %v7917_v47  ;;  %v7956_v47 = vld [vmem:[%s16484_s5 + $0x5d8] sm:$0xff] }
 0x598   : > { %v6486_v55 = vrot.slane %v15953_v0, 2  ;;  %v6576_v28 = vrot.slane %v15953_v0, 4 }
 0x59a   : > { %12086 = vmatpush3.bf16.msra.mxu1 %v12085_v50  ;;  %v12142_v50 = vpack.c.bf16 %v7916_v25, %v7915_v13  ;;  %v7954_v13 = vld [vmem:[%s16484_s5 + $0x5c8] sm:$0xff] }
 0x59b   : > { %12087 = vmatprep.subr.bf16.mxu1 %v12764_v20 }
 0x59e   : > { %12089 = vmatpush3.bf16.msra.mxu1 %v12088_v30  ;;  %v7919_v30 = vld [vmem:[%s16484_s5 + $0x4b0] sm:$0xff] }
 0x59f   : > { %12090 = vmatprep.subr.bf16.mxu1 %v12764_v20  ;;  %v12148_v3 = vpack.c.bf16 %v7920_v34, %v7919_v30  ;;  %v7958_v30 = vld [vmem:[%s16484_s5 + $0x5e8] sm:$0xff] }
 0x5a1   : > { %10738 = vmatmul.mubr.f32.vlgmr.msra.gmra.mrb[68].mxu1 %v6216_v15  ;;  %v7922_v15 = vld [vmem:[%s16484_s5 + $0x4c8] sm:$0xff] }
 0x5a2   : > { %12092 = vmatpush3.bf16.msra.mxu1 %v12091_v49  ;;  %10772 = vmatprep.mubr.msk.f32.mxu1 %vm12766_vm8, %v12765_v54  ;;  %v7921_v49 = vld [vmem:[%s16484_s5 + $0x4c0] sm:$0xff] }
 0x5a3   : > { %12093 = vmatprep.subr.bf16.mxu1 %v12764_v20  ;;  %v12151_v42 = vpack.c.bf16 %v7922_v15, %v7921_v49  ;;  %v7960_v49 = vld [vmem:[%s16484_s5 + $0x5f8] sm:$0xff] }
 0x5a6   : > { %12095 = vmatpush3.bf16.msra.mxu1 %v12094_v18  ;;  %v7924_v18 = vld [vmem:[%s16484_s5 + $0x4d8] sm:$0xff] }
 0x5a7   : > { %12096 = vmatprep.subr.bf16.mxu1 %v12764_v20  ;;  %v12154_v43 = vpack.c.bf16 %v7924_v18, %v7923_v17  ;;  %v7962_v17 = vld [vmem:[%s16484_s5 + $0x608] sm:$0xff] }
 0x5aa   : > { %12098 = vmatpush3.bf16.msra.mxu1 %v12097_v45  ;;  %v7926_v45 = vld [vmem:[%s16484_s5 + $0x4e8] sm:$0xff] }
 0x5ab   : > { %12099 = vmatprep.subr.bf16.mxu1 %v12764_v20  ;;  %v12157_v46 = vpack.c.bf16 %v7926_v45, %v7925_v48  ;;  %v7963_v48 = vld [vmem:[%s16484_s5 + $0x610] sm:$0xff]  ;;  %v7964_v45 = vld [vmem:[%s16484_s5 + $0x618] sm:$0xff] }
 0x5ae   : > { %12101 = vmatpush3.bf16.msra.mxu1 %v12100_v2  ;;  %v7928_v2 = vld [vmem:[%s16484_s5 + $0x4f8] sm:$0xff] }
 0x5af   : > { %12102 = vmatprep.subr.bf16.mxu1 %v12764_v20  ;;  %v12160_v21 = vpack.c.bf16 %v7928_v2, %v7927_v32  ;;  %v7966_v32 = vld [vmem:[%s16484_s5 + $0x628] sm:$0xff] }
 0x5b2   : > { %12104 = vmatpush3.bf16.msra.mxu1 %v12103_v8  ;;  %v7930_v8 = vld [vmem:[%s16484_s5 + $0x508] sm:$0xff] }
 0x5b3   : > { %12105 = vmatprep.subr.bf16.mxu1 %v12764_v20  ;;  %v12163_v39 = vpack.c.bf16 %v7930_v8, %v7929_v57  ;;  %v7968_v57 = vld [vmem:[%s16484_s5 + $0x638] sm:$0xff] }
 0x5b6   : > { %12107 = vmatpush3.bf16.msra.mxu1 %v12106_v29  ;;  %v7931_v29 = vld [vmem:[%s16484_s5 + $0x510] sm:$0xff] }
 0x5b7   : > { %12108 = vmatprep.subr.bf16.mxu1 %v12764_v20  ;;  %v12166_v56 = vpack.c.bf16 %v7932_v51, %v7931_v29  ;;  %v7971_v51 = vld [vmem:[%s16484_s5 + $0x650] sm:$0xff] }
 0x5ba   : > { %12110 = vmatpush3.bf16.msra.mxu1 %v12109_v4  ;;  %v7933_v4 = vld [vmem:[%s16484_s5 + $0x520] sm:$0xff] }
 0x5bb   : > { %12111 = vmatprep.subr.bf16.mxu1 %v12764_v20  ;;  %v12169_v40 = vpack.c.bf16 %v7934_v5, %v7933_v4  ;;  %v7973_v5 = vld [vmem:[%s16484_s5 + $0x660] sm:$0xff] }
 0x5be   : > { %12113 = vmatpush3.bf16.msra.mxu1 %v12112_v14  ;;  %v7935_v14 = vld [vmem:[%s16484_s5 + $0x530] sm:$0xff] }
 0x5bf   : > { %12114 = vmatprep.subr.bf16.mxu1 %v12764_v20  ;;  %v12172_v26 = vpack.c.bf16 %v7936_v19, %v7935_v14  ;;  %v7975_v19 = vld [vmem:[%s16484_s5 + $0x670] sm:$0xff] }
 0x5c1   : > { %10773 = vmatmul.mubr.f32.vlgmr.msra.gmra.mrb[68].mxu1 %v6306_v63  ;;  %v7938_v63 = vld [vmem:[%s16484_s5 + $0x548] sm:$0xff] }
 0x5c2   : > { %12116 = vmatpush3.bf16.msra.mxu1 %v12115_v23  ;;  %10807 = vmatprep.mubr.msk.f32.mxu1 %vm12766_vm8, %v12765_v54  ;;  %v7937_v23 = vld [vmem:[%s16484_s5 + $0x540] sm:$0xff] }
 0x5c3   : > { %12117 = vmatprep.subr.bf16.mxu1 %v12764_v20  ;;  %v12175_v44 = vpack.c.bf16 %v7938_v63, %v7937_v23  ;;  %v7977_v63 = vld [vmem:[%s16484_s5 + $0x680] sm:$0xff] }
 0x5c6   : > { %12119 = vmatpush3.bf16.msra.mxu1 %v12118_v1  ;;  %v7940_v1 = vld [vmem:[%s16484_s5 + $0x558] sm:$0xff] }
 0x5c7   : > { %12120 = vmatprep.subr.bf16.mxu1 %v12764_v20  ;;  %v12178_v60 = vpack.c.bf16 %v7940_v1, %v7939_v33  ;;  %v16192_v1 = vmax.f32 %v15506_v27, 0.0  ;;  %v7981_v27 = vld [vmem:[%s16484_s5 + $0x6a0] sm:$0xff] }
 0x5ca   : > { %12122 = vmatpush3.bf16.msra.mxu1 %v12121_v53  ;;  %v7942_v53 = vld [vmem:[%s16484_s5 + $0x568] sm:$0xff] }
 0x5cb   : > { %12123 = vmatprep.subr.bf16.mxu1 %v12764_v20  ;;  %v12181_v38 = vpack.c.bf16 %v7942_v53, %v7941_v36  ;;  %v7980_v36 = vld [vmem:[%s16484_s5 + $0x698] sm:$0xff] }
 0x5ce   : > { %12125 = vmatpush3.bf16.msra.mxu1 %v12124_v61  ;;  %v7944_v61 = vld [vmem:[%s16484_s5 + $0x578] sm:$0xff] }
 0x5cf   : > { %12126 = vmatprep.subr.bf16.mxu1 %v12764_v20  ;;  %v12184_v16 = vpack.c.bf16 %v7944_v61, %v7943_v11  ;;  %v7983_v61 = vld [vmem:[%s16484_s5 + $0x6b0] sm:$0xff] }
 0x5d2   : > { %12128 = vmatpush3.bf16.msra.mxu1 %v12127_v58  ;;  %v7946_v58 = vld [vmem:[%s16484_s5 + $0x588] sm:$0xff] }
 0x5d3   : > { %12129 = vmatprep.subr.bf16.mxu1 %v12764_v20  ;;  %v12187_v22 = vpack.c.bf16 %v7946_v58, %v7945_v9  ;;  %v7985_v58 = vld [vmem:[%s16484_s5 + $0x6c0] sm:$0xff] }
 0x5d6   : > { %12131 = vmatpush3.bf16.msra.mxu1 %v12130_v52  ;;  %v7947_v52 = vld [vmem:[%s16484_s5 + $0x590] sm:$0xff] }
 0x5d7   : > { %12132 = vmatprep.subr.bf16.mxu1 %v12764_v20  ;;  %v12190_v6 = vpack.c.bf16 %v7948_v7, %v7947_v52  ;;  %v7987_v52 = vld [vmem:[%s16484_s5 + $0x6d0] sm:$0xff]  ;;  %v7988_v7 = vld [vmem:[%s16484_s5 + $0x6d8] sm:$0xff] }
 0x5da   : > { %12134 = vmatpush3.bf16.msra.mxu1 %v12133_v35  ;;  %v7949_v35 = vld [vmem:[%s16484_s5 + $0x5a0] sm:$0xff] }
 0x5db   : > { %12135 = vmatprep.subr.bf16.mxu1 %v12764_v20  ;;  %v12193_v24 = vpack.c.bf16 %v7950_v59, %v7949_v35  ;;  %v7989_v35 = vld [vmem:[%s16484_s5 + $0x6e0] sm:$0xff]  ;;  %v7990_v59 = vld [vmem:[%s16484_s5 + $0x6e8] sm:$0xff] }
 0x5de   : > { %12137 = vmatpush3.bf16.msra.mxu1 %v12136_v62  ;;  %v7951_v62 = vld [vmem:[%s16484_s5 + $0x5b0] sm:$0xff] }
 0x5df   : > { %12138 = vmatprep.subr.bf16.mxu1 %v12764_v20  ;;  %v12196_v37 = vpack.c.bf16 %v7952_v31, %v7951_v62  ;;  %v7991_v62 = vld [vmem:[%s16484_s5 + $0x6f0] sm:$0xff]  ;;  %v7992_v31 = vld [vmem:[%s16484_s5 + $0x6f8] sm:$0xff] }
 0x5e1   : > { %10808 = vmatmul.mubr.f32.vlgmr.msra.gmra.mrb[68].mxu1 %v15953_v0 }
 0x5e2   : > { %12140 = vmatpush3.bf16.msra.mxu1 %v12139_v10  ;;  %10842 = vmatprep.mubr.msk.f32.mxu1 %vm12766_vm8, %v12765_v54  ;;  %v7953_v10 = vld [vmem:[%s16484_s5 + $0x5c0] sm:$0xff] }
 0x5e3   : > { %12141 = vmatprep.subr.bf16.mxu1 %v12764_v20  ;;  %v12199_v25 = vpack.c.bf16 %v7954_v13, %v7953_v10  ;;  %v7993_v10 = vld [vmem:[%s16484_s5 + $0x700] sm:$0xff]  ;;  %v7994_v13 = vld [vmem:[%s16484_s5 + $0x708] sm:$0xff] }
 0x5e6   : > { %12143 = vmatpush3.bf16.msra.mxu1 %v12142_v50  ;;  %v7955_v50 = vld [vmem:[%s16484_s5 + $0x5d0] sm:$0xff] }
 0x5e7   : > { %12144 = vmatprep.subr.bf16.mxu1 %v12764_v20  ;;  %v12202_v12 = vpack.c.bf16 %v7956_v47, %v7955_v50  ;;  %v6846_v50 = vrot.slane %v16192_v1, 2  ;;  %v7995_v47 = vld [vmem:[%s16484_s5 + $0x710] sm:$0xff] }
 0x5ea   : > { %12146 = vmatpush3.bf16.msra.mxu1 %v12145_v41  ;;  %v7957_v41 = vld [vmem:[%s16484_s5 + $0x5e0] sm:$0xff] }
 0x5eb   : > { %12147 = vmatprep.subr.bf16.mxu1 %v12764_v20  ;;  %v12205_v34 = vpack.c.bf16 %v7958_v30, %v7957_v41  ;;  %v7997_v30 = vld [vmem:[%s16484_s5 + $0x720] sm:$0xff] }
 0x5ee   : > { %12149 = vmatpush3.bf16.msra.mxu1 %v12148_v3  ;;  %v7959_v3 = vld [vmem:[%s16484_s5 + $0x5f0] sm:$0xff] }
 0x5ef   : > { %12150 = vmatprep.subr.bf16.mxu1 %v12764_v20  ;;  %v12208_v15 = vpack.c.bf16 %v7960_v49, %v7959_v3  ;;  %v7999_v49 = vld [vmem:[%s16484_s5 + $0x730] sm:$0xff] }
 0x5f2   : > { %12152 = vmatpush3.bf16.msra.mxu1 %v12151_v42  ;;  %v7961_v42 = vld [vmem:[%s16484_s5 + $0x600] sm:$0xff] }
 0x5f3   : > { %12153 = vmatprep.subr.bf16.mxu1 %v12764_v20  ;;  %v12211_v18 = vpack.c.bf16 %v7962_v17, %v7961_v42  ;;  %v8001_v17 = vld [vmem:[%s16484_s5 + $0x740] sm:$0xff] }
 0x5f6   : > { %12155 = vmatpush3.bf16.msra.mxu1 %v12154_v43  ;;  %v6666_v43 = vrot.slane %v15953_v0, 6  ;;  %v7965_v0 = vld [vmem:[%s16484_s5 + $0x620] sm:$0xff] }
 0x5f7   : > { %12156 = vmatprep.subr.bf16.mxu1 %v12764_v20  ;;  %v12217_v2 = vpack.c.bf16 %v7966_v32, %v7965_v0  ;;  %v8005_v0 = vld [vmem:[%s16484_s5 + $0x760] sm:$0xff]  ;;  %v8006_v32 = vld [vmem:[%s16484_s5 + $0x768] sm:$0xff] }
 0x5fa   : > { %12158 = vmatpush3.bf16.msra.mxu1 %v12157_v46  ;;  %v12214_v46 = vpack.c.bf16 %v7964_v45, %v7963_v48  ;;  %v8003_v48 = vld [vmem:[%s16484_s5 + $0x750] sm:$0xff]  ;;  %v8004_v45 = vld [vmem:[%s16484_s5 + $0x758] sm:$0xff] }
 0x5fb   : > { %12159 = vmatprep.subr.bf16.mxu1 %v12764_v20 }
 0x5fe   : > { %12161 = vmatpush3.bf16.msra.mxu1 %v12160_v21  ;;  %v7967_v21 = vld [vmem:[%s16484_s5 + $0x630] sm:$0xff] }
 0x5ff   : > { %12162 = vmatprep.subr.bf16.mxu1 %v12764_v20  ;;  %v12220_v8 = vpack.c.bf16 %v7968_v57, %v7967_v21  ;;  %v8007_v21 = vld [vmem:[%s16484_s5 + $0x770] sm:$0xff]  ;;  %v8008_v57 = vld [vmem:[%s16484_s5 + $0x778] sm:$0xff] }
 0x601   : > { %10843 = vmatmul.mubr.f32.vlgmr.msra.gmra.mrb[68].mxu1 %v6486_v55  ;;  %v7970_v55 = vld [vmem:[%s16484_s5 + $0x648] sm:$0xff] }
 0x602   : > { %12164 = vmatpush3.bf16.msra.mxu1 %v12163_v39  ;;  %10877 = vmatprep.mubr.msk.f32.mxu1 %vm12766_vm8, %v12765_v54  ;;  %v7969_v39 = vld [vmem:[%s16484_s5 + $0x640] sm:$0xff] }
 0x603   : > { %12165 = vmatprep.subr.bf16.mxu1 %v12764_v20  ;;  %v12223_v29 = vpack.c.bf16 %v7970_v55, %v7969_v39  ;;  %v8009_v39 = vld [vmem:[%s16484_s5 + $0x780] sm:$0xff]  ;;  %v8010_v55 = vld [vmem:[%s16484_s5 + $0x788] sm:$0xff] }
 0x606   : > { %12167 = vmatpush3.bf16.msra.mxu1 %v12166_v56  ;;  %v7972_v56 = vld [vmem:[%s16484_s5 + $0x658] sm:$0xff] }
 0x607   : > { %12168 = vmatprep.subr.bf16.mxu1 %v12764_v20  ;;  %v12226_v4 = vpack.c.bf16 %v7972_v56, %v7971_v51  ;;  %v6936_v51 = vrot.slane %v16192_v1, 4  ;;  %v8011_v56 = vld [vmem:[%s16484_s5 + $0x790] sm:$0xff] }
 0x60a   : > { %12170 = vmatpush3.bf16.msra.mxu1 %v12169_v40  ;;  %v7974_v40 = vld [vmem:[%s16484_s5 + $0x668] sm:$0xff] }
 0x60b   : > { %12171 = vmatprep.subr.bf16.mxu1 %v12764_v20  ;;  %v12229_v14 = vpack.c.bf16 %v7974_v40, %v7973_v5  ;;  %v8013_v40 = vld [vmem:[%s16484_s5 + $0x7a0] sm:$0xff] }
 0x60e   : > { %12173 = vmatpush3.bf16.msra.mxu1 %v12172_v26  ;;  %v7976_v26 = vld [vmem:[%s16484_s5 + $0x678] sm:$0xff] }
 0x60f   : > { %12174 = vmatprep.subr.bf16.mxu1 %v12764_v20  ;;  %v12232_v23 = vpack.c.bf16 %v7976_v26, %v7975_v19  ;;  %v8015_v26 = vld [vmem:[%s16484_s5 + $0x7b0] sm:$0xff] }
 0x612   : > { %12176 = vmatpush3.bf16.msra.mxu1 %v12175_v44  ;;  %v7978_v44 = vld [vmem:[%s16484_s5 + $0x688] sm:$0xff] }
 0x613   : > { %12177 = vmatprep.subr.bf16.mxu1 %v12764_v20  ;;  %v12235_v33 = vpack.c.bf16 %v7978_v44, %v7977_v63  ;;  %v8017_v44 = vld [vmem:[%s16484_s5 + $0x7c0] sm:$0xff] }
 0x616   : > { %12179 = vmatpush3.bf16.msra.mxu1 %v12178_v60  ;;  %v7979_v60 = vld [vmem:[%s16484_s5 + $0x690] sm:$0xff] }
 0x617   : > { %12180 = vmatprep.subr.bf16.mxu1 %v12764_v20  ;;  %v12238_v53 = vpack.c.bf16 %v7980_v36, %v7979_v60  ;;  %v8019_v36 = vld [vmem:[%s16484_s5 + $0x7d0] sm:$0xff] }
 0x61a   : > { %12182 = vmatpush3.bf16.msra.mxu1 %v12181_v38  ;;  %v7982_v38 = vld [vmem:[%s16484_s5 + $0x6a8] sm:$0xff] }
 0x61b   : > { %12183 = vmatprep.subr.bf16.mxu1 %v12764_v20  ;;  %v12241_v11 = vpack.c.bf16 %v7982_v38, %v7981_v27  ;;  %v8021_v38 = vld [vmem:[%s16484_s5 + $0x7e0] sm:$0xff] }
 0x61e   : > { %12185 = vmatpush3.bf16.msra.mxu1 %v12184_v16  ;;  %v7984_v16 = vld [vmem:[%s16484_s5 + $0x6b8] sm:$0xff] }
 0x61f   : > { %12186 = vmatprep.subr.bf16.mxu1 %v12764_v20  ;;  %v12244_v9 = vpack.c.bf16 %v7984_v16, %v7983_v61  ;;  %v8023_v16 = vld [vmem:[%s16484_s5 + $0x7f0] sm:$0xff] }
 0x621   : > { %10878 = vmatmul.mubr.f32.vlgmr.msra.gmra.mrb[68].mxu1 %v6576_v28 }
 0x622   : > { %12188 = vmatpush3.bf16.msra.mxu1 %v12187_v22  ;;  %10912 = vmatprep.mubr.msk.f32.mxu1 %vm12766_vm8, %v12765_v54  ;;  %v7986_v22 = vld [vmem:[%s16484_s5 + $0x6c8] sm:$0xff] }
 0x623   : > { %12189 = vmatprep.subr.bf16.mxu1 %v12764_v20  ;;  %v12247_v28 = vpack.c.bf16 %v7986_v22, %v7985_v58  ;;  %v7100_v22 = vld [vmem:[%s16486_s7] sm:$0xff] }
 0x626   : > { %12191 = vmatpush3.bf16.msra.mxu1 %v12190_v6  ;;  %v12250_v6 = vpack.c.bf16 %v7988_v7, %v7987_v52  ;;  %v7026_v7 = vrot.slane %v16192_v1, 6 }
 0x627   : > { %12192 = vmatprep.subr.bf16.mxu1 %v12764_v20 }
 0x62a   : > { %12194 = vmatpush3.bf16.msra.mxu1 %v12193_v24  ;;  %v12253_v24 = vpack.c.bf16 %v7990_v59, %v7989_v35  ;;  %v7103_v35 = vld [vmem:[%s16486_s7 + $0x18] sm:$0xff] }
 0x62b   : > { %12195 = vmatprep.subr.bf16.mxu1 %v12764_v20 }
 0x62e   : > { %12197 = vmatpush3.bf16.msra.mxu1 %v12196_v37  ;;  %v12256_v37 = vpack.c.bf16 %v7992_v31, %v7991_v62  ;;  %v7106_v31 = vld [vmem:[%s16486_s7 + $0x30] sm:$0xff] }
 0x62f   : > { %12198 = vmatprep.subr.bf16.mxu1 %v12764_v20 }
 0x632   : > { %12200 = vmatpush3.bf16.msra.mxu1 %v12199_v25  ;;  %v12259_v25 = vpack.c.bf16 %v7994_v13, %v7993_v10  ;;  %v7108_v10 = vld [vmem:[%s16486_s7 + $0x40] sm:$0xff]  ;;  %v7109_v13 = vld [vmem:[%s16486_s7 + $0x48] sm:$0xff] }
 0x633   : > { %12201 = vmatprep.subr.bf16.mxu1 %v12764_v20 }
 0x636   : > { %12203 = vmatpush3.bf16.msra.mxu1 %v12202_v12  ;;  %v7996_v12 = vld [vmem:[%s16484_s5 + $0x718] sm:$0xff] }
 0x637   : > { %12204 = vmatprep.subr.bf16.mxu1 %v12764_v20  ;;  %v12262_v41 = vpack.c.bf16 %v7996_v12, %v7995_v47  ;;  %v7111_v47 = vld [vmem:[%s16486_s7 + $0x58] sm:$0xff] }
 0x63a   : > { %12206 = vmatpush3.bf16.msra.mxu1 %v12205_v34  ;;  %v7998_v34 = vld [vmem:[%s16484_s5 + $0x728] sm:$0xff] }
 0x63b   : > { %12207 = vmatprep.subr.bf16.mxu1 %v12764_v20  ;;  %v12265_v3 = vpack.c.bf16 %v7998_v34, %v7997_v30  ;;  %v7113_v30 = vld [vmem:[%s16486_s7 + $0x68] sm:$0xff] }
 0x63e   : > { %12209 = vmatpush3.bf16.msra.mxu1 %v12208_v15  ;;  %v8000_v15 = vld [vmem:[%s16484_s5 + $0x738] sm:$0xff] }
 0x63f   : > { %12210 = vmatprep.subr.bf16.mxu1 %v12764_v20  ;;  %v12268_v42 = vpack.c.bf16 %v8000_v15, %v7999_v49  ;;  %v7115_v49 = vld [vmem:[%s16486_s7 + $0x78] sm:$0xff] }
 0x641   : > { %10913 = vmatmul.mubr.f32.vlgmr.msra.gmra.mrb[68].mxu1 %v6666_v43 }
 0x642   : > { %12212 = vmatpush3.bf16.msra.mxu1 %v12211_v18  ;;  %10947 = vmatprep.mubr.msk.f32.mxu1 %vm12766_vm8, %v12765_v54  ;;  %v8002_v18 = vld [vmem:[%s16484_s5 + $0x748] sm:$0xff] }
 0x643   : > { %12213 = vmatprep.subr.bf16.mxu1 %v12764_v20  ;;  %v12271_v43 = vpack.c.bf16 %v8002_v18, %v8001_v17 }
 0x646   : > { %12215 = vmatpush3.bf16.msra.mxu1 %v12214_v46  ;;  %v12274_v46 = vpack.c.bf16 %v8004_v45, %v8003_v48 }
 0x647   : > { %12216 = vmatprep.subr.bf16.mxu1 %v12764_v20 }
 0x64a   : > { %12218 = vmatpush3.bf16.msra.mxu1 %v12217_v2  ;;  %v12277_v2 = vpack.c.bf16 %v8006_v32, %v8005_v0 }
 0x64b   : > { %12219 = vmatprep.subr.bf16.mxu1 %v12764_v20 }
 0x64e   : > { %12221 = vmatpush3.bf16.msra.mxu1 %v12220_v8  ;;  %v12280_v8 = vpack.c.bf16 %v8008_v57, %v8007_v21 }
 0x64f   : > { %12222 = vmatprep.subr.bf16.mxu1 %v12764_v20 }
 0x652   : > { %12224 = vmatpush3.bf16.msra.mxu1 %v12223_v29  ;;  %v12283_v29 = vpack.c.bf16 %v8010_v55, %v8009_v39 }
 0x653   : > { %12225 = vmatprep.subr.bf16.mxu1 %v12764_v20 }
 0x656   : > { %12227 = vmatpush3.bf16.msra.mxu1 %v12226_v4  ;;  %v8012_v4 = vld [vmem:[%s16484_s5 + $0x798] sm:$0xff] }
 0x657   : > { %12228 = vmatprep.subr.bf16.mxu1 %v12764_v20  ;;  %v12286_v5 = vpack.c.bf16 %v8012_v4, %v8011_v56 }
 0x65a   : > { %12230 = vmatpush3.bf16.msra.mxu1 %v12229_v14  ;;  %v8014_v14 = vld [vmem:[%s16484_s5 + $0x7a8] sm:$0xff] }
 0x65b   : > { %12231 = vmatprep.subr.bf16.mxu1 %v12764_v20  ;;  %v12289_v19 = vpack.c.bf16 %v8014_v14, %v8013_v40 }
 0x65e   : > { %12233 = vmatpush3.bf16.msra.mxu1 %v12232_v23  ;;  %v8016_v23 = vld [vmem:[%s16484_s5 + $0x7b8] sm:$0xff] }
 0x65f   : > { %12234 = vmatprep.subr.bf16.mxu1 %v12764_v20  ;;  %v12292_v63 = vpack.c.bf16 %v8016_v23, %v8015_v26 }
 0x661   : > { %10948 = vmatmul.mubr.f32.vlgmr.msra.gmra.mrb[68].mxu1 %v16192_v1  ;;  %v7104_v1 = vld [vmem:[%s16486_s7 + $0x20] sm:$0xff] }
 0x662   : > { %12236 = vmatpush3.bf16.msra.mxu1 %v12235_v33  ;;  %10982 = vmatprep.mubr.msk.f32.mxu1 %vm12766_vm8, %v12765_v54  ;;  %v8018_v33 = vld [vmem:[%s16484_s5 + $0x7c8] sm:$0xff] }
 0x663   : > { %12237 = vmatprep.subr.bf16.mxu1 %v12764_v20  ;;  %v12295_v60 = vpack.c.bf16 %v8018_v33, %v8017_v44 }
 0x666   : > { %12239 = vmatpush3.bf16.msra.mxu1 %v12238_v53  ;;  %v8020_v53 = vld [vmem:[%s16484_s5 + $0x7d8] sm:$0xff] }
 0x667   : > { %12240 = vmatprep.subr.bf16.mxu1 %v12764_v20  ;;  %v12298_v27 = vpack.c.bf16 %v8020_v53, %v8019_v36 }
 0x66a   : > { %12242 = vmatpush3.bf16.msra.mxu1 %v12241_v11  ;;  %v8022_v11 = vld [vmem:[%s16484_s5 + $0x7e8] sm:$0xff] }
 0x66b   : > { %12243 = vmatprep.subr.bf16.mxu1 %v12764_v20  ;;  %v12301_v61 = vpack.c.bf16 %v8022_v11, %v8021_v38 }
 0x66e   : > { %12245 = vmatpush3.bf16.msra.mxu1 %v12244_v9  ;;  %v8024_v9 = vld [vmem:[%s16484_s5 + $0x7f8] sm:$0xff] }
 0x66f   : > { %12246 = vmatprep.subr.bf16.mxu1 %v12764_v20  ;;  %v12304_v58 = vpack.c.bf16 %v8024_v9, %v8023_v16 }
 0x672   : > { %12248 = vmatpush3.bf16.msra.mxu1 %v12247_v28  ;;  %v7101_v28 = vld [vmem:[%s16486_s7 + $0x8] sm:$0xff] }
 0x673   : > { %12249 = vmatprep.subr.bf16.mxu1 %v12764_v20  ;;  %v12307_v52 = vpack.c.bf16 %v7101_v28, %v7100_v22 }
 0x676   : > { %12251 = vmatpush3.bf16.msra.mxu1 %v12250_v6  ;;  %v7102_v6 = vld [vmem:[%s16486_s7 + $0x10] sm:$0xff] }
 0x677   : > { %12252 = vmatprep.subr.bf16.mxu1 %v12764_v20  ;;  %v12310_v59 = vpack.c.bf16 %v7103_v35, %v7102_v6 }
 0x67a   : > { %12254 = vmatpush3.bf16.msra.mxu1 %v12253_v24  ;;  %v7105_v24 = vld [vmem:[%s16486_s7 + $0x28] sm:$0xff] }
 0x67b   : > { %12255 = vmatprep.subr.bf16.mxu1 %v12764_v20  ;;  %v12313_v62 = vpack.c.bf16 %v7105_v24, %v7104_v1 }
 0x67e   : > { %12257 = vmatpush3.bf16.msra.mxu1 %v12256_v37 }
 0x67f   : > { %12258 = vmatprep.subr.bf16.mxu1 %v12764_v20 }
 0x681   : > { %10983 = vmatmul.mubr.f32.vlgmr.msra.gmra.mrb[68].mxu1 %v6846_v50  ;;  %v7110_v50 = vld [vmem:[%s16486_s7 + $0x50] sm:$0xff] }
 0x682   : > { %12260 = vmatpush3.bf16.msra.mxu1 %v12259_v25  ;;  %11017 = vmatprep.mubr.msk.f32.mxu1 %vm12766_vm8, %v12765_v54  ;;  %v12319_v25 = vpack.c.bf16 %v7109_v13, %v7108_v10  ;;  %v12322_v12 = vpack.c.bf16 %v7111_v47, %v7110_v50 }
 0x683   : > { %12261 = vmatprep.subr.bf16.mxu1 %v12764_v20 }
 0x686   : > { %12263 = vmatpush3.bf16.msra.mxu1 %v12262_v41  ;;  %v7112_v41 = vld [vmem:[%s16486_s7 + $0x60] sm:$0xff] }
 0x687   : > { %12264 = vmatprep.subr.bf16.mxu1 %v12764_v20  ;;  %v12325_v34 = vpack.c.bf16 %v7113_v30, %v7112_v41 }
 0x68a   : > { %12266 = vmatpush3.bf16.msra.mxu1 %v12265_v3  ;;  %v7114_v3 = vld [vmem:[%s16486_s7 + $0x70] sm:$0xff] }
 0x68b   : > { %12267 = vmatprep.subr.bf16.mxu1 %v12764_v20  ;;  %v12328_v15 = vpack.c.bf16 %v7115_v49, %v7114_v3 }
 0x68e   : > { %12269 = vmatpush3.bf16.msra.mxu1 %v12268_v42  ;;  %v5659_v42 = vld [vmem:[%s16485_s6] sm:$0x1] }
 0x68f   : > { %12270 = vmatprep.subr.bf16.mxu1 %v12764_v20 }
 0x692   : > { %12272 = vmatpush3.bf16.msra.mxu1 %v12271_v43 }
 0x693   : > { %12273 = vmatprep.subr.bf16.mxu1 %v12764_v20 }
 0x696   : > { %12275 = vmatpush3.bf16.msra.mxu1 %v12274_v46 }
 0x697   : > { %12276 = vmatprep.subr.bf16.mxu1 %v12764_v20 }
 0x69a   : > { %12278 = vmatpush3.bf16.msra.mxu1 %v12277_v2 }
 0x69b   : > { %12279 = vmatprep.subr.bf16.mxu1 %v12764_v20 }
 0x69e   : > { %12281 = vmatpush3.bf16.msra.mxu1 %v12280_v8 }
 0x69f   : > { %12282 = vmatprep.subr.bf16.mxu1 %v12764_v20 }
 0x6a1   : > { %11018 = vmatmul.mubr.f32.vlgmr.msra.gmra.mrb[68].mxu1 %v6936_v51 }
 0x6a2   : > { %12284 = vmatpush3.bf16.msra.mxu1 %v12283_v29  ;;  %11052 = vmatprep.mubr.msk.f32.mxu1 %vm12766_vm8, %v12765_v54 }
 0x6a3   : > { %12285 = vmatprep.subr.bf16.mxu1 %v12764_v20 }
 0x6a6   : > { %12287 = vmatpush3.bf16.msra.mxu1 %v12286_v5 }
 0x6a7   : > { %12288 = vmatprep.subr.bf16.mxu1 %v12764_v20 }
 0x6aa   : > { %12290 = vmatpush3.bf16.msra.mxu1 %v12289_v19 }
 0x6ab   : > { %12291 = vmatprep.subr.bf16.mxu1 %v12764_v20 }
 0x6ae   : > { %12293 = vmatpush3.bf16.msra.mxu1 %v12292_v63 }
 0x6af   : > { %12294 = vmatprep.subr.bf16.mxu1 %v12764_v20 }
 0x6b2   : > { %12296 = vmatpush3.bf16.msra.mxu1 %v12295_v60 }
 0x6b3   : > { %12297 = vmatprep.subr.bf16.mxu1 %v12764_v20 }
 0x6b6   : > { %12299 = vmatpush3.bf16.msra.mxu1 %v12298_v27 }
 0x6b7   : > { %12300 = vmatprep.subr.bf16.mxu1 %v12764_v20 }
 0x6ba   : > { %12302 = vmatpush3.bf16.msra.mxu1 %v12301_v61 }
 0x6bb   : > { %12303 = vmatprep.subr.bf16.mxu1 %v12764_v20 }
 0x6be   : > { %12305 = vmatpush3.bf16.msra.mxu1 %v12304_v58 }
 0x6bf   : > { %12306 = vmatprep.subr.bf16.mxu1 %v12764_v20 }
 0x6c1   : > { %11053 = vmatmul.mubr.f32.vlgmr.msra.gmra.mrb[68].mxu1 %v7026_v7 }
 0x6c2   : > { %12308 = vmatpush3.bf16.msra.mxu1 %v12307_v52  ;;  %11087 = vmatprep.mubr.msk.f32.mxu1 %vm12766_vm8, %v12765_v54  ;;  %v7107_v54 = vld [vmem:[%s16486_s7 + $0x38] sm:$0xff] }
 0x6c3   : > { %12309 = vmatprep.subr.bf16.mxu1 %v12764_v20  ;;  %v12316_v37 = vpack.c.bf16 %v7107_v54, %v7106_v31 }
 0x6c6   : > { %12311 = vmatpush3.bf16.msra.mxu1 %v12310_v59 }
 0x6c7   : > { %12312 = vmatprep.subr.bf16.mxu1 %v12764_v20 }
 0x6ca   : > { %12314 = vmatpush3.bf16.msra.mxu1 %v12313_v62 }
 0x6cb   : > { %12315 = vmatprep.subr.bf16.mxu1 %v12764_v20 }
 0x6ce   : > { %12317 = vmatpush3.bf16.msra.mxu1 %v12316_v37 }
 0x6cf   : > { %12318 = vmatprep.subr.bf16.mxu1 %v12764_v20 }
 0x6d2   : > { %12320 = vmatpush3.bf16.msra.mxu1 %v12319_v25 }
 0x6d3   : > { %12321 = vmatprep.subr.bf16.mxu1 %v12764_v20 }
 0x6d6   : > { %12323 = vmatpush3.bf16.msra.mxu1 %v12322_v12 }
 0x6d7   : > { %12324 = vmatprep.subr.bf16.mxu1 %v12764_v20 }
 0x6da   : > { %12326 = vmatpush3.bf16.msra.mxu1 %v12325_v34 }
 0x6db   : > { %12327 = vmatprep.subr.bf16.mxu1 %v12764_v20  ;;  %v7116_v20 = vld [vmem:[%s16487_s8] sm:$0x1] }
 0x6de   : > { %12329 = vmatpush3.bf16.msra.mxu1 %v12328_v15 }
 0x794   : > { %v7094_v17 = vpop.f32.mrb[68].mxu1 }
 0x795   : > { %v12346_v18 = vadd.f32 %v7094_v17, %v5659_v42  ;;  %v11054_v43 = vpop.f32.mrb[69].mxu1 }
 0x797   : > { %v7099_v48 = vmax.f32 %v12346_v18, 0.0 }
 0x799   : > { %11088 = vmatmul.mubr.f32.vlgmr.msra.gmra.mrb[70].mxu1 %v7099_v48 }
 0x86c   : > { %v7183_v45 = vpop.f32.mrb[70].mxu1 }
 0x86d   : > { %v7184_v46 = vadd.f32 %v7183_v45, %v7116_v20  ;;  %v11089_v0 = vpop.f32.mrb[71].mxu1 }
 0x86f   : > { %v7187_v32 = vsel %vm2812_vm7, %v7184_v46, -inf }
 0x870   : > { %7188 = vmax.xlane.f32.xlu0 %v7187_v32 }
 0x8fd   : > { %v7189_v2 = vpop.xlane.xlu0 %7188 }
 0x8fe   : > { %v7190_v21 = vsub.f32 %v7184_v46, %v7189_v2 }
 0x900   : > { %v7191_v57 = vmul.f32 1.442695, %v7190_v21 }
 0x902   : > { %12696 = vpow2.f32 %v7191_v57 }
 0x90c   : > { %v12697_v8 = vpop.eup %12696 }
 0x90d   : > { %v7193_v39 = vsel %vm2812_vm7, %v12697_v8, 0.0 }
 0x90e   : > { %7194 = vadd.xlane.f32.xlu0 %v7193_v39 }
 0x99b   : > { %v7195_v55 = vpop.xlane.xlu0 %7194 }
 0x99c   : > { %12698 = vlog2.f32 %v7195_v55 }
 0x9a6   : > { %v12699_v29 = vpop.eup %12698 }
 0x9a7   : > { %v7197_v51 = vmul.f32 0.6931472, %v12699_v29 }
 0x9a9   : > { %v7198_v56 = vsub.f32 %v7190_v21, %v7197_v51 }
 0x9ab   : > { %7199 = vst [vmem:[%s324_s17] sm:$0x1] %v7198_v56 }
 0x9ac   : > { %12713 = shalt.err (!%p12710_p3)
}
 0x9ad   : > { %s12714_s29 = scalar_lea.hbm %s16437_s24, 16  ;;  %s12718_s17 = scalar_lea.hbm %s16488_s9, 32 }
 0x9ae   : > { %p12715_p4 = scmp.ne.s32.totalorder %s16437_s24, %s12714_s29  ;;  %p12719_p9 = scmp.lt.u32.totalorder %s16437_s24, %s16488_s9 }
 0x9af   : > { %p12720_p10 = scmp.lt.u32.totalorder %s12718_s17, %s12714_s29  ;;  %p12722_p12 = scmp.lt.u32.totalorder %s12714_s29, %s16437_s24 }
 0x9b0   : > { %p12716_p7 = pnand %p12715_p4, %p12856_p5 }
 0x9b1   : > { %p12721_p11 = por %p12720_p10, %p12719_p9 }
 0x9b2   : > { %p12717_p8 = pneg %p12716_p7 }
 0x9b3   : > { %p12723_p13 = por %p12722_p12, %p12721_p11 }
 0x9b5   : > { %p12724_p0 = pnand %p12723_p13, %p12717_p8 }
 0x9b7   : > { %12727 = shalt.err (!%p12724_p0)
}
 0x9b8   : > { %12654 = dma.vmem_to_hbm [thread:$0]  (%p12856_p5), %s16439_s21, 16, %s16437_s24, %s7201_s25  }
 0x9b9 PF: > { %p12660_p1 = scmp.ge.s32.totalorder %s12762_s12, 2  ;;  %s7225_s26 = sand.u32 1, %s12750_s30  }
 0x9ba   : > { %s7226_s13 = scalar_lea.sflag [#allocation3], %s7225_s26 }
 0x9bb   : > { %p12657_p2 = pnand %p12660_p1, %p12860_p6 }
 0x9bd   : > { %12745 = dma.done.wait (!%p12657_p2), %s7226_s13, 16  }
 0x9be   : > { %12747 = vsyncadd (!%p12657_p2), %s7226_s13, 4294967280  ;;  %p19_p3 = scmp.ge.s32.totalorder %s12843_s15, 4   ;;  %s16700_s30 = smov %s12754_s10 }
 0x9bf   : > { %s16701_s10 = smov %s12758_s11  ;;  %s16702_s11 = smov %s12854_s18 }
 0x9c0   : > { %s16703_s12 = smov %s12843_s15  ;;  %21 = sbr.rel (!%p19_p3) target bundleno = 3 (0x3), region = 133 }
 0x9c7   :  { %7230 = vsyncpa [#allocation3], 1 }
 0x9c8   :  { %7232 = vsyncpa [#allocation3 + $0x1], 1 }

</bundles_post_ra>
